<compile_context>
chip_gen: v7x
topology: tpu7x:2x2x1
jax: 0.10.0
libtpu: 0.0.40
codegen_flags: <defaults>
</compile_context>

<pallas_src>
import functools

import jax
import jax.numpy as jnp
from jax.experimental import pallas as pl
from jax.experimental.pallas import tpu as pltpu

NUM_FEATURES = 16
DIM = 32
NODES_PER_GRAPH = 64
NUM_LAYERS = 3
NUM_CLASSES = 2
BN_EPS = 1e-5
GRAPHS_PER_BLOCK = 4          # 4 graphs -> K = 256 aggregation tile (use 2 on v5e)

_VMEM = pl.BlockSpec(memory_space=pltpu.MemorySpace.VMEM)


# ----------------------------------------------------------------------------
# Fused kernel: one grid step == one group of G graphs
# ----------------------------------------------------------------------------
def gin_fused_kernel(a_ref, x_ref, sel_ref, w1_0_ref, w1_ref, b1_ref, w2_ref,
                     b2_ref, scale_ref, shift_ref, fcw_ref, fcb_ref, o_ref):
    a = a_ref[0]                          # (G*64, G*64) bf16 block-diag A + (1+eps)I
    h = x_ref[0]                          # (G*64, 16)   bf16 node features
    for l in range(NUM_LAYERS):           # static unroll; h stays VMEM/vreg-resident
        # Neighborhood aggregation for all G graphs in one MXU matmul (f32 acc).
        agg = jnp.dot(a, h, preferred_element_type=jnp.float32)
        w1 = w1_0_ref[...] if l == 0 else w1_ref[l - 1]
        t = jnp.dot(agg.astype(jnp.bfloat16), w1,
                    preferred_element_type=jnp.float32) + b1_ref[l]
        t = jnp.maximum(t, 0.0)                                   # MLP inner ReLU
        t = jnp.dot(t.astype(jnp.bfloat16), w2_ref[l],
                    preferred_element_type=jnp.float32) + b2_ref[l]
        t = jnp.maximum(t, 0.0)                                   # outer F.relu(conv)
        h = (t * scale_ref[l] + shift_ref[l]).astype(jnp.bfloat16)  # folded BN (eval)
    # Per-graph sum-pool for the whole group: block-diag ones selector on the MXU.
    pooled = jnp.dot(sel_ref[...], h, preferred_element_type=jnp.float32)   # (G, 32)
    # Dropout(p=0.3) is identity in eval mode.
    logits = jnp.dot(pooled.astype(jnp.bfloat16), fcw_ref[...],
                     preferred_element_type=jnp.float32) + fcb_ref[...]      # (G, 2)
    m = jnp.max(logits, axis=-1, keepdims=True)
    lse = m + jnp.log(jnp.sum(jnp.exp(logits - m), axis=-1, keepdims=True))
    o_ref[0] = logits - lse                                                  # log_softmax


# ----------------------------------------------------------------------------
# Wrapper: group G graphs per grid step, block-diagonal pack, bf16 cast
# ----------------------------------------------------------------------------
@functools.partial(jax.jit, static_argnames=("graphs_per_block",))
def gin_forward(x, a_graph, params, *, graphs_per_block=GRAPHS_PER_BLOCK):
    batch = x.shape[0]
    g = min(graphs_per_block, batch)
    num_groups = -(-batch // g)
    pad = num_groups * g - batch
    if pad:                                   # pad with empty graphs, drop at the end
        x = jnp.pad(x, ((0, pad), (0, 0), (0, 0)))
        a_graph = jnp.pad(a_graph, ((0, pad), (0, 0), (0, 0)))
    gn = g * NODES_PER_GRAPH

    # Host-side block-diagonal pack: g graphs -> one (gn, gn) aggregation tile.
    a_blk = jnp.einsum(
        "bgij,gh->bgihj",
        a_graph.reshape(num_groups, g, NODES_PER_GRAPH, NODES_PER_GRAPH),
        jnp.eye(g, dtype=a_graph.dtype),
    ).reshape(num_groups, gn, gn).astype(jnp.bfloat16)
    x_blk = x.reshape(num_groups, gn, NUM_FEATURES).astype(jnp.bfloat16)
    # Sum-pool selector: sel[g, g*64:(g+1)*64] = 1.
    sel = jnp.repeat(jnp.eye(g, dtype=jnp.float32), NODES_PER_GRAPH,
                     axis=1).astype(jnp.bfloat16)                    # (g, gn)

    out = pl.pallas_call(
        gin_fused_kernel,
        out_shape=jax.ShapeDtypeStruct((num_groups, g, NUM_CLASSES), jnp.float32),
        grid=(num_groups,),
        in_specs=[
            pl.BlockSpec((1, gn, gn), lambda b: (b, 0, 0)),
            pl.BlockSpec((1, gn, NUM_FEATURES), lambda b: (b, 0, 0)),
            _VMEM, _VMEM, _VMEM, _VMEM, _VMEM, _VMEM, _VMEM, _VMEM, _VMEM, _VMEM,
        ],
        out_specs=pl.BlockSpec((1, g, NUM_CLASSES), lambda b: (b, 0, 0)),
        compiler_params=pltpu.CompilerParams(dimension_semantics=("parallel",)),
    )(a_blk, x_blk, sel, params["w1_0"], params["w1_rest"], params["b1"],
      params["w2"], params["b2"], params["scale"], params["shift"],
      params["fc2_w"], params["fc2_b"])
    return out.reshape(num_groups * g, NUM_CLASSES)[:batch]


# ----------------------------------------------------------------------------
# Parameter / graph setup (plain JAX glue, host-side)
# ----------------------------------------------------------------------------
def init_linear(key, fan_in, fan_out):
    kw, kb = jax.random.split(key)
    bound = 1.0 / jnp.sqrt(fan_in)
    w = jax.random.uniform(kw, (fan_in, fan_out), jnp.float32, -bound, bound)
    b = jax.random.uniform(kb, (1, fan_out), jnp.float32, -bound, bound)
    return w, b


def init_gin_params(key, in_dim):
    k1, k2, kg, kb = jax.random.split(key, 4)
    w1, b1 = init_linear(k1, in_dim, DIM)
    w2, b2 = init_linear(k2, DIM, DIM)
    gamma = 1.0 + 0.1 * jax.random.normal(kg, (1, DIM), jnp.float32)
    beta = 0.1 * jax.random.normal(kb, (1, DIM), jnp.float32)
    mean = jnp.zeros((1, DIM), jnp.float32)      # BatchNorm1d running_mean init
    var = jnp.ones((1, DIM), jnp.float32)        # BatchNorm1d running_var init
    return (w1, b1, w2, b2, gamma, beta, mean, var)


def pack_params(layers, fc2_w, fc2_b):
    """Fold BN into (scale, shift); keep layer-0 W1 at (16, 32); cast weights bf16."""
    b1s, w2s, b2s, scs, shs, w1_rest = [], [], [], [], [], []
    w1_0 = None
    for i, (w1, b1, w2, b2, gamma, beta, mean, var) in enumerate(layers):
        scale = gamma * jax.lax.rsqrt(var + BN_EPS)
        shift = beta - mean * scale
        if i == 0:
            w1_0 = w1.astype(jnp.bfloat16)
        else:
            w1_rest.append(w1.astype(jnp.bfloat16))
        b1s.append(b1); w2s.append(w2.astype(jnp.bfloat16)); b2s.append(b2)
        scs.append(scale); shs.append(shift)
    return dict(
        w1_0=w1_0,                       # (16, 32) bf16
        w1_rest=jnp.stack(w1_rest),      # (2, 32, 32) bf16
        b1=jnp.stack(b1s),               # (3, 1, 32) f32
        w2=jnp.stack(w2s),               # (3, 32, 32) bf16
        b2=jnp.stack(b2s),               # (3, 1, 32) f32
        scale=jnp.stack(scs),            # (3, 1, 32) f32
        shift=jnp.stack(shs),            # (3, 1, 32) f32
        fc2_w=fc2_w.astype(jnp.bfloat16),  # (32, 2) bf16
        fc2_b=fc2_b,                     # (1, 2) f32
    )


def build_a_blocks(edge_index, batch):
    # Per-graph adjacency blocks. PyG convention: edge_index[0]=source,
    # edge_index[1]=target; messages summed at target; duplicate edges accumulate.
    # Assumes 64 contiguously numbered nodes per graph (as in the reference forward).
    src, dst = edge_index[0], edge_index[1]
    gidx = dst // NODES_PER_GRAPH
    a = jnp.zeros((batch, NODES_PER_GRAPH, NODES_PER_GRAPH), jnp.float32)
    a = a.at[gidx, dst % NODES_PER_GRAPH, src % NODES_PER_GRAPH].add(1.0)
    return a + jnp.eye(NODES_PER_GRAPH, dtype=jnp.float32)[None]  # + (1+eps) I, eps=0


def gin_reference(x, a_graph, layer_params, fc2_w, fc2_b):
    """Pure-JAX f32 reference for a parity sanity check."""
    h = x
    for (w1, b1, w2, b2, gamma, beta, mean, var) in layer_params:
        agg = jnp.einsum("bij,bjd->bid", a_graph, h)
        t = jnp.maximum(agg @ w1 + b1, 0.0)
        t = t @ w2 + b2
        t = jnp.maximum(t, 0.0)
        h = (t - mean) * gamma * jax.lax.rsqrt(var + BN_EPS) + beta
    pooled = h.sum(axis=1)
    logits = pooled @ fc2_w + fc2_b
    return jax.nn.log_softmax(logits, axis=-1)


# ----------------------------------------------------------------------------
if __name__ == "__main__":
    batch = 8                                       # 8 graphs x 64 nodes = 512 nodes

    key = jax.random.PRNGKey(0)
    kx, k1, k2, k3, kf = jax.random.split(key, 5)

    # Node features: (batch, 64, 16)  (reference reshapes (-1, 16) internally).
    x = jax.random.normal(kx, (batch, NODES_PER_GRAPH, NUM_FEATURES), jnp.float32)

    # Deterministic bidirectional ring graph inside each graph.
    offsets = jnp.repeat(jnp.arange(batch) * NODES_PER_GRAPH, NODES_PER_GRAPH)
    local = jnp.tile(jnp.arange(NODES_PER_GRAPH), batch)
    nxt = jnp.tile((jnp.arange(NODES_PER_GRAPH) + 1) % NODES_PER_GRAPH, batch)
    src = jnp.concatenate([local + offsets, nxt + offsets]).astype(jnp.int32)
    dst = jnp.concatenate([nxt + offsets, local + offsets]).astype(jnp.int32)
    edge_index = jnp.stack([src, dst])              # (2, 1024)

    a_graph = build_a_blocks(edge_index, batch)     # (8, 64, 64)

    layer_params = [
        init_gin_params(k1, NUM_FEATURES),
        init_gin_params(k2, DIM),
        init_gin_params(k3, DIM),
    ]
    fc2_w, fc2_b = init_linear(kf, DIM, NUM_CLASSES)
    params = pack_params(layer_params, fc2_w, fc2_b)
    # TODO(synk): fc1 (Linear(dim, dim)) exists in __init__ but is unused in forward(); omitted.

    out = gin_forward(x, a_graph, params)
    jax.block_until_ready(out)

    assert out.shape == (batch, NUM_CLASSES)
    assert bool(jnp.all(jnp.isfinite(out)))
    # log_softmax rows must exponentiate-sum to 1
    assert bool(jnp.allclose(jnp.sum(jnp.exp(out), axis=-1), 1.0, atol=1e-4))
    # Parity vs f32 pure-JAX reference (loose tolerance: bf16 MXU operands).
    ref = gin_reference(x, a_graph, layer_params, fc2_w, fc2_b)
    assert bool(jnp.max(jnp.abs(out - ref)) < 0.1)
    print("KERNEL_OK")
</pallas_src>

<mosaic_0001>
module attributes {stable_mosaic.version = 11 : i64} {
  func.func @gin_fused_kernel(%arg0: i32, %arg1: memref<1x256x256xbf16, #tpu.memory_space<vmem>>, %arg2: memref<1x256x16xbf16, #tpu.memory_space<vmem>>, %arg3: memref<4x256xbf16, #tpu.memory_space<vmem>>, %arg4: memref<16x32xbf16, #tpu.memory_space<vmem>>, %arg5: memref<2x32x32xbf16, #tpu.memory_space<vmem>>, %arg6: memref<3x1x32xf32, #tpu.memory_space<vmem>>, %arg7: memref<3x32x32xbf16, #tpu.memory_space<vmem>>, %arg8: memref<3x1x32xf32, #tpu.memory_space<vmem>>, %arg9: memref<3x1x32xf32, #tpu.memory_space<vmem>>, %arg10: memref<3x1x32xf32, #tpu.memory_space<vmem>>, %arg11: memref<32x2xbf16, #tpu.memory_space<vmem>>, %arg12: memref<1x2xf32, #tpu.memory_space<vmem>>, %arg13: memref<1x4x2xf32, #tpu.memory_space<vmem>>) attributes {dimension_semantics = [#tpu.dimension_semantics<parallel>], iteration_bounds = array<i64: 2>, scalar_prefetch = 0 : i64, scratch_operands = 0 : i64, tpu.core_type = #tpu.core_type<tc>, window_params = [{transform_indices = @transform_0, window_bounds = array<i64: 1, 256, 256>}, {transform_indices = @transform_1, window_bounds = array<i64: 1, 256, 16>}, {pipeline_mode = #tpu.pipeline_mode<synchronous>, transform_indices = @transform_2, window_bounds = array<i64: 4, 256>}, {pipeline_mode = #tpu.pipeline_mode<synchronous>, transform_indices = @transform_3, window_bounds = array<i64: 16, 32>}, {pipeline_mode = #tpu.pipeline_mode<synchronous>, transform_indices = @transform_4, window_bounds = array<i64: 2, 32, 32>}, {pipeline_mode = #tpu.pipeline_mode<synchronous>, transform_indices = @transform_5, window_bounds = array<i64: 3, 1, 32>}, {pipeline_mode = #tpu.pipeline_mode<synchronous>, transform_indices = @transform_6, window_bounds = array<i64: 3, 32, 32>}, {pipeline_mode = #tpu.pipeline_mode<synchronous>, transform_indices = @transform_7, window_bounds = array<i64: 3, 1, 32>}, {pipeline_mode = #tpu.pipeline_mode<synchronous>, transform_indices = @transform_8, window_bounds = array<i64: 3, 1, 32>}, {pipeline_mode = #tpu.pipeline_mode<synchronous>, transform_indices = @transform_9, window_bounds = array<i64: 3, 1, 32>}, {pipeline_mode = #tpu.pipeline_mode<synchronous>, transform_indices = @transform_10, window_bounds = array<i64: 32, 2>}, {pipeline_mode = #tpu.pipeline_mode<synchronous>, transform_indices = @transform_11, window_bounds = array<i64: 1, 2>}, {transform_indices = @transform_12, window_bounds = array<i64: 1, 4, 2>}]} {
    %c0 = arith.constant 0 : index
    %c0_0 = arith.constant 0 : index
    %c0_1 = arith.constant 0 : index
    %0 = vector.load %arg1[%c0, %c0_0, %c0_1] : memref<1x256x256xbf16, #tpu.memory_space<vmem>>, vector<1x256x256xbf16>
    %1 = vector.shape_cast %0 : vector<1x256x256xbf16> to vector<256x256xbf16>
    %c0_2 = arith.constant 0 : index
    %c0_3 = arith.constant 0 : index
    %c0_4 = arith.constant 0 : index
    %2 = vector.load %arg2[%c0_2, %c0_3, %c0_4] : memref<1x256x16xbf16, #tpu.memory_space<vmem>>, vector<1x256x16xbf16>
    %3 = vector.shape_cast %2 : vector<1x256x16xbf16> to vector<256x16xbf16>
    %cst = arith.constant dense<0.000000e+00> : vector<256x16xf32>
    %4 = tpu.matmul %1, %3, %cst {dimension_numbers = #tpu.dot_dimension_numbers<[1], [0], [0], [1], [0, 0, 1, 1], [], []>} : vector<256x256xbf16>, vector<256x16xbf16>, vector<256x16xf32> -> vector<256x16xf32>
    %c0_5 = arith.constant 0 : index
    %c0_6 = arith.constant 0 : index
    %5 = vector.load %arg4[%c0_5, %c0_6] : memref<16x32xbf16, #tpu.memory_space<vmem>>, vector<16x32xbf16>
    %6 = arith.truncf %4 : vector<256x16xf32> to vector<256x16xbf16>
    %cst_7 = arith.constant dense<0.000000e+00> : vector<256x32xf32>
    %7 = tpu.matmul %6, %5, %cst_7 {dimension_numbers = #tpu.dot_dimension_numbers<[1], [0], [0], [1], [0, 0, 1, 1], [], []>} : vector<256x16xbf16>, vector<16x32xbf16>, vector<256x32xf32> -> vector<256x32xf32>
    %c0_8 = arith.constant 0 : index
    %c0_9 = arith.constant 0 : index
    %c0_10 = arith.constant 0 : index
    %8 = vector.load %arg6[%c0_8, %c0_9, %c0_10] : memref<3x1x32xf32, #tpu.memory_space<vmem>>, vector<1x1x32xf32>
    %9 = vector.shape_cast %8 : vector<1x1x32xf32> to vector<1x32xf32>
    %10 = vector.broadcast %9 : vector<1x32xf32> to vector<256x32xf32>
    %11 = arith.addf %7, %10 : vector<256x32xf32>
    %cst_11 = arith.constant 0.000000e+00 : f32
    %12 = vector.broadcast %cst_11 : f32 to vector<256x32xf32>
    %13 = arith.maximumf %11, %12 : vector<256x32xf32>
    %14 = arith.truncf %13 : vector<256x32xf32> to vector<256x32xbf16>
    %c0_12 = arith.constant 0 : index
    %c0_13 = arith.constant 0 : index
    %c0_14 = arith.constant 0 : index
    %15 = vector.load %arg7[%c0_12, %c0_13, %c0_14] : memref<3x32x32xbf16, #tpu.memory_space<vmem>>, vector<1x32x32xbf16>
    %16 = vector.shape_cast %15 : vector<1x32x32xbf16> to vector<32x32xbf16>
    %cst_15 = arith.constant dense<0.000000e+00> : vector<256x32xf32>
    %17 = tpu.matmul %14, %16, %cst_15 {dimension_numbers = #tpu.dot_dimension_numbers<[1], [0], [0], [1], [0, 0, 1, 1], [], []>} : vector<256x32xbf16>, vector<32x32xbf16>, vector<256x32xf32> -> vector<256x32xf32>
    %c0_16 = arith.constant 0 : index
    %c0_17 = arith.constant 0 : index
    %c0_18 = arith.constant 0 : index
    %18 = vector.load %arg8[%c0_16, %c0_17, %c0_18] : memref<3x1x32xf32, #tpu.memory_space<vmem>>, vector<1x1x32xf32>
    %19 = vector.shape_cast %18 : vector<1x1x32xf32> to vector<1x32xf32>
    %20 = vector.broadcast %19 : vector<1x32xf32> to vector<256x32xf32>
    %21 = arith.addf %17, %20 : vector<256x32xf32>
    %cst_19 = arith.constant 0.000000e+00 : f32
    %22 = vector.broadcast %cst_19 : f32 to vector<256x32xf32>
    %23 = arith.maximumf %21, %22 : vector<256x32xf32>
    %c0_20 = arith.constant 0 : index
    %c0_21 = arith.constant 0 : index
    %c0_22 = arith.constant 0 : index
    %24 = vector.load %arg9[%c0_20, %c0_21, %c0_22] : memref<3x1x32xf32, #tpu.memory_space<vmem>>, vector<1x1x32xf32>
    %25 = vector.shape_cast %24 : vector<1x1x32xf32> to vector<1x32xf32>
    %26 = vector.broadcast %25 : vector<1x32xf32> to vector<256x32xf32>
    %27 = arith.mulf %23, %26 : vector<256x32xf32>
    %c0_23 = arith.constant 0 : index
    %c0_24 = arith.constant 0 : index
    %c0_25 = arith.constant 0 : index
    %28 = vector.load %arg10[%c0_23, %c0_24, %c0_25] : memref<3x1x32xf32, #tpu.memory_space<vmem>>, vector<1x1x32xf32>
    %29 = vector.shape_cast %28 : vector<1x1x32xf32> to vector<1x32xf32>
    %30 = vector.broadcast %29 : vector<1x32xf32> to vector<256x32xf32>
    %31 = arith.addf %27, %30 : vector<256x32xf32>
    %32 = arith.truncf %31 : vector<256x32xf32> to vector<256x32xbf16>
    %cst_26 = arith.constant dense<0.000000e+00> : vector<256x32xf32>
    %33 = tpu.matmul %1, %32, %cst_26 {dimension_numbers = #tpu.dot_dimension_numbers<[1], [0], [0], [1], [0, 0, 1, 1], [], []>} : vector<256x256xbf16>, vector<256x32xbf16>, vector<256x32xf32> -> vector<256x32xf32>
    %c0_27 = arith.constant 0 : index
    %c0_28 = arith.constant 0 : index
    %c0_29 = arith.constant 0 : index
    %34 = vector.load %arg5[%c0_27, %c0_28, %c0_29] : memref<2x32x32xbf16, #tpu.memory_space<vmem>>, vector<1x32x32xbf16>
    %35 = vector.shape_cast %34 : vector<1x32x32xbf16> to vector<32x32xbf16>
    %36 = arith.truncf %33 : vector<256x32xf32> to vector<256x32xbf16>
    %cst_30 = arith.constant dense<0.000000e+00> : vector<256x32xf32>
    %37 = tpu.matmul %36, %35, %cst_30 {dimension_numbers = #tpu.dot_dimension_numbers<[1], [0], [0], [1], [0, 0, 1, 1], [], []>} : vector<256x32xbf16>, vector<32x32xbf16>, vector<256x32xf32> -> vector<256x32xf32>
    %c1 = arith.constant 1 : index
    %c0_31 = arith.constant 0 : index
    %c0_32 = arith.constant 0 : index
    %38 = vector.load %arg6[%c1, %c0_31, %c0_32] : memref<3x1x32xf32, #tpu.memory_space<vmem>>, vector<1x1x32xf32>
    %39 = vector.shape_cast %38 : vector<1x1x32xf32> to vector<1x32xf32>
    %40 = vector.broadcast %39 : vector<1x32xf32> to vector<256x32xf32>
    %41 = arith.addf %37, %40 : vector<256x32xf32>
    %cst_33 = arith.constant 0.000000e+00 : f32
    %42 = vector.broadcast %cst_33 : f32 to vector<256x32xf32>
    %43 = arith.maximumf %41, %42 : vector<256x32xf32>
    %44 = arith.truncf %43 : vector<256x32xf32> to vector<256x32xbf16>
    %c1_34 = arith.constant 1 : index
    %c0_35 = arith.constant 0 : index
    %c0_36 = arith.constant 0 : index
    %45 = vector.load %arg7[%c1_34, %c0_35, %c0_36] : memref<3x32x32xbf16, #tpu.memory_space<vmem>>, vector<1x32x32xbf16>
    %46 = vector.shape_cast %45 : vector<1x32x32xbf16> to vector<32x32xbf16>
    %cst_37 = arith.constant dense<0.000000e+00> : vector<256x32xf32>
    %47 = tpu.matmul %44, %46, %cst_37 {dimension_numbers = #tpu.dot_dimension_numbers<[1], [0], [0], [1], [0, 0, 1, 1], [], []>} : vector<256x32xbf16>, vector<32x32xbf16>, vector<256x32xf32> -> vector<256x32xf32>
    %c1_38 = arith.constant 1 : index
    %c0_39 = arith.constant 0 : index
    %c0_40 = arith.constant 0 : index
    %48 = vector.load %arg8[%c1_38, %c0_39, %c0_40] : memref<3x1x32xf32, #tpu.memory_space<vmem>>, vector<1x1x32xf32>
    %49 = vector.shape_cast %48 : vector<1x1x32xf32> to vector<1x32xf32>
    %50 = vector.broadcast %49 : vector<1x32xf32> to vector<256x32xf32>
    %51 = arith.addf %47, %50 : vector<256x32xf32>
    %cst_41 = arith.constant 0.000000e+00 : f32
    %52 = vector.broadcast %cst_41 : f32 to vector<256x32xf32>
    %53 = arith.maximumf %51, %52 : vector<256x32xf32>
    %c1_42 = arith.constant 1 : index
    %c0_43 = arith.constant 0 : index
    %c0_44 = arith.constant 0 : index
    %54 = vector.load %arg9[%c1_42, %c0_43, %c0_44] : memref<3x1x32xf32, #tpu.memory_space<vmem>>, vector<1x1x32xf32>
    %55 = vector.shape_cast %54 : vector<1x1x32xf32> to vector<1x32xf32>
    %56 = vector.broadcast %55 : vector<1x32xf32> to vector<256x32xf32>
    %57 = arith.mulf %53, %56 : vector<256x32xf32>
    %c1_45 = arith.constant 1 : index
    %c0_46 = arith.constant 0 : index
    %c0_47 = arith.constant 0 : index
    %58 = vector.load %arg10[%c1_45, %c0_46, %c0_47] : memref<3x1x32xf32, #tpu.memory_space<vmem>>, vector<1x1x32xf32>
    %59 = vector.shape_cast %58 : vector<1x1x32xf32> to vector<1x32xf32>
    %60 = vector.broadcast %59 : vector<1x32xf32> to vector<256x32xf32>
    %61 = arith.addf %57, %60 : vector<256x32xf32>
    %62 = arith.truncf %61 : vector<256x32xf32> to vector<256x32xbf16>
    %cst_48 = arith.constant dense<0.000000e+00> : vector<256x32xf32>
    %63 = tpu.matmul %1, %62, %cst_48 {dimension_numbers = #tpu.dot_dimension_numbers<[1], [0], [0], [1], [0, 0, 1, 1], [], []>} : vector<256x256xbf16>, vector<256x32xbf16>, vector<256x32xf32> -> vector<256x32xf32>
    %c1_49 = arith.constant 1 : index
    %c0_50 = arith.constant 0 : index
    %c0_51 = arith.constant 0 : index
    %64 = vector.load %arg5[%c1_49, %c0_50, %c0_51] : memref<2x32x32xbf16, #tpu.memory_space<vmem>>, vector<1x32x32xbf16>
    %65 = vector.shape_cast %64 : vector<1x32x32xbf16> to vector<32x32xbf16>
    %66 = arith.truncf %63 : vector<256x32xf32> to vector<256x32xbf16>
    %cst_52 = arith.constant dense<0.000000e+00> : vector<256x32xf32>
    %67 = tpu.matmul %66, %65, %cst_52 {dimension_numbers = #tpu.dot_dimension_numbers<[1], [0], [0], [1], [0, 0, 1, 1], [], []>} : vector<256x32xbf16>, vector<32x32xbf16>, vector<256x32xf32> -> vector<256x32xf32>
    %c2 = arith.constant 2 : index
    %c0_53 = arith.constant 0 : index
    %c0_54 = arith.constant 0 : index
    %68 = vector.load %arg6[%c2, %c0_53, %c0_54] : memref<3x1x32xf32, #tpu.memory_space<vmem>>, vector<1x1x32xf32>
    %69 = vector.shape_cast %68 : vector<1x1x32xf32> to vector<1x32xf32>
    %70 = vector.broadcast %69 : vector<1x32xf32> to vector<256x32xf32>
    %71 = arith.addf %67, %70 : vector<256x32xf32>
    %cst_55 = arith.constant 0.000000e+00 : f32
    %72 = vector.broadcast %cst_55 : f32 to vector<256x32xf32>
    %73 = arith.maximumf %71, %72 : vector<256x32xf32>
    %74 = arith.truncf %73 : vector<256x32xf32> to vector<256x32xbf16>
    %c2_56 = arith.constant 2 : index
    %c0_57 = arith.constant 0 : index
    %c0_58 = arith.constant 0 : index
    %75 = vector.load %arg7[%c2_56, %c0_57, %c0_58] : memref<3x32x32xbf16, #tpu.memory_space<vmem>>, vector<1x32x32xbf16>
    %76 = vector.shape_cast %75 : vector<1x32x32xbf16> to vector<32x32xbf16>
    %cst_59 = arith.constant dense<0.000000e+00> : vector<256x32xf32>
    %77 = tpu.matmul %74, %76, %cst_59 {dimension_numbers = #tpu.dot_dimension_numbers<[1], [0], [0], [1], [0, 0, 1, 1], [], []>} : vector<256x32xbf16>, vector<32x32xbf16>, vector<256x32xf32> -> vector<256x32xf32>
    %c2_60 = arith.constant 2 : index
    %c0_61 = arith.constant 0 : index
    %c0_62 = arith.constant 0 : index
    %78 = vector.load %arg8[%c2_60, %c0_61, %c0_62] : memref<3x1x32xf32, #tpu.memory_space<vmem>>, vector<1x1x32xf32>
    %79 = vector.shape_cast %78 : vector<1x1x32xf32> to vector<1x32xf32>
    %80 = vector.broadcast %79 : vector<1x32xf32> to vector<256x32xf32>
    %81 = arith.addf %77, %80 : vector<256x32xf32>
    %cst_63 = arith.constant 0.000000e+00 : f32
    %82 = vector.broadcast %cst_63 : f32 to vector<256x32xf32>
    %83 = arith.maximumf %81, %82 : vector<256x32xf32>
    %c2_64 = arith.constant 2 : index
    %c0_65 = arith.constant 0 : index
    %c0_66 = arith.constant 0 : index
    %84 = vector.load %arg9[%c2_64, %c0_65, %c0_66] : memref<3x1x32xf32, #tpu.memory_space<vmem>>, vector<1x1x32xf32>
    %85 = vector.shape_cast %84 : vector<1x1x32xf32> to vector<1x32xf32>
    %86 = vector.broadcast %85 : vector<1x32xf32> to vector<256x32xf32>
    %87 = arith.mulf %83, %86 : vector<256x32xf32>
    %c2_67 = arith.constant 2 : index
    %c0_68 = arith.constant 0 : index
    %c0_69 = arith.constant 0 : index
    %88 = vector.load %arg10[%c2_67, %c0_68, %c0_69] : memref<3x1x32xf32, #tpu.memory_space<vmem>>, vector<1x1x32xf32>
    %89 = vector.shape_cast %88 : vector<1x1x32xf32> to vector<1x32xf32>
    %90 = vector.broadcast %89 : vector<1x32xf32> to vector<256x32xf32>
    %91 = arith.addf %87, %90 : vector<256x32xf32>
    %92 = arith.truncf %91 : vector<256x32xf32> to vector<256x32xbf16>
    %c0_70 = arith.constant 0 : index
    %c0_71 = arith.constant 0 : index
    %93 = vector.load %arg3[%c0_70, %c0_71] : memref<4x256xbf16, #tpu.memory_space<vmem>>, vector<4x256xbf16>
    %cst_72 = arith.constant dense<0.000000e+00> : vector<4x32xf32>
    %94 = tpu.matmul %93, %92, %cst_72 {dimension_numbers = #tpu.dot_dimension_numbers<[1], [0], [0], [1], [0, 0, 1, 1], [], []>} : vector<4x256xbf16>, vector<256x32xbf16>, vector<4x32xf32> -> vector<4x32xf32>
    %95 = arith.truncf %94 : vector<4x32xf32> to vector<4x32xbf16>
    %c0_73 = arith.constant 0 : index
    %c0_74 = arith.constant 0 : index
    %96 = vector.load %arg11[%c0_73, %c0_74] : memref<32x2xbf16, #tpu.memory_space<vmem>>, vector<32x2xbf16>
    %cst_75 = arith.constant dense<0.000000e+00> : vector<4x2xf32>
    %97 = tpu.matmul %95, %96, %cst_75 {dimension_numbers = #tpu.dot_dimension_numbers<[1], [0], [0], [1], [0, 0, 1, 1], [], []>} : vector<4x32xbf16>, vector<32x2xbf16>, vector<4x2xf32> -> vector<4x2xf32>
    %c0_76 = arith.constant 0 : index
    %c0_77 = arith.constant 0 : index
    %98 = vector.load %arg12[%c0_76, %c0_77] : memref<1x2xf32, #tpu.memory_space<vmem>>, vector<1x2xf32>
    %99 = vector.broadcast %98 : vector<1x2xf32> to vector<4x2xf32>
    %100 = arith.addf %97, %99 : vector<4x2xf32>
    %cst_78 = arith.constant dense<0xFF800000> : vector<4xf32>
    %101 = vector.multi_reduction <maximumf>, %100, %cst_78 [1] : vector<4x2xf32> to vector<4xf32>
    %102 = vector.shape_cast %101 : vector<4xf32> to vector<4x1xf32>
    %103 = vector.broadcast %102 : vector<4x1xf32> to vector<4x2xf32>
    %104 = arith.subf %100, %103 : vector<4x2xf32>
    %105 = math.exp %104 : vector<4x2xf32>
    %cst_79 = arith.constant dense<0.000000e+00> : vector<4xf32>
    %106 = vector.multi_reduction <add>, %105, %cst_79 [1] : vector<4x2xf32> to vector<4xf32>
    %107 = vector.shape_cast %106 : vector<4xf32> to vector<4x1xf32>
    %108 = math.log %107 : vector<4x1xf32>
    %109 = arith.addf %102, %108 : vector<4x1xf32>
    %110 = vector.broadcast %109 : vector<4x1xf32> to vector<4x2xf32>
    %111 = arith.subf %100, %110 : vector<4x2xf32>
    %c0_80 = arith.constant 0 : index
    %c0_81 = arith.constant 0 : index
    %c0_82 = arith.constant 0 : index
    %112 = vector.load %arg13[%c0_80, %c0_81, %c0_82] : memref<1x4x2xf32, #tpu.memory_space<vmem>>, vector<1x4x2xf32>
    %113 = vector.shape_cast %112 : vector<1x4x2xf32> to vector<4x2xf32>
    %114 = vector.shape_cast %111 : vector<4x2xf32> to vector<1x4x2xf32>
    tpu.vector_store %arg13[%c0_80, %c0_81, %c0_82], %114 {strides = array<i32>} : memref<1x4x2xf32, #tpu.memory_space<vmem>>, vector<1x4x2xf32>,
    return
  }
  func.func @transform_0(%arg0: i32) -> (i32, i32, i32) {
    %c0_i32 = arith.constant 0 : i32
    %c0_i32_0 = arith.constant 0 : i32
    %c0_i32_1 = arith.constant 0 : i32
    return %arg0, %c0_i32, %c0_i32_0 : i32, i32, i32
  }
  func.func @transform_1(%arg0: i32) -> (i32, i32, i32) {
    %c0_i32 = arith.constant 0 : i32
    %c0_i32_0 = arith.constant 0 : i32
    %c0_i32_1 = arith.constant 0 : i32
    return %arg0, %c0_i32, %c0_i32_0 : i32, i32, i32
  }
  func.func @transform_2(%arg0: i32) -> (i32, i32) {
    %c0_i32 = arith.constant 0 : i32
    %c0_i32_0 = arith.constant 0 : i32
    %c0_i32_1 = arith.constant 0 : i32
    return %c0_i32, %c0_i32_0 : i32, i32
  }
  func.func @transform_3(%arg0: i32) -> (i32, i32) {
    %c0_i32 = arith.constant 0 : i32
    %c0_i32_0 = arith.constant 0 : i32
    %c0_i32_1 = arith.constant 0 : i32
    return %c0_i32, %c0_i32_0 : i32, i32
  }
  func.func @transform_4(%arg0: i32) -> (i32, i32, i32) {
    %c0_i32 = arith.constant 0 : i32
    %c0_i32_0 = arith.constant 0 : i32
    %c0_i32_1 = arith.constant 0 : i32
    %c0_i32_2 = arith.constant 0 : i32
    return %c0_i32, %c0_i32_0, %c0_i32_1 : i32, i32, i32
  }
  func.func @transform_5(%arg0: i32) -> (i32, i32, i32) {
    %c0_i32 = arith.constant 0 : i32
    %c0_i32_0 = arith.constant 0 : i32
    %c0_i32_1 = arith.constant 0 : i32
    %c0_i32_2 = arith.constant 0 : i32
    return %c0_i32, %c0_i32_0, %c0_i32_1 : i32, i32, i32
  }
  func.func @transform_6(%arg0: i32) -> (i32, i32, i32) {
    %c0_i32 = arith.constant 0 : i32
    %c0_i32_0 = arith.constant 0 : i32
    %c0_i32_1 = arith.constant 0 : i32
    %c0_i32_2 = arith.constant 0 : i32
    return %c0_i32, %c0_i32_0, %c0_i32_1 : i32, i32, i32
  }
  func.func @transform_7(%arg0: i32) -> (i32, i32, i32) {
    %c0_i32 = arith.constant 0 : i32
    %c0_i32_0 = arith.constant 0 : i32
    %c0_i32_1 = arith.constant 0 : i32
    %c0_i32_2 = arith.constant 0 : i32
    return %c0_i32, %c0_i32_0, %c0_i32_1 : i32, i32, i32
  }
  func.func @transform_8(%arg0: i32) -> (i32, i32, i32) {
    %c0_i32 = arith.constant 0 : i32
    %c0_i32_0 = arith.constant 0 : i32
    %c0_i32_1 = arith.constant 0 : i32
    %c0_i32_2 = arith.constant 0 : i32
    return %c0_i32, %c0_i32_0, %c0_i32_1 : i32, i32, i32
  }
  func.func @transform_9(%arg0: i32) -> (i32, i32, i32) {
    %c0_i32 = arith.constant 0 : i32
    %c0_i32_0 = arith.constant 0 : i32
    %c0_i32_1 = arith.constant 0 : i32
    %c0_i32_2 = arith.constant 0 : i32
    return %c0_i32, %c0_i32_0, %c0_i32_1 : i32, i32, i32
  }
  func.func @transform_10(%arg0: i32) -> (i32, i32) {
    %c0_i32 = arith.constant 0 : i32
    %c0_i32_0 = arith.constant 0 : i32
    %c0_i32_1 = arith.constant 0 : i32
    return %c0_i32, %c0_i32_0 : i32, i32
  }
  func.func @transform_11(%arg0: i32) -> (i32, i32) {
    %c0_i32 = arith.constant 0 : i32
    %c0_i32_0 = arith.constant 0 : i32
    %c0_i32_1 = arith.constant 0 : i32
    return %c0_i32, %c0_i32_0 : i32, i32
  }
  func.func @transform_12(%arg0: i32) -> (i32, i32, i32) {
    %c0_i32 = arith.constant 0 : i32
    %c0_i32_0 = arith.constant 0 : i32
    %c0_i32_1 = arith.constant 0 : i32
    return %arg0, %c0_i32, %c0_i32_0 : i32, i32, i32
  }
}

</mosaic_0001>

<bundles_post_ra>
// kernel: gin_forward.1
= control target key start
LH: loop header
LB: loop body
LE: loop exit
PB: predicated region body
PF: predicated region fallthrough
CT: control target
= control target key end

     0   :  { %s4496_s21 = smov 0   ;;  %s5543_s0 = inlined_call_operand.vmem [shape: bf16[2,256,256], index: 0, kind: input, shape index: {}]   ;;  %s5544_s1 = inlined_call_operand.vmem [shape: bf16[2,256,16], index: 1, kind: input, shape index: {}]   ;;  %s5545_s2 = inlined_call_operand.vmem [shape: bf16[4,256], index: 2, kind: input, shape index: {}]   ;;  %s5546_s3 = inlined_call_operand.vmem [shape: bf16[16,32], index: 3, kind: input, shape index: {}]   ;;  %s5547_s4 = inlined_call_operand.vmem [shape: bf16[2,32,32], index: 4, kind: input, shape index: {}]   ;;  %s5548_s5 = inlined_call_operand.vmem [shape: f32[3,1,32], index: 5, kind: input, shape index: {}]   ;;  %s5549_s6 = inlined_call_operand.vmem [shape: bf16[3,32,32], index: 6, kind: input, shape index: {}]   ;;  %s5550_s7 = inlined_call_operand.vmem [shape: f32[3,1,32], index: 7, kind: input, shape index: {}]   ;;  %s5551_s8 = inlined_call_operand.vmem [shape: f32[3,1,32], index: 8, kind: input, shape index: {}]   ;;  %s5552_s9 = inlined_call_operand.vmem [shape: f32[3,1,32], index: 9, kind: input, shape index: {}]   ;;  %s5553_s10 = inlined_call_operand.vmem [shape: bf16[32,2], index: 10, kind: input, shape index: {}]   ;;  %s5554_s11 = inlined_call_operand.vmem [shape: f32[1,2], index: 11, kind: input, shape index: {}]   ;;  %s5555_s12 = inlined_call_operand.vmem [shape: f32[2,4,2], index: 12, kind: output, shape index: {}]  }
   0x1 LB: > { %s3402_s22 = sadd.s32 4294967295, %s4427_s21   ;;  %p3406_p0 = scmp.ge.s32.totalorder %s4427_s21, 1  ;;  %s4427_s21 = sphi %s4496_s21, %s22_s21  }
   0x2   : > { %p372_p1 = scmp.lt.s32.totalorder %s4427_s21, 3 }
   0x4   : > { %p373_p2 = pnand %p3406_p0, %p372_p1 }
   0x5   : > { %p418_p3 = scmp.lt.s32.totalorder (!%p373_p2), %s3402_s22, 1  ;;  %v4372_v43 = vld [vmem:[%s5546_s3] sm:$0xff] (!%p373_p2)   ;;  %vm945_vm0 = vcmask (!%p373_p2), 130048   ;;  %vm1226_vm1 = vcmask (!%p373_p2), 261120   ;;  %vm4430_vm2 = vmmov (!%p373_p2), 0   ;;  %vm3322_vm3 = vcmask (!%p373_p2), 11264  }
   0x6   : > { %376 = sbr.rel (%p373_p2) target bundleno = 3181 (0xc6d), region = 68  ;;  %4076 = vmatprep.subr.bf16.mxu1 (!%p373_p2), %v4372_v43 }
   0x7   : > { %4077 = vmatpush3.bf16.msra.mxu1 (!%p373_p2), %v4372_v43 }
   0xd   : > { %s5557_s22 = smov (!%p418_p3, %s3402_s22), 1 }
   0xe   : > { %s3607_s23 = sshll.u32 %s5557_s22, 7  ;;  %s3606_s27 = sshll.u32 %s5557_s22, 8 }
   0xf   : > { %s4510_s26 = scalar_lea.vmem %s5544_s1, %s3607_s23  ;;  %s4525_s30 = scalar_lea.vmem %s5543_s0, %s3606_s27 }
  0x10   : > { %v4308_v0 = vld [vmem:[%s4510_s26 + $0x40] sm:$0xff]   ;;  %v4310_v2 = vld [vmem:[%s4510_s26 + $0x48] sm:$0xff]   ;;  %v4312_v4 = vld [vmem:[%s4510_s26 + $0x50] sm:$0xff]   ;;  %s3411_s20 = sshll.u32 %s5557_s22, 2 }
  0x11   : > { %v4309_v1 = vld [vmem:[%s4510_s26] sm:$0xff]   ;;  %3608 = vmatprep.subr.bf16.mxu0 %v4308_v0  ;;  %v4311_v3 = vld [vmem:[%s4510_s26 + $0x8] sm:$0xff]   ;;  %v4313_v5 = vld [vmem:[%s4510_s26 + $0x10] sm:$0xff]   ;;  %s431_s25 = scalar_lea.vmem %s5555_s12, %s3411_s20 }
  0x12   : > { %3609 = vmatpush3.bf16.msra.mxu0 %v4309_v1  ;;  %v4314_v6 = vld [vmem:[%s4510_s26 + $0x58] sm:$0xff]   ;;  %v4316_v8 = vld [vmem:[%s4510_s26 + $0x60] sm:$0xff]   ;;  %v4318_v10 = vld [vmem:[%s4510_s26 + $0x68] sm:$0xff]  }
  0x13   : > { %3610 = vmatprep.subr.bf16.mxu0 %v4310_v2  ;;  %v4315_v7 = vld [vmem:[%s4510_s26 + $0x18] sm:$0xff]   ;;  %v4317_v9 = vld [vmem:[%s4510_s26 + $0x20] sm:$0xff]   ;;  %v4319_v12 = vld [vmem:[%s4510_s26 + $0x28] sm:$0xff]  }
  0x14   : > { %v4530_v11 = vld [vmem:[%s4525_s30 + $0x4] ss:$8 sps:$4 sm:$0xff]   ;;  %v4320_v13 = vld [vmem:[%s4510_s26 + $0x70] sm:$0xff]   ;;  %v4322_v15 = vld [vmem:[%s4510_s26 + $0x78] sm:$0xff]  }
  0x15   : > { %785 = vmatprep.mubr.bf16.mxu0 %v4530_v11  ;;  %v4321_v14 = vld [vmem:[%s4510_s26 + $0x30] sm:$0xff]   ;;  %v4323_v16 = vld [vmem:[%s4510_s26 + $0x38] sm:$0xff]   ;;  %v4326_v17 = vld [vmem:[%s4525_s30] ss:$8 sps:$4 sm:$0xff]  }
  0x16   : > { %3611 = vmatpush3.bf16.msra.mxu0 %v4311_v3  ;;  %v4327_v18 = vld [vmem:[%s4525_s30 + $0x14] ss:$8 sps:$4 sm:$0xff]   ;;  %v4329_v19 = vld [vmem:[%s4525_s30 + $0x10] ss:$8 sps:$4 sm:$0xff]   ;;  %v4330_v20 = vld [vmem:[%s4525_s30 + $0x24] ss:$8 sps:$4 sm:$0xff]  }
  0x17   : > { %3612 = vmatprep.subr.bf16.mxu0 %v4312_v4  ;;  %v4332_v21 = vld [vmem:[%s4525_s30 + $0x20] ss:$8 sps:$4 sm:$0xff]   ;;  %v4333_v22 = vld [vmem:[%s4525_s30 + $0x34] ss:$8 sps:$4 sm:$0xff]   ;;  %v4335_v23 = vld [vmem:[%s4525_s30 + $0x30] ss:$8 sps:$4 sm:$0xff]  }
  0x18   : > { %v4336_v24 = vld [vmem:[%s4525_s30 + $0x44] ss:$8 sps:$4 sm:$0xff]   ;;  %v4338_v25 = vld [vmem:[%s4525_s30 + $0x40] ss:$8 sps:$4 sm:$0xff]   ;;  %v4339_v26 = vld [vmem:[%s4525_s30 + $0x54] ss:$8 sps:$4 sm:$0xff]  }
  0x19   : > { %v4341_v27 = vld [vmem:[%s4525_s30 + $0x50] ss:$8 sps:$4 sm:$0xff]   ;;  %v4342_v28 = vld [vmem:[%s4525_s30 + $0x64] ss:$8 sps:$4 sm:$0xff]   ;;  %v4344_v29 = vld [vmem:[%s4525_s30 + $0x60] ss:$8 sps:$4 sm:$0xff]  }
  0x1a   : > { %3613 = vmatpush3.bf16.msra.mxu0 %v4313_v5  ;;  %v4345_v30 = vld [vmem:[%s4525_s30 + $0x74] ss:$8 sps:$4 sm:$0xff]   ;;  %v4347_v31 = vld [vmem:[%s4525_s30 + $0x70] ss:$8 sps:$4 sm:$0xff]   ;;  %v4348_v32 = vld [vmem:[%s4525_s30 + $0x84] ss:$8 sps:$4 sm:$0xff]  }
  0x1b   : > { %3614 = vmatprep.subr.bf16.mxu0 %v4314_v6  ;;  %v4555_v33 = vld [vmem:[%s4525_s30 + $0x80] ss:$8 sps:$4 sm:$0xff]   ;;  %v4558_v34 = vld [vmem:[%s4525_s30 + $0x94] ss:$8 sps:$4 sm:$0xff]   ;;  %v4563_v35 = vld [vmem:[%s4525_s30 + $0x90] ss:$8 sps:$4 sm:$0xff]  }
  0x1c   : > { %v4566_v36 = vld [vmem:[%s4525_s30 + $0xa4] ss:$8 sps:$4 sm:$0xff]   ;;  %v4571_v37 = vld [vmem:[%s4525_s30 + $0xa0] ss:$8 sps:$4 sm:$0xff]   ;;  %v4574_v38 = vld [vmem:[%s4525_s30 + $0xb4] ss:$8 sps:$4 sm:$0xff]  }
  0x1d   : > { %v4579_v39 = vld [vmem:[%s4525_s30 + $0xb0] ss:$8 sps:$4 sm:$0xff]   ;;  %v4582_v40 = vld [vmem:[%s4525_s30 + $0xc4] ss:$8 sps:$4 sm:$0xff]   ;;  %v4587_v41 = vld [vmem:[%s4525_s30 + $0xc0] ss:$8 sps:$4 sm:$0xff]  }
  0x1e   : > { %3615 = vmatpush3.bf16.msra.mxu0 %v4315_v7  ;;  %v4590_v42 = vld [vmem:[%s4525_s30 + $0xd4] ss:$8 sps:$4 sm:$0xff]   ;;  %v4598_v44 = vld [vmem:[%s4525_s30 + $0xd0] ss:$8 sps:$4 sm:$0xff]   ;;  %v4601_v45 = vld [vmem:[%s4525_s30 + $0xe4] ss:$8 sps:$4 sm:$0xff]  }
  0x1f   : > { %3616 = vmatprep.subr.bf16.mxu0 %v4316_v8  ;;  %v4606_v46 = vld [vmem:[%s4525_s30 + $0xe0] ss:$8 sps:$4 sm:$0xff]   ;;  %v4609_v47 = vld [vmem:[%s4525_s30 + $0xf4] ss:$8 sps:$4 sm:$0xff]   ;;  %v4614_v48 = vld [vmem:[%s4525_s30 + $0xf0] ss:$8 sps:$4 sm:$0xff]  }
  0x22   : > { %3617 = vmatpush3.bf16.msra.mxu0 %v4317_v9 }
  0x23   : > { %3618 = vmatprep.subr.bf16.mxu0 %v4318_v10 }
  0x26   : > { %3619 = vmatpush3.bf16.msra.mxu0 %v4319_v12 }
  0x27   : > { %3620 = vmatprep.subr.bf16.mxu0 %v4320_v13 }
  0x2a   : > { %3621 = vmatpush3.bf16.msra.mxu0 %v4321_v14 }
  0x2b   : > { %3622 = vmatprep.subr.bf16.mxu0 %v4322_v15 }
  0x2e   : > { %3623 = vmatpush3.bf16.msra.mxu0 %v4323_v16 }
  0x31   : > { %786 = vmatmul.mubr.bf16.vlgmr.msra.gmra.mrb[0].mxu0 %v4326_v17 }
  0x32   : > { %793 = vmatprep.mubr.bf16.mxu0 %v4327_v18 }
  0x39   : > { %794 = vmatmul.mubr.bf16.gmra.mrb[4].mxu0 %v4329_v19 }
  0x3a   : > { %801 = vmatprep.mubr.bf16.mxu0 %v4330_v20 }
  0x41   : > { %802 = vmatmul.mubr.bf16.gmra.mrb[8].mxu0 %v4332_v21 }
  0x42   : > { %809 = vmatprep.mubr.bf16.mxu0 %v4333_v22 }
  0x49   : > { %810 = vmatmul.mubr.bf16.gmra.mrb[12].mxu0 %v4335_v23 }
  0x4a   : > { %817 = vmatprep.mubr.bf16.mxu0 %v4336_v24 }
  0x51   : > { %818 = vmatmul.mubr.bf16.gmra.mrb[16].mxu0 %v4338_v25 }
  0x52   : > { %825 = vmatprep.mubr.bf16.mxu0 %v4339_v26 }
  0x59   : > { %826 = vmatmul.mubr.bf16.gmra.mrb[20].mxu0 %v4341_v27 }
  0x5a   : > { %833 = vmatprep.mubr.bf16.mxu0 %v4342_v28 }
  0x61   : > { %834 = vmatmul.mubr.bf16.gmra.mrb[24].mxu0 %v4344_v29 }
  0x62   : > { %841 = vmatprep.mubr.bf16.mxu0 %v4345_v30 }
  0x69   : > { %842 = vmatmul.mubr.bf16.gmra.mrb[28].mxu0 %v4347_v31 }
  0x6a   : > { %849 = vmatprep.mubr.bf16.mxu0 %v4348_v32 }
  0x71   : > { %850 = vmatmul.mubr.bf16.gmra.mrb[32].mxu0 %v4555_v33 }
  0x72   : > { %857 = vmatprep.mubr.bf16.mxu0 %v4558_v34 }
  0x79   : > { %858 = vmatmul.mubr.bf16.gmra.mrb[36].mxu0 %v4563_v35 }
  0x7a   : > { %865 = vmatprep.mubr.bf16.mxu0 %v4566_v36 }
  0x81   : > { %866 = vmatmul.mubr.bf16.gmra.mrb[40].mxu0 %v4571_v37 }
  0x82   : > { %873 = vmatprep.mubr.bf16.mxu0 %v4574_v38 }
  0x89   : > { %874 = vmatmul.mubr.bf16.gmra.mrb[44].mxu0 %v4579_v39 }
  0x8a   : > { %881 = vmatprep.mubr.bf16.mxu0 %v4582_v40 }
  0x91   : > { %882 = vmatmul.mubr.bf16.gmra.mrb[48].mxu0 %v4587_v41 }
  0x92   : > { %889 = vmatprep.mubr.bf16.mxu0 %v4590_v42 }
  0x99   : > { %890 = vmatmul.mubr.bf16.gmra.mrb[52].mxu0 %v4598_v44 }
  0x9a   : > { %897 = vmatprep.mubr.bf16.mxu0 %v4601_v45 }
  0xa1   : > { %898 = vmatmul.mubr.bf16.gmra.mrb[56].mxu0 %v4606_v46 }
  0xa2   : > { %905 = vmatprep.mubr.bf16.mxu0 %v4609_v47 }
  0xa9   : > { %906 = vmatmul.mubr.bf16.gmra.mrb[60].mxu0 %v4614_v48 }
 0x104   : > { %v3624_v49 = vpop.f32.mrb[0].mxu0 }
 0x105   : > { %v3625_v50 = vpop.f32.mrb[1].mxu0 }
 0x106   : > { %v3626_v51 = vadd.f32 %v3625_v50, %v3624_v49  ;;  %v3627_v52 = vpop.f32.mrb[2].mxu0 }
 0x107   : > { %v3628_v53 = vpop.f32.mrb[3].mxu0 }
 0x108   : > { %v3629_v54 = vadd.f32 %v3628_v53, %v3627_v52 }
 0x10a   : > { %v916_v55 = vpack.c.bf16 %v3629_v54, %v3626_v51 }
 0x10c   : > { %v3630_v56 = vpop.f32.mrb[4].mxu0  ;;  %4078 = vmatprep.mubr.msk.bf16.mxu1 %vm945_vm0, %v916_v55 }
 0x10d   : > { %v3631_v57 = vpop.f32.mrb[5].mxu0 }
 0x10e   : > { %v3632_v58 = vadd.f32 %v3631_v57, %v3630_v56  ;;  %v3633_v59 = vpop.f32.mrb[6].mxu0 }
 0x10f   : > { %v3634_v60 = vpop.f32.mrb[7].mxu0 }
 0x110   : > { %v3635_v61 = vadd.f32 %v3634_v60, %v3633_v59 }
 0x112   : > { %v917_v62 = vpack.c.bf16 %v3635_v61, %v3632_v58 }
 0x114   : > { %v3636_v63 = vpop.f32.mrb[8].mxu0  ;;  %4079 = vmatmul.mubr.msk.bf16.vlgmr.msra.gmra.mrb[0].mxu1 %vm945_vm0, %v917_v62 }
 0x115   : > { %v3637_v0 = vpop.f32.mrb[9].mxu0 }
 0x116   : > { %v3638_v1 = vadd.f32 %v3637_v0, %v3636_v63  ;;  %v3639_v2 = vpop.f32.mrb[10].mxu0 }
 0x117   : > { %v3640_v3 = vpop.f32.mrb[11].mxu0 }
 0x118   : > { %v3641_v4 = vadd.f32 %v3640_v3, %v3639_v2 }
 0x11a   : > { %v918_v5 = vpack.c.bf16 %v3641_v4, %v3638_v1 }
 0x11c   : > { %v3642_v6 = vpop.f32.mrb[12].mxu0  ;;  %4082 = vmatprep.mubr.msk.bf16.mxu1 %vm945_vm0, %v918_v5 }
 0x11d   : > { %v3643_v7 = vpop.f32.mrb[13].mxu0 }
 0x11e   : > { %v3644_v8 = vadd.f32 %v3643_v7, %v3642_v6  ;;  %v3645_v9 = vpop.f32.mrb[14].mxu0 }
 0x11f   : > { %v3646_v10 = vpop.f32.mrb[15].mxu0 }
 0x120   : > { %v3647_v12 = vadd.f32 %v3646_v10, %v3645_v9 }
 0x122   : > { %v919_v13 = vpack.c.bf16 %v3647_v12, %v3644_v8 }
 0x124   : > { %v3648_v14 = vpop.f32.mrb[16].mxu0  ;;  %4083 = vmatmul.mubr.msk.bf16.gmra.mrb[4].mxu1 %vm945_vm0, %v919_v13 }
 0x125   : > { %v3649_v15 = vpop.f32.mrb[17].mxu0 }
 0x126   : > { %v3650_v16 = vadd.f32 %v3649_v15, %v3648_v14  ;;  %v3651_v17 = vpop.f32.mrb[18].mxu0 }
 0x127   : > { %v3652_v18 = vpop.f32.mrb[19].mxu0 }
 0x128   : > { %v3653_v19 = vadd.f32 %v3652_v18, %v3651_v17 }
 0x12a   : > { %v920_v20 = vpack.c.bf16 %v3653_v19, %v3650_v16 }
 0x12c   : > { %v3654_v21 = vpop.f32.mrb[20].mxu0  ;;  %4086 = vmatprep.mubr.msk.bf16.mxu1 %vm945_vm0, %v920_v20 }
 0x12d   : > { %v3655_v22 = vpop.f32.mrb[21].mxu0 }
 0x12e   : > { %v3656_v23 = vadd.f32 %v3655_v22, %v3654_v21  ;;  %v3657_v24 = vpop.f32.mrb[22].mxu0 }
 0x12f   : > { %v3658_v25 = vpop.f32.mrb[23].mxu0 }
 0x130   : > { %v3659_v26 = vadd.f32 %v3658_v25, %v3657_v24 }
 0x132   : > { %v921_v27 = vpack.c.bf16 %v3659_v26, %v3656_v23 }
 0x134   : > { %v3660_v28 = vpop.f32.mrb[24].mxu0  ;;  %4087 = vmatmul.mubr.msk.bf16.gmra.mrb[8].mxu1 %vm945_vm0, %v921_v27 }
 0x135   : > { %v3661_v29 = vpop.f32.mrb[25].mxu0 }
 0x136   : > { %v3662_v30 = vadd.f32 %v3661_v29, %v3660_v28  ;;  %v3663_v31 = vpop.f32.mrb[26].mxu0  ;;  %v4373_v28 = vld [vmem:[%s5549_s6] sm:$0xff]  }
 0x137   : > { %v3664_v32 = vpop.f32.mrb[27].mxu0  ;;  %4110 = vmatprep.subr.bf16.mxu1 %v4373_v28 }
 0x138   : > { %v3665_v43 = vadd.f32 %v3664_v32, %v3663_v31  ;;  %4111 = vmatpush3.bf16.msra.mxu1 %v4373_v28  ;;  %v4374_v31 = vld [vmem:[%s5549_s6 + $0x8] sm:$0xff]  }
 0x139   : > { %4112 = vmatprep.subr.bf16.mxu1 %v4374_v31 }
 0x13a   : > { %v922_v49 = vpack.c.bf16 %v3665_v43, %v3662_v30 }
 0x13c   : > { %v3666_v50 = vpop.f32.mrb[28].mxu0  ;;  %4090 = vmatprep.mubr.msk.bf16.mxu1 %vm945_vm0, %v922_v49  ;;  %4113 = vmatpush3.bf16.msra.mxu1 %v4374_v31 }
 0x13d   : > { %v3667_v51 = vpop.f32.mrb[29].mxu0 }
 0x13e   : > { %v3668_v52 = vadd.f32 %v3667_v51, %v3666_v50  ;;  %v3669_v53 = vpop.f32.mrb[30].mxu0 }
 0x13f   : > { %v3670_v54 = vpop.f32.mrb[31].mxu0 }
 0x140   : > { %v3671_v55 = vadd.f32 %v3670_v54, %v3669_v53 }
 0x142   : > { %v923_v56 = vpack.c.bf16 %v3671_v55, %v3668_v52 }
 0x144   : > { %v3672_v57 = vpop.f32.mrb[32].mxu0  ;;  %4091 = vmatmul.mubr.msk.bf16.gmra.mrb[12].mxu1 %vm945_vm0, %v923_v56 }
 0x145   : > { %v3673_v58 = vpop.f32.mrb[33].mxu0 }
 0x146   : > { %v3674_v59 = vadd.f32 %v3673_v58, %v3672_v57  ;;  %v3675_v60 = vpop.f32.mrb[34].mxu0 }
 0x147   : > { %v3676_v61 = vpop.f32.mrb[35].mxu0 }
 0x148   : > { %v3677_v62 = vadd.f32 %v3676_v61, %v3675_v60 }
 0x14a   : > { %v924_v63 = vpack.c.bf16 %v3677_v62, %v3674_v59 }
 0x14c   : > { %v3678_v0 = vpop.f32.mrb[36].mxu0  ;;  %4094 = vmatprep.mubr.msk.bf16.mxu1 %vm945_vm0, %v924_v63 }
 0x14d   : > { %v3679_v1 = vpop.f32.mrb[37].mxu0 }
 0x14e   : > { %v3680_v2 = vadd.f32 %v3679_v1, %v3678_v0  ;;  %v3681_v3 = vpop.f32.mrb[38].mxu0 }
 0x14f   : > { %v3682_v4 = vpop.f32.mrb[39].mxu0 }
 0x150   : > { %v3683_v5 = vadd.f32 %v3682_v4, %v3681_v3  ;;  %v4642_v3 = vld [vmem:[%s5548_s5] ss:$0 sm:$0xff] }
 0x152   : > { %v925_v6 = vpack.c.bf16 %v3683_v5, %v3680_v2 }
 0x154   : > { %v3684_v7 = vpop.f32.mrb[40].mxu0  ;;  %4095 = vmatmul.mubr.msk.bf16.gmra.mrb[16].mxu1 %vm945_vm0, %v925_v6 }
 0x155   : > { %v3685_v8 = vpop.f32.mrb[41].mxu0 }
 0x156   : > { %v3686_v9 = vadd.f32 %v3685_v8, %v3684_v7  ;;  %v3687_v10 = vpop.f32.mrb[42].mxu0 }
 0x157   : > { %v3688_v12 = vpop.f32.mrb[43].mxu0 }
 0x158   : > { %v3689_v13 = vadd.f32 %v3688_v12, %v3687_v10 }
 0x15a   : > { %v926_v14 = vpack.c.bf16 %v3689_v13, %v3686_v9 }
 0x15c   : > { %v3690_v15 = vpop.f32.mrb[44].mxu0  ;;  %4098 = vmatprep.mubr.msk.bf16.mxu1 %vm945_vm0, %v926_v14 }
 0x15d   : > { %v3691_v16 = vpop.f32.mrb[45].mxu0 }
 0x15e   : > { %v3692_v17 = vadd.f32 %v3691_v16, %v3690_v15  ;;  %v3693_v18 = vpop.f32.mrb[46].mxu0 }
 0x15f   : > { %v3694_v19 = vpop.f32.mrb[47].mxu0 }
 0x160   : > { %v3695_v20 = vadd.f32 %v3694_v19, %v3693_v18 }
 0x162   : > { %v927_v21 = vpack.c.bf16 %v3695_v20, %v3692_v17 }
 0x164   : > { %v3696_v22 = vpop.f32.mrb[48].mxu0  ;;  %4099 = vmatmul.mubr.msk.bf16.gmra.mrb[20].mxu1 %vm945_vm0, %v927_v21 }
 0x165   : > { %v3697_v23 = vpop.f32.mrb[49].mxu0 }
 0x166   : > { %v3698_v24 = vadd.f32 %v3697_v23, %v3696_v22  ;;  %v3699_v25 = vpop.f32.mrb[50].mxu0 }
 0x167   : > { %v3700_v26 = vpop.f32.mrb[51].mxu0 }
 0x168   : > { %v3701_v27 = vadd.f32 %v3700_v26, %v3699_v25 }
 0x16a   : > { %v928_v29 = vpack.c.bf16 %v3701_v27, %v3698_v24 }
 0x16c   : > { %v3702_v30 = vpop.f32.mrb[52].mxu0  ;;  %4102 = vmatprep.mubr.msk.bf16.mxu1 %vm945_vm0, %v928_v29 }
 0x16d   : > { %v3703_v32 = vpop.f32.mrb[53].mxu0 }
 0x16e   : > { %v3704_v43 = vadd.f32 %v3703_v32, %v3702_v30  ;;  %v3705_v49 = vpop.f32.mrb[54].mxu0 }
 0x16f   : > { %v3706_v50 = vpop.f32.mrb[55].mxu0 }
 0x170   : > { %v3707_v51 = vadd.f32 %v3706_v50, %v3705_v49 }
 0x172   : > { %v929_v52 = vpack.c.bf16 %v3707_v51, %v3704_v43 }
 0x174   : > { %v3708_v53 = vpop.f32.mrb[56].mxu0  ;;  %4103 = vmatmul.mubr.msk.bf16.gmra.mrb[24].mxu1 %vm945_vm0, %v929_v52 }
 0x175   : > { %v3709_v54 = vpop.f32.mrb[57].mxu0 }
 0x176   : > { %v3710_v55 = vadd.f32 %v3709_v54, %v3708_v53  ;;  %v3711_v56 = vpop.f32.mrb[58].mxu0 }
 0x177   : > { %v3712_v57 = vpop.f32.mrb[59].mxu0 }
 0x178   : > { %v3713_v58 = vadd.f32 %v3712_v57, %v3711_v56 }
 0x17a   : > { %v930_v59 = vpack.c.bf16 %v3713_v58, %v3710_v55 }
 0x17c   : > { %v3714_v60 = vpop.f32.mrb[60].mxu0  ;;  %4106 = vmatprep.mubr.msk.bf16.mxu1 %vm945_vm0, %v930_v59 }
 0x17d   : > { %v3715_v61 = vpop.f32.mrb[61].mxu0 }
 0x17e   : > { %v3716_v62 = vadd.f32 %v3715_v61, %v3714_v60  ;;  %v3717_v63 = vpop.f32.mrb[62].mxu0 }
 0x17f   : > { %v3718_v0 = vpop.f32.mrb[63].mxu0 }
 0x180   : > { %v3719_v1 = vadd.f32 %v3718_v0, %v3717_v63 }
 0x182   : > { %v931_v2 = vpack.c.bf16 %v3719_v1, %v3716_v62 }
 0x184   : > { %4107 = vmatmul.mubr.msk.bf16.gmra.mrb[28].mxu1 %vm945_vm0, %v931_v2 }
 0x1e7   : > { %v4080_v4 = vpop.f32.mrb[0].mxu1 }
 0x1e8   : > { %v1037_v5 = vadd.f32 %v4080_v4, %v4642_v3  ;;  %v1028_v6 = vpop.f32.mrb[1].mxu1 }
 0x1e9   : > { %v1029_v7 = vadd.f32 %v4642_v3, %v1028_v6  ;;  %v4081_v8 = vpop.f32.mrb[2].mxu1 }
 0x1ea   : > { %v1040_v9 = vadd.f32 %v4081_v8, %v4642_v3  ;;  %v1031_v10 = vpop.f32.mrb[3].mxu1  ;;  %v1157_v13 = vmax.f32 %v1037_v5, 0.0 }
 0x1eb   : > { %v1032_v12 = vadd.f32 %v4642_v3, %v1031_v10  ;;  %v1155_v15 = vmax.f32 %v1029_v7, 0.0 }
 0x1ec   : > { %v1158_v14 = vmax.f32 %v1040_v9, 0.0 }
 0x1ed   : > { %v1156_v16 = vmax.f32 %v1032_v12, 0.0 }
 0x1ee   : > { %v1188_v17 = vpack.c.bf16 %v1158_v14, %v1157_v13 }
 0x1ef   : > { %v1187_v18 = vpack.c.bf16 %v1156_v16, %v1155_v15 }
 0x1f1   : > { %4114 = vmatprep.mubr.msk.bf16.mxu1 %vm1226_vm1, %v1187_v18 }
 0x1f2   : > { %4115 = vmatmul.mubr.msk.bf16.vlgmr.msra.gmra.mrb[32].mxu1 %vm1226_vm1, %v1188_v17 }
 0x1f7   : > { %v4084_v19 = vpop.f32.mrb[4].mxu1 }
 0x1f8   : > { %v1053_v20 = vadd.f32 %v4084_v19, %v4642_v3  ;;  %v1044_v21 = vpop.f32.mrb[5].mxu1 }
 0x1f9   : > { %v1045_v22 = vadd.f32 %v4642_v3, %v1044_v21  ;;  %v4085_v23 = vpop.f32.mrb[6].mxu1 }
 0x1fa   : > { %v1056_v24 = vadd.f32 %v4085_v23, %v4642_v3  ;;  %v1047_v25 = vpop.f32.mrb[7].mxu1  ;;  %v1161_v27 = vmax.f32 %v1053_v20, 0.0 }
 0x1fb   : > { %v1048_v26 = vadd.f32 %v4642_v3, %v1047_v25  ;;  %v1159_v29 = vmax.f32 %v1045_v22, 0.0 }
 0x1fc   : > { %v1162_v28 = vmax.f32 %v1056_v24, 0.0 }
 0x1fd   : > { %v1160_v30 = vmax.f32 %v1048_v26, 0.0 }
 0x1fe   : > { %v1190_v31 = vpack.c.bf16 %v1162_v28, %v1161_v27 }
 0x1ff   : > { %v1189_v32 = vpack.c.bf16 %v1160_v30, %v1159_v29 }
 0x201   : > { %4118 = vmatprep.mubr.msk.bf16.mxu1 %vm1226_vm1, %v1189_v32 }
 0x202   : > { %4119 = vmatmul.mubr.msk.bf16.gmra.mrb[36].mxu1 %vm1226_vm1, %v1190_v31 }
 0x207   : > { %v4088_v43 = vpop.f32.mrb[8].mxu1 }
 0x208   : > { %v1069_v49 = vadd.f32 %v4088_v43, %v4642_v3  ;;  %v1060_v50 = vpop.f32.mrb[9].mxu1 }
 0x209   : > { %v1061_v51 = vadd.f32 %v4642_v3, %v1060_v50  ;;  %v4089_v52 = vpop.f32.mrb[10].mxu1 }
 0x20a   : > { %v1072_v53 = vadd.f32 %v4089_v52, %v4642_v3  ;;  %v1063_v54 = vpop.f32.mrb[11].mxu1  ;;  %v1165_v56 = vmax.f32 %v1069_v49, 0.0 }
 0x20b   : > { %v1064_v55 = vadd.f32 %v4642_v3, %v1063_v54  ;;  %v1163_v58 = vmax.f32 %v1061_v51, 0.0 }
 0x20c   : > { %v1166_v57 = vmax.f32 %v1072_v53, 0.0 }
 0x20d   : > { %v1164_v59 = vmax.f32 %v1064_v55, 0.0 }
 0x20e   : > { %v1192_v60 = vpack.c.bf16 %v1166_v57, %v1165_v56 }
 0x20f   : > { %v1191_v61 = vpack.c.bf16 %v1164_v59, %v1163_v58 }
 0x211   : > { %4122 = vmatprep.mubr.msk.bf16.mxu1 %vm1226_vm1, %v1191_v61 }
 0x212   : > { %4123 = vmatmul.mubr.msk.bf16.gmra.mrb[40].mxu1 %vm1226_vm1, %v1192_v60 }
 0x217   : > { %v4092_v62 = vpop.f32.mrb[12].mxu1 }
 0x218   : > { %v1085_v63 = vadd.f32 %v4092_v62, %v4642_v3  ;;  %v1076_v0 = vpop.f32.mrb[13].mxu1 }
 0x219   : > { %v1077_v1 = vadd.f32 %v4642_v3, %v1076_v0  ;;  %v4093_v2 = vpop.f32.mrb[14].mxu1 }
 0x21a   : > { %v1088_v4 = vadd.f32 %v4093_v2, %v4642_v3  ;;  %v1079_v5 = vpop.f32.mrb[15].mxu1  ;;  %v1169_v7 = vmax.f32 %v1085_v63, 0.0 }
 0x21b   : > { %v1080_v6 = vadd.f32 %v4642_v3, %v1079_v5  ;;  %v1167_v9 = vmax.f32 %v1077_v1, 0.0 }
 0x21c   : > { %v1170_v8 = vmax.f32 %v1088_v4, 0.0 }
 0x21d   : > { %v1168_v10 = vmax.f32 %v1080_v6, 0.0 }
 0x21e   : > { %v1194_v12 = vpack.c.bf16 %v1170_v8, %v1169_v7 }
 0x21f   : > { %v1193_v13 = vpack.c.bf16 %v1168_v10, %v1167_v9 }
 0x221   : > { %4126 = vmatprep.mubr.msk.bf16.mxu1 %vm1226_vm1, %v1193_v13 }
 0x222   : > { %4127 = vmatmul.mubr.msk.bf16.gmra.mrb[44].mxu1 %vm1226_vm1, %v1194_v12 }
 0x227   : > { %v4096_v14 = vpop.f32.mrb[16].mxu1 }
 0x228   : > { %v1101_v15 = vadd.f32 %v4096_v14, %v4642_v3  ;;  %v1092_v16 = vpop.f32.mrb[17].mxu1 }
 0x229   : > { %v1093_v17 = vadd.f32 %v4642_v3, %v1092_v16  ;;  %v4097_v18 = vpop.f32.mrb[18].mxu1 }
 0x22a   : > { %v1104_v19 = vadd.f32 %v4097_v18, %v4642_v3  ;;  %v1095_v20 = vpop.f32.mrb[19].mxu1  ;;  %v1173_v22 = vmax.f32 %v1101_v15, 0.0 }
 0x22b   : > { %v1096_v21 = vadd.f32 %v4642_v3, %v1095_v20  ;;  %v1171_v24 = vmax.f32 %v1093_v17, 0.0 }
 0x22c   : > { %v1174_v23 = vmax.f32 %v1104_v19, 0.0 }
 0x22d   : > { %v1172_v25 = vmax.f32 %v1096_v21, 0.0 }
 0x22e   : > { %v1196_v26 = vpack.c.bf16 %v1174_v23, %v1173_v22  ;;  %v4696_v23 = vld [vmem:[%s5550_s7] ss:$0 sm:$0xff] }
 0x22f   : > { %v1195_v27 = vpack.c.bf16 %v1172_v25, %v1171_v24 }
 0x231   : > { %4130 = vmatprep.mubr.msk.bf16.mxu1 %vm1226_vm1, %v1195_v27 }
 0x232   : > { %4131 = vmatmul.mubr.msk.bf16.gmra.mrb[48].mxu1 %vm1226_vm1, %v1196_v26  ;;  %v4702_v26 = vld [vmem:[%s5551_s8] ss:$0 sm:$0xff] }
 0x237   : > { %v4100_v28 = vpop.f32.mrb[20].mxu1 }
 0x238   : > { %v1117_v29 = vadd.f32 %v4100_v28, %v4642_v3  ;;  %v1108_v30 = vpop.f32.mrb[21].mxu1 }
 0x239   : > { %v1109_v31 = vadd.f32 %v4642_v3, %v1108_v30  ;;  %v4101_v32 = vpop.f32.mrb[22].mxu1 }
 0x23a   : > { %v1120_v43 = vadd.f32 %v4101_v32, %v4642_v3  ;;  %v1111_v49 = vpop.f32.mrb[23].mxu1  ;;  %v1177_v51 = vmax.f32 %v1117_v29, 0.0 }
 0x23b   : > { %v1112_v50 = vadd.f32 %v4642_v3, %v1111_v49  ;;  %v1175_v53 = vmax.f32 %v1109_v31, 0.0 }
 0x23c   : > { %v1178_v52 = vmax.f32 %v1120_v43, 0.0 }
 0x23d   : > { %v1176_v54 = vmax.f32 %v1112_v50, 0.0  ;;  %v4711_v50 = vld [vmem:[%s5552_s9] ss:$0 sm:$0xff] }
 0x23e   : > { %v1198_v55 = vpack.c.bf16 %v1178_v52, %v1177_v51 }
 0x23f   : > { %v1197_v56 = vpack.c.bf16 %v1176_v54, %v1175_v53 }
 0x241   : > { %4134 = vmatprep.mubr.msk.bf16.mxu1 %vm1226_vm1, %v1197_v56 }
 0x242   : > { %4135 = vmatmul.mubr.msk.bf16.gmra.mrb[52].mxu1 %vm1226_vm1, %v1198_v55 }
 0x247   : > { %v4104_v57 = vpop.f32.mrb[24].mxu1 }
 0x248   : > { %v1133_v58 = vadd.f32 %v4104_v57, %v4642_v3  ;;  %v1124_v59 = vpop.f32.mrb[25].mxu1 }
 0x249   : > { %v1125_v60 = vadd.f32 %v4642_v3, %v1124_v59  ;;  %v4105_v61 = vpop.f32.mrb[26].mxu1 }
 0x24a   : > { %v1136_v62 = vadd.f32 %v4105_v61, %v4642_v3  ;;  %v1127_v63 = vpop.f32.mrb[27].mxu1  ;;  %v1181_v1 = vmax.f32 %v1133_v58, 0.0 }
 0x24b   : > { %v1128_v0 = vadd.f32 %v4642_v3, %v1127_v63  ;;  %v1179_v4 = vmax.f32 %v1125_v60, 0.0 }
 0x24c   : > { %v1182_v2 = vmax.f32 %v1136_v62, 0.0 }
 0x24d   : > { %v1180_v5 = vmax.f32 %v1128_v0, 0.0 }
 0x24e   : > { %v1200_v6 = vpack.c.bf16 %v1182_v2, %v1181_v1 }
 0x24f   : > { %v1199_v7 = vpack.c.bf16 %v1180_v5, %v1179_v4 }
 0x251   : > { %4138 = vmatprep.mubr.msk.bf16.mxu1 %vm1226_vm1, %v1199_v7 }
 0x252   : > { %4139 = vmatmul.mubr.msk.bf16.gmra.mrb[56].mxu1 %vm1226_vm1, %v1200_v6 }
 0x257   : > { %v4108_v8 = vpop.f32.mrb[28].mxu1 }
 0x258   : > { %v1149_v9 = vadd.f32 %v4108_v8, %v4642_v3  ;;  %v1140_v10 = vpop.f32.mrb[29].mxu1 }
 0x259   : > { %v1141_v12 = vadd.f32 %v4642_v3, %v1140_v10  ;;  %v4109_v13 = vpop.f32.mrb[30].mxu1 }
 0x25a   : > { %v1152_v14 = vadd.f32 %v4109_v13, %v4642_v3  ;;  %v1143_v15 = vpop.f32.mrb[31].mxu1  ;;  %v1185_v17 = vmax.f32 %v1149_v9, 0.0 }
 0x25b   : > { %v1144_v16 = vadd.f32 %v4642_v3, %v1143_v15  ;;  %v1183_v19 = vmax.f32 %v1141_v12, 0.0 }
 0x25c   : > { %v1186_v18 = vmax.f32 %v1152_v14, 0.0 }
 0x25d   : > { %v1184_v20 = vmax.f32 %v1144_v16, 0.0 }
 0x25e   : > { %v1202_v21 = vpack.c.bf16 %v1186_v18, %v1185_v17 }
 0x25f   : > { %v1201_v22 = vpack.c.bf16 %v1184_v20, %v1183_v19 }
 0x261   : > { %4142 = vmatprep.mubr.msk.bf16.mxu1 %vm1226_vm1, %v1201_v22 }
 0x262   : > { %4143 = vmatmul.mubr.msk.bf16.gmra.mrb[60].mxu1 %vm1226_vm1, %v1202_v21 }
 0x263   : > { %1594 = vmatprep.mubr.bf16.mxu1 %v4530_v11 }
 0x2c5   : > { %v4116_v24 = vpop.f32.mrb[32].mxu1 }
 0x2c6   : > { %v1318_v3 = vadd.f32 %v4116_v24, %v4696_v23  ;;  %v1309_v25 = vpop.f32.mrb[33].mxu1 }
 0x2c7   : > { %v1310_v27 = vadd.f32 %v4696_v23, %v1309_v25  ;;  %v4117_v28 = vpop.f32.mrb[34].mxu1 }
 0x2c8   : > { %v1438_v29 = vmax.f32 %v1318_v3, 0.0  ;;  %v1321_v11 = vadd.f32 %v4117_v28, %v4696_v23  ;;  %v1312_v30 = vpop.f32.mrb[35].mxu1 }
 0x2c9   : > { %v1436_v31 = vmax.f32 %v1310_v27, 0.0  ;;  %v1313_v32 = vadd.f32 %v4696_v23, %v1312_v30 }
 0x2ca   : > { %v1477_v43 = vmul.f32 %v4702_v26, %v1438_v29  ;;  %v1439_v49 = vmax.f32 %v1321_v11, 0.0 }
 0x2cb   : > { %v1475_v51 = vmul.f32 %v4702_v26, %v1436_v31  ;;  %v1437_v52 = vmax.f32 %v1313_v32, 0.0 }
 0x2cc   : > { %v1478_v53 = vmul.f32 %v4702_v26, %v1439_v49  ;;  %v4717_v55 = vadd.f32 %v4711_v50, %v1477_v43 }
 0x2cd   : > { %v1476_v54 = vmul.f32 %v4702_v26, %v1437_v52  ;;  %v4723_v57 = vadd.f32 %v4711_v50, %v1475_v51 }
 0x2ce   : > { %v4720_v56 = vadd.f32 %v4711_v50, %v1478_v53 }
 0x2cf   : > { %v4726_v58 = vadd.f32 %v4711_v50, %v1476_v54 }
 0x2d0   : > { %v1547_v59 = vpack.c.bf16 %v4720_v56, %v4717_v55 }
 0x2d1   : > { %v1546_v60 = vpack.c.bf16 %v4726_v58, %v4723_v57 }
 0x2d5   : > { %v4120_v61 = vpop.f32.mrb[36].mxu1 }
 0x2d6   : > { %v1334_v62 = vadd.f32 %v4120_v61, %v4696_v23  ;;  %v1325_v63 = vpop.f32.mrb[37].mxu1 }
 0x2d7   : > { %v1326_v0 = vadd.f32 %v4696_v23, %v1325_v63  ;;  %v4121_v1 = vpop.f32.mrb[38].mxu1 }
 0x2d8   : > { %v1442_v2 = vmax.f32 %v1334_v62, 0.0  ;;  %v1337_v4 = vadd.f32 %v4121_v1, %v4696_v23  ;;  %v1328_v5 = vpop.f32.mrb[39].mxu1 }
 0x2d9   : > { %v1440_v6 = vmax.f32 %v1326_v0, 0.0  ;;  %v1329_v7 = vadd.f32 %v4696_v23, %v1328_v5 }
 0x2da   : > { %v1481_v8 = vmul.f32 %v4702_v26, %v1442_v2  ;;  %v1443_v9 = vmax.f32 %v1337_v4, 0.0 }
 0x2db   : > { %v1479_v10 = vmul.f32 %v4702_v26, %v1440_v6  ;;  %v1441_v12 = vmax.f32 %v1329_v7, 0.0 }
 0x2dc   : > { %v1482_v13 = vmul.f32 %v4702_v26, %v1443_v9  ;;  %v4741_v15 = vadd.f32 %v4711_v50, %v1481_v8 }
 0x2dd   : > { %v1480_v14 = vmul.f32 %v4702_v26, %v1441_v12  ;;  %v4747_v17 = vadd.f32 %v4711_v50, %v1479_v10 }
 0x2de   : > { %v4744_v16 = vadd.f32 %v4711_v50, %v1482_v13 }
 0x2df   : > { %v4750_v18 = vadd.f32 %v4711_v50, %v1480_v14 }
 0x2e0   : > { %v1549_v19 = vpack.c.bf16 %v4744_v16, %v4741_v15 }
 0x2e1   : > { %v1548_v20 = vpack.c.bf16 %v4750_v18, %v4747_v17 }
 0x2e5   : > { %v4124_v21 = vpop.f32.mrb[40].mxu1 }
 0x2e6   : > { %v1350_v22 = vadd.f32 %v4124_v21, %v4696_v23  ;;  %v1341_v24 = vpop.f32.mrb[41].mxu1 }
 0x2e7   : > { %v1342_v3 = vadd.f32 %v4696_v23, %v1341_v24  ;;  %v4125_v25 = vpop.f32.mrb[42].mxu1 }
 0x2e8   : > { %v1446_v27 = vmax.f32 %v1350_v22, 0.0  ;;  %v1353_v28 = vadd.f32 %v4125_v25, %v4696_v23  ;;  %v1344_v29 = vpop.f32.mrb[43].mxu1 }
 0x2e9   : > { %v1444_v11 = vmax.f32 %v1342_v3, 0.0  ;;  %v1345_v30 = vadd.f32 %v4696_v23, %v1344_v29 }
 0x2ea   : > { %v1485_v31 = vmul.f32 %v4702_v26, %v1446_v27  ;;  %v1447_v32 = vmax.f32 %v1353_v28, 0.0 }
 0x2eb   : > { %v1483_v43 = vmul.f32 %v4702_v26, %v1444_v11  ;;  %v1445_v49 = vmax.f32 %v1345_v30, 0.0 }
 0x2ec   : > { %v1486_v51 = vmul.f32 %v4702_v26, %v1447_v32  ;;  %v4765_v53 = vadd.f32 %v4711_v50, %v1485_v31 }
 0x2ed   : > { %v1484_v52 = vmul.f32 %v4702_v26, %v1445_v49  ;;  %v4771_v61 = vadd.f32 %v4711_v50, %v1483_v43 }
 0x2ee   : > { %v4768_v54 = vadd.f32 %v4711_v50, %v1486_v51 }
 0x2ef   : > { %v4774_v62 = vadd.f32 %v4711_v50, %v1484_v52 }
 0x2f0   : > { %v1551_v63 = vpack.c.bf16 %v4768_v54, %v4765_v53 }
 0x2f1   : > { %v1550_v0 = vpack.c.bf16 %v4774_v62, %v4771_v61 }
 0x2f5   : > { %v4128_v1 = vpop.f32.mrb[44].mxu1 }
 0x2f6   : > { %v1366_v2 = vadd.f32 %v4128_v1, %v4696_v23  ;;  %v1357_v4 = vpop.f32.mrb[45].mxu1 }
 0x2f7   : > { %v1358_v5 = vadd.f32 %v4696_v23, %v1357_v4  ;;  %v4129_v6 = vpop.f32.mrb[46].mxu1 }
 0x2f8   : > { %v1450_v7 = vmax.f32 %v1366_v2, 0.0  ;;  %v1369_v8 = vadd.f32 %v4129_v6, %v4696_v23  ;;  %v1360_v9 = vpop.f32.mrb[47].mxu1 }
 0x2f9   : > { %v1448_v10 = vmax.f32 %v1358_v5, 0.0  ;;  %v1361_v12 = vadd.f32 %v4696_v23, %v1360_v9 }
 0x2fa   : > { %v1489_v13 = vmul.f32 %v4702_v26, %v1450_v7  ;;  %v1451_v14 = vmax.f32 %v1369_v8, 0.0 }
 0x2fb   : > { %v1487_v21 = vmul.f32 %v4702_v26, %v1448_v10  ;;  %v1449_v22 = vmax.f32 %v1361_v12, 0.0 }
 0x2fc   : > { %v1490_v24 = vmul.f32 %v4702_v26, %v1451_v14  ;;  %v4789_v25 = vadd.f32 %v4711_v50, %v1489_v13 }
 0x2fd   : > { %v1488_v3 = vmul.f32 %v4702_v26, %v1449_v22  ;;  %v4795_v28 = vadd.f32 %v4711_v50, %v1487_v21 }
 0x2fe   : > { %v4792_v27 = vadd.f32 %v4711_v50, %v1490_v24 }
 0x2ff   : > { %v4798_v29 = vadd.f32 %v4711_v50, %v1488_v3 }
 0x300   : > { %v1553_v11 = vpack.c.bf16 %v4792_v27, %v4789_v25  ;;  %v4893_v25 = vld [vmem:[%s4525_s30 + $0x20] ss:$8 sps:$4 sm:$0xff]   ;;  %v4897_v27 = vld [vmem:[%s4525_s30 + $0x34] ss:$8 sps:$4 sm:$0xff]  }
 0x301   : > { %v1552_v30 = vpack.c.bf16 %v4798_v29, %v4795_v28  ;;  %v4889_v28 = vld [vmem:[%s4525_s30 + $0x24] ss:$8 sps:$4 sm:$0xff]   ;;  %v4901_v29 = vld [vmem:[%s4525_s30 + $0x30] ss:$8 sps:$4 sm:$0xff]  }
 0x305   : > { %v4132_v31 = vpop.f32.mrb[48].mxu1 }
 0x306   : > { %v1382_v32 = vadd.f32 %v4132_v31, %v4696_v23  ;;  %v1373_v43 = vpop.f32.mrb[49].mxu1 }
 0x307   : > { %v1374_v49 = vadd.f32 %v4696_v23, %v1373_v43  ;;  %v4133_v51 = vpop.f32.mrb[50].mxu1 }
 0x308   : > { %v1454_v52 = vmax.f32 %v1382_v32, 0.0  ;;  %v1385_v1 = vadd.f32 %v4133_v51, %v4696_v23  ;;  %v1376_v2 = vpop.f32.mrb[51].mxu1 }
 0x309   : > { %v1452_v4 = vmax.f32 %v1374_v49, 0.0  ;;  %v1377_v5 = vadd.f32 %v4696_v23, %v1376_v2 }
 0x30a   : > { %v1493_v6 = vmul.f32 %v4702_v26, %v1454_v52  ;;  %v1455_v7 = vmax.f32 %v1385_v1, 0.0 }
 0x30b   : > { %v1491_v8 = vmul.f32 %v4702_v26, %v1452_v4  ;;  %v1453_v9 = vmax.f32 %v1377_v5, 0.0 }
 0x30c   : > { %v1494_v10 = vmul.f32 %v4702_v26, %v1455_v7  ;;  %v1532_v13 = vadd.f32 %v4711_v50, %v1493_v6 }
 0x30d   : > { %v1492_v12 = vmul.f32 %v4702_v26, %v1453_v9  ;;  %v1530_v21 = vadd.f32 %v4711_v50, %v1491_v8 }
 0x30e   : > { %v1533_v14 = vadd.f32 %v4711_v50, %v1494_v10 }
 0x30f   : > { %v1531_v22 = vadd.f32 %v4711_v50, %v1492_v12 }
 0x310   : > { %v1555_v24 = vpack.c.bf16 %v1533_v14, %v1532_v13 }
 0x311   : > { %v1554_v3 = vpack.c.bf16 %v1531_v22, %v1530_v21 }
 0x313   : > { %3755 = vmatprep.subr.bf16.mxu1 %v1554_v3 }
 0x314   : > { %3756 = vmatpush3.bf16.msra.mxu1 %v1546_v60 }
 0x315   : > { %v4136_v31 = vpop.f32.mrb[52].mxu1  ;;  %3757 = vmatprep.subr.bf16.mxu1 %v1555_v24 }
 0x316   : > { %v1398_v32 = vadd.f32 %v4136_v31, %v4696_v23  ;;  %v1389_v43 = vpop.f32.mrb[53].mxu1 }
 0x317   : > { %v1390_v49 = vadd.f32 %v4696_v23, %v1389_v43  ;;  %v4137_v51 = vpop.f32.mrb[54].mxu1 }
 0x318   : > { %v1458_v52 = vmax.f32 %v1398_v32, 0.0  ;;  %v1401_v1 = vadd.f32 %v4137_v51, %v4696_v23  ;;  %v1392_v2 = vpop.f32.mrb[55].mxu1  ;;  %3758 = vmatpush3.bf16.msra.mxu1 %v1547_v59 }
 0x319   : > { %v1456_v4 = vmax.f32 %v1390_v49, 0.0  ;;  %v1393_v57 = vadd.f32 %v4696_v23, %v1392_v2 }
 0x31a   : > { %v1497_v58 = vmul.f32 %v4702_v26, %v1458_v52  ;;  %v1459_v60 = vmax.f32 %v1401_v1, 0.0 }
 0x31b   : > { %v1495_v5 = vmul.f32 %v4702_v26, %v1456_v4  ;;  %v1457_v6 = vmax.f32 %v1393_v57, 0.0 }
 0x31c   : > { %v1498_v7 = vmul.f32 %v4702_v26, %v1459_v60  ;;  %v1536_v9 = vadd.f32 %v4711_v50, %v1497_v58 }
 0x31d   : > { %v1496_v8 = vmul.f32 %v4702_v26, %v1457_v6  ;;  %v1534_v55 = vadd.f32 %v4711_v50, %v1495_v5 }
 0x31e   : > { %v1537_v10 = vadd.f32 %v4711_v50, %v1498_v7 }
 0x31f   : > { %v1535_v56 = vadd.f32 %v4711_v50, %v1496_v8 }
 0x320   : > { %v1557_v59 = vpack.c.bf16 %v1537_v10, %v1536_v9 }
 0x321   : > { %v1556_v12 = vpack.c.bf16 %v1535_v56, %v1534_v55 }
 0x323   : > { %3759 = vmatprep.subr.bf16.mxu1 %v1556_v12 }
 0x324   : > { %3760 = vmatpush3.bf16.msra.mxu1 %v1548_v20 }
 0x325   : > { %v4140_v13 = vpop.f32.mrb[56].mxu1  ;;  %3761 = vmatprep.subr.bf16.mxu1 %v1557_v59 }
 0x326   : > { %v1414_v14 = vadd.f32 %v4140_v13, %v4696_v23  ;;  %v1405_v21 = vpop.f32.mrb[57].mxu1 }
 0x327   : > { %v1406_v22 = vadd.f32 %v4696_v23, %v1405_v21  ;;  %v4141_v24 = vpop.f32.mrb[58].mxu1 }
 0x328   : > { %v1462_v3 = vmax.f32 %v1414_v14, 0.0  ;;  %v1417_v31 = vadd.f32 %v4141_v24, %v4696_v23  ;;  %v1408_v32 = vpop.f32.mrb[59].mxu1  ;;  %3762 = vmatpush3.bf16.msra.mxu1 %v1549_v19  ;;  %v4913_v24 = vld [vmem:[%s4525_s30 + $0x54] ss:$8 sps:$4 sm:$0xff]  }
 0x329   : > { %v1460_v43 = vmax.f32 %v1406_v22, 0.0  ;;  %v1409_v17 = vadd.f32 %v4696_v23, %v1408_v32  ;;  %v4885_v22 = vld [vmem:[%s4525_s30 + $0x10] ss:$8 sps:$4 sm:$0xff]   ;;  %v4925_v32 = vld [vmem:[%s4525_s30 + $0x60] ss:$8 sps:$4 sm:$0xff]  }
 0x32a   : > { %v1501_v18 = vmul.f32 %v4702_v26, %v1462_v3  ;;  %v1463_v20 = vmax.f32 %v1417_v31, 0.0  ;;  %v4917_v3 = vld [vmem:[%s4525_s30 + $0x50] ss:$8 sps:$4 sm:$0xff]   ;;  %v4921_v31 = vld [vmem:[%s4525_s30 + $0x64] ss:$8 sps:$4 sm:$0xff]  }
 0x32b   : > { %v1499_v49 = vmul.f32 %v4702_v26, %v1460_v43  ;;  %v1461_v51 = vmax.f32 %v1409_v17, 0.0  ;;  %v4929_v43 = vld [vmem:[%s4525_s30 + $0x74] ss:$8 sps:$4 sm:$0xff]   ;;  %v4933_v17 = vld [vmem:[%s4525_s30 + $0x70] ss:$8 sps:$4 sm:$0xff]  }
 0x32c   : > { %v1502_v52 = vmul.f32 %v4702_v26, %v1463_v20  ;;  %v1540_v2 = vadd.f32 %v4711_v50, %v1501_v18  ;;  %v4937_v18 = vld [vmem:[%s4525_s30 + $0x84] ss:$8 sps:$4 sm:$0xff]  }
 0x32d   : > { %v1500_v1 = vmul.f32 %v4702_v26, %v1461_v51  ;;  %v1538_v15 = vadd.f32 %v4711_v50, %v1499_v49  ;;  %v4375_v20 = vld [vmem:[%s5547_s4] sm:$0xff]  }
 0x32e   : > { %v1541_v4 = vadd.f32 %v4711_v50, %v1502_v52  ;;  %4146 = vmatprep.subr.bf16.mxu0 %v4375_v20 }
 0x32f   : > { %v1539_v16 = vadd.f32 %v4711_v50, %v1500_v1  ;;  %4147 = vmatpush3.bf16.msra.mxu0 %v4375_v20 }
 0x330   : > { %v1559_v19 = vpack.c.bf16 %v1541_v4, %v1540_v2 }
 0x331   : > { %v1558_v57 = vpack.c.bf16 %v1539_v16, %v1538_v15 }
 0x333   : > { %3763 = vmatprep.subr.bf16.mxu1 %v1558_v57 }
 0x334   : > { %3764 = vmatpush3.bf16.msra.mxu1 %v1550_v0 }
 0x335   : > { %v4144_v58 = vpop.f32.mrb[60].mxu1  ;;  %3765 = vmatprep.subr.bf16.mxu1 %v1559_v19 }
 0x336   : > { %v1430_v60 = vadd.f32 %v4144_v58, %v4696_v23  ;;  %v1421_v5 = vpop.f32.mrb[61].mxu1 }
 0x337   : > { %v1422_v6 = vadd.f32 %v4696_v23, %v1421_v5  ;;  %v4145_v7 = vpop.f32.mrb[62].mxu1 }
 0x338   : > { %v1466_v8 = vmax.f32 %v1430_v60, 0.0  ;;  %v1433_v9 = vadd.f32 %v4145_v7, %v4696_v23  ;;  %v1424_v10 = vpop.f32.mrb[63].mxu1  ;;  %3766 = vmatpush3.bf16.msra.mxu1 %v1551_v63 }
 0x339   : > { %v1464_v55 = vmax.f32 %v1422_v6, 0.0  ;;  %v1425_v61 = vadd.f32 %v4696_v23, %v1424_v10 }
 0x33a   : > { %v1505_v62 = vmul.f32 %v4702_v26, %v1466_v8  ;;  %v1467_v0 = vmax.f32 %v1433_v9, 0.0 }
 0x33b   : > { %v1503_v56 = vmul.f32 %v4702_v26, %v1464_v55  ;;  %v1465_v59 = vmax.f32 %v1425_v61, 0.0 }
 0x33c   : > { %v1506_v12 = vmul.f32 %v4702_v26, %v1467_v0  ;;  %v1544_v14 = vadd.f32 %v4711_v50, %v1505_v62 }
 0x33d   : > { %v1504_v13 = vmul.f32 %v4702_v26, %v1465_v59  ;;  %v1542_v23 = vadd.f32 %v4711_v50, %v1503_v56  ;;  %v4877_v26 = vld [vmem:[%s4525_s30] ss:$8 sps:$4 sm:$0xff]  }
 0x33e   : > { %v1545_v53 = vadd.f32 %v4711_v50, %v1506_v12 }
 0x33f   : > { %v1543_v54 = vadd.f32 %v4711_v50, %v1504_v13  ;;  %v4881_v50 = vld [vmem:[%s4525_s30 + $0x14] ss:$8 sps:$4 sm:$0xff]  }
 0x340   : > { %v1561_v63 = vpack.c.bf16 %v1545_v53, %v1544_v14 }
 0x341   : > { %v1560_v21 = vpack.c.bf16 %v1543_v54, %v1542_v23 }
 0x343   : > { %3767 = vmatprep.subr.bf16.mxu1 %v1560_v21 }
 0x344   : > { %3768 = vmatpush3.bf16.msra.mxu1 %v1552_v30  ;;  %v4909_v30 = vld [vmem:[%s4525_s30 + $0x40] ss:$8 sps:$4 sm:$0xff]  }
 0x345   : > { %3769 = vmatprep.subr.bf16.mxu1 %v1561_v63 }
 0x348   : > { %3770 = vmatpush3.bf16.msra.mxu1 %v1553_v11  ;;  %v4905_v11 = vld [vmem:[%s4525_s30 + $0x44] ss:$8 sps:$4 sm:$0xff]  }
 0x34b   : > { %1595 = vmatmul.mubr.bf16.vlgmr.msra.gmra.mrb[64].mxu1 %v4877_v26 }
 0x34c   : > { %1602 = vmatprep.mubr.bf16.mxu1 %v4881_v50 }
 0x353   : > { %1603 = vmatmul.mubr.bf16.gmra.mrb[68].mxu1 %v4885_v22 }
 0x354   : > { %1610 = vmatprep.mubr.bf16.mxu1 %v4889_v28 }
 0x35b   : > { %1611 = vmatmul.mubr.bf16.gmra.mrb[72].mxu1 %v4893_v25 }
 0x35c   : > { %1618 = vmatprep.mubr.bf16.mxu1 %v4897_v27 }
 0x363   : > { %1619 = vmatmul.mubr.bf16.gmra.mrb[76].mxu1 %v4901_v29 }
 0x364   : > { %1626 = vmatprep.mubr.bf16.mxu1 %v4905_v11 }
 0x36b   : > { %1627 = vmatmul.mubr.bf16.gmra.mrb[80].mxu1 %v4909_v30 }
 0x36c   : > { %1634 = vmatprep.mubr.bf16.mxu1 %v4913_v24 }
 0x373   : > { %1635 = vmatmul.mubr.bf16.gmra.mrb[84].mxu1 %v4917_v3 }
 0x374   : > { %1642 = vmatprep.mubr.bf16.mxu1 %v4921_v31 }
 0x37b   : > { %1643 = vmatmul.mubr.bf16.gmra.mrb[88].mxu1 %v4925_v32 }
 0x37c   : > { %1650 = vmatprep.mubr.bf16.mxu1 %v4929_v43 }
 0x383   : > { %1651 = vmatmul.mubr.bf16.gmra.mrb[92].mxu1 %v4933_v17 }
 0x384   : > { %1658 = vmatprep.mubr.bf16.mxu1 %v4937_v18 }
 0x38b   : > { %1659 = vmatmul.mubr.bf16.gmra.mrb[96].mxu1 %v4555_v33  ;;  %v4376_v33 = vld [vmem:[%s5547_s4 + $0x8] sm:$0xff]  }
 0x38c   : > { %1666 = vmatprep.mubr.bf16.mxu1 %v4558_v34  ;;  %4148 = vmatprep.subr.bf16.mxu0 %v4376_v33  ;;  %v4405_v34 = vld [vmem:[%s4525_s30 + $0x4] ss:$8 sps:$4 sm:$0xff]  }
 0x38d   : > { %4149 = vmatpush3.bf16.msra.mxu0 %v4376_v33 }
 0x393   : > { %1667 = vmatmul.mubr.bf16.gmra.mrb[100].mxu1 %v4563_v35 }
 0x394   : > { %1674 = vmatprep.mubr.bf16.mxu1 %v4566_v36 }
 0x39b   : > { %1675 = vmatmul.mubr.bf16.gmra.mrb[104].mxu1 %v4571_v37 }
 0x39c   : > { %1682 = vmatprep.mubr.bf16.mxu1 %v4574_v38 }
 0x3a3   : > { %1683 = vmatmul.mubr.bf16.gmra.mrb[108].mxu1 %v4579_v39 }
 0x3a4   : > { %1690 = vmatprep.mubr.bf16.mxu1 %v4582_v40 }
 0x3ab   : > { %1691 = vmatmul.mubr.bf16.gmra.mrb[112].mxu1 %v4587_v41 }
 0x3ac   : > { %1698 = vmatprep.mubr.bf16.mxu1 %v4590_v42 }
 0x3b3   : > { %1699 = vmatmul.mubr.bf16.gmra.mrb[116].mxu1 %v4598_v44 }
 0x3b4   : > { %1706 = vmatprep.mubr.bf16.mxu1 %v4601_v45 }
 0x3bb   : > { %1707 = vmatmul.mubr.bf16.gmra.mrb[120].mxu1 %v4606_v46 }
 0x3bc   : > { %1714 = vmatprep.mubr.bf16.mxu1 %v4609_v47 }
 0x3c3   : > { %1715 = vmatmul.mubr.bf16.gmra.mrb[124].mxu1 %v4614_v48 }
 0x3c4   : > { %2414 = vmatprep.mubr.bf16.mxu1 %v4405_v34 }
 0x41e   : > { %v3771_v35 = vpop.f32.mrb[64].mxu1 }
 0x41f   : > { %v3772_v36 = vpop.f32.mrb[65].mxu1 }
 0x420   : > { %v3773_v37 = vadd.f32 %v3772_v36, %v3771_v35  ;;  %v3774_v38 = vpop.f32.mrb[66].mxu1 }
 0x421   : > { %v3775_v39 = vpop.f32.mrb[67].mxu1 }
 0x422   : > { %v3776_v40 = vadd.f32 %v3775_v39, %v3774_v38 }
 0x424   : > { %v1727_v41 = vpack.c.bf16 %v3776_v40, %v3773_v37 }
 0x426   : > { %v3777_v42 = vpop.f32.mrb[68].mxu1  ;;  %4150 = vmatprep.mubr.msk.bf16.mxu0 %vm1226_vm1, %v1727_v41 }
 0x427   : > { %v3778_v44 = vpop.f32.mrb[69].mxu1 }
 0x428   : > { %v3779_v45 = vadd.f32 %v3778_v44, %v3777_v42  ;;  %v3780_v49 = vpop.f32.mrb[70].mxu1 }
 0x429   : > { %v3781_v46 = vpop.f32.mrb[71].mxu1 }
 0x42a   : > { %v3782_v51 = vadd.f32 %v3781_v46, %v3780_v49 }
 0x42c   : > { %v1728_v47 = vpack.c.bf16 %v3782_v51, %v3779_v45 }
 0x42e   : > { %v3783_v52 = vpop.f32.mrb[72].mxu1  ;;  %4151 = vmatmul.mubr.msk.bf16.vlgmr.msra.gmra.mrb[64].mxu0 %vm1226_vm1, %v1728_v47 }
 0x42f   : > { %v3784_v48 = vpop.f32.mrb[73].mxu1 }
 0x430   : > { %v3785_v1 = vadd.f32 %v3784_v48, %v3783_v52  ;;  %v3786_v2 = vpop.f32.mrb[74].mxu1 }
 0x431   : > { %v3787_v4 = vpop.f32.mrb[75].mxu1 }
 0x432   : > { %v3788_v15 = vadd.f32 %v3787_v4, %v3786_v2 }
 0x434   : > { %v1729_v16 = vpack.c.bf16 %v3788_v15, %v3785_v1 }
 0x436   : > { %v3789_v19 = vpop.f32.mrb[76].mxu1  ;;  %4154 = vmatprep.mubr.msk.bf16.mxu0 %vm1226_vm1, %v1729_v16 }
 0x437   : > { %v3790_v57 = vpop.f32.mrb[77].mxu1 }
 0x438   : > { %v3791_v58 = vadd.f32 %v3790_v57, %v3789_v19  ;;  %v3792_v60 = vpop.f32.mrb[78].mxu1 }
 0x439   : > { %v3793_v5 = vpop.f32.mrb[79].mxu1 }
 0x43a   : > { %v3794_v6 = vadd.f32 %v3793_v5, %v3792_v60 }
 0x43c   : > { %v1730_v7 = vpack.c.bf16 %v3794_v6, %v3791_v58 }
 0x43e   : > { %v3795_v8 = vpop.f32.mrb[80].mxu1  ;;  %4155 = vmatmul.mubr.msk.bf16.gmra.mrb[68].mxu0 %vm1226_vm1, %v1730_v7 }
 0x43f   : > { %v3796_v9 = vpop.f32.mrb[81].mxu1 }
 0x440   : > { %v3797_v10 = vadd.f32 %v3796_v9, %v3795_v8  ;;  %v3798_v55 = vpop.f32.mrb[82].mxu1 }
 0x441   : > { %v3799_v61 = vpop.f32.mrb[83].mxu1 }
 0x442   : > { %v3800_v62 = vadd.f32 %v3799_v61, %v3798_v55 }
 0x444   : > { %v1731_v0 = vpack.c.bf16 %v3800_v62, %v3797_v10 }
 0x446   : > { %v3801_v56 = vpop.f32.mrb[84].mxu1  ;;  %4158 = vmatprep.mubr.msk.bf16.mxu0 %vm1226_vm1, %v1731_v0 }
 0x447   : > { %v3802_v59 = vpop.f32.mrb[85].mxu1 }
 0x448   : > { %v3803_v12 = vadd.f32 %v3802_v59, %v3801_v56  ;;  %v3804_v13 = vpop.f32.mrb[86].mxu1 }
 0x449   : > { %v3805_v14 = vpop.f32.mrb[87].mxu1 }
 0x44a   : > { %v3806_v53 = vadd.f32 %v3805_v14, %v3804_v13 }
 0x44c   : > { %v1732_v23 = vpack.c.bf16 %v3806_v53, %v3803_v12 }
 0x44e   : > { %v3807_v54 = vpop.f32.mrb[88].mxu1  ;;  %4159 = vmatmul.mubr.msk.bf16.gmra.mrb[72].mxu0 %vm1226_vm1, %v1732_v23 }
 0x44f   : > { %v3808_v63 = vpop.f32.mrb[89].mxu1 }
 0x450   : > { %v3809_v21 = vadd.f32 %v3808_v63, %v3807_v54  ;;  %v3810_v20 = vpop.f32.mrb[90].mxu1  ;;  %v4377_v54 = vld [vmem:[%s5549_s6 + $0x10] sm:$0xff]  }
 0x451   : > { %v3811_v33 = vpop.f32.mrb[91].mxu1  ;;  %4182 = vmatprep.subr.bf16.mxu0 %v4377_v54 }
 0x452   : > { %v3812_v34 = vadd.f32 %v3811_v33, %v3810_v20  ;;  %4183 = vmatpush3.bf16.msra.mxu0 %v4377_v54  ;;  %v4378_v20 = vld [vmem:[%s5549_s6 + $0x18] sm:$0xff]  }
 0x453   : > { %4184 = vmatprep.subr.bf16.mxu0 %v4378_v20 }
 0x454   : > { %v1733_v35 = vpack.c.bf16 %v3812_v34, %v3809_v21 }
 0x456   : > { %v3813_v36 = vpop.f32.mrb[92].mxu1  ;;  %4162 = vmatprep.mubr.msk.bf16.mxu0 %vm1226_vm1, %v1733_v35  ;;  %4185 = vmatpush3.bf16.msra.mxu0 %v4378_v20 }
 0x457   : > { %v3814_v37 = vpop.f32.mrb[93].mxu1 }
 0x458   : > { %v3815_v38 = vadd.f32 %v3814_v37, %v3813_v36  ;;  %v3816_v39 = vpop.f32.mrb[94].mxu1 }
 0x459   : > { %v3817_v40 = vpop.f32.mrb[95].mxu1 }
 0x45a   : > { %v3818_v41 = vadd.f32 %v3817_v40, %v3816_v39 }
 0x45c   : > { %v1734_v42 = vpack.c.bf16 %v3818_v41, %v3815_v38 }
 0x45e   : > { %v3819_v44 = vpop.f32.mrb[96].mxu1  ;;  %4163 = vmatmul.mubr.msk.bf16.gmra.mrb[76].mxu0 %vm1226_vm1, %v1734_v42 }
 0x45f   : > { %v3820_v45 = vpop.f32.mrb[97].mxu1 }
 0x460   : > { %v3821_v49 = vadd.f32 %v3820_v45, %v3819_v44  ;;  %v3822_v46 = vpop.f32.mrb[98].mxu1 }
 0x461   : > { %v3823_v51 = vpop.f32.mrb[99].mxu1 }
 0x462   : > { %v3824_v47 = vadd.f32 %v3823_v51, %v3822_v46 }
 0x464   : > { %v1735_v52 = vpack.c.bf16 %v3824_v47, %v3821_v49 }
 0x466   : > { %v3825_v48 = vpop.f32.mrb[100].mxu1  ;;  %4166 = vmatprep.mubr.msk.bf16.mxu0 %vm1226_vm1, %v1735_v52 }
 0x467   : > { %v3826_v1 = vpop.f32.mrb[101].mxu1 }
 0x468   : > { %v3827_v2 = vadd.f32 %v3826_v1, %v3825_v48  ;;  %v3828_v4 = vpop.f32.mrb[102].mxu1 }
 0x469   : > { %v3829_v15 = vpop.f32.mrb[103].mxu1 }
 0x46a   : > { %v3830_v16 = vadd.f32 %v3829_v15, %v3828_v4  ;;  %v4987_v4 = vld [vmem:[%s5548_s5 + $0x1] ss:$0 sm:$0xff] }
 0x46c   : > { %v1736_v19 = vpack.c.bf16 %v3830_v16, %v3827_v2 }
 0x46e   : > { %v3831_v57 = vpop.f32.mrb[104].mxu1  ;;  %4167 = vmatmul.mubr.msk.bf16.gmra.mrb[80].mxu0 %vm1226_vm1, %v1736_v19 }
 0x46f   : > { %v3832_v58 = vpop.f32.mrb[105].mxu1 }
 0x470   : > { %v3833_v60 = vadd.f32 %v3832_v58, %v3831_v57  ;;  %v3834_v5 = vpop.f32.mrb[106].mxu1 }
 0x471   : > { %v3835_v6 = vpop.f32.mrb[107].mxu1 }
 0x472   : > { %v3836_v7 = vadd.f32 %v3835_v6, %v3834_v5 }
 0x474   : > { %v1737_v8 = vpack.c.bf16 %v3836_v7, %v3833_v60 }
 0x476   : > { %v3837_v9 = vpop.f32.mrb[108].mxu1  ;;  %4170 = vmatprep.mubr.msk.bf16.mxu0 %vm1226_vm1, %v1737_v8 }
 0x477   : > { %v3838_v10 = vpop.f32.mrb[109].mxu1 }
 0x478   : > { %v3839_v55 = vadd.f32 %v3838_v10, %v3837_v9  ;;  %v3840_v61 = vpop.f32.mrb[110].mxu1 }
 0x479   : > { %v3841_v62 = vpop.f32.mrb[111].mxu1 }
 0x47a   : > { %v3842_v0 = vadd.f32 %v3841_v62, %v3840_v61 }
 0x47c   : > { %v1738_v56 = vpack.c.bf16 %v3842_v0, %v3839_v55 }
 0x47e   : > { %v3843_v59 = vpop.f32.mrb[112].mxu1  ;;  %4171 = vmatmul.mubr.msk.bf16.gmra.mrb[84].mxu0 %vm1226_vm1, %v1738_v56 }
 0x47f   : > { %v3844_v12 = vpop.f32.mrb[113].mxu1 }
 0x480   : > { %v3845_v13 = vadd.f32 %v3844_v12, %v3843_v59  ;;  %v3846_v14 = vpop.f32.mrb[114].mxu1 }
 0x481   : > { %v3847_v53 = vpop.f32.mrb[115].mxu1 }
 0x482   : > { %v3848_v23 = vadd.f32 %v3847_v53, %v3846_v14 }
 0x484   : > { %v1739_v63 = vpack.c.bf16 %v3848_v23, %v3845_v13 }
 0x486   : > { %v3849_v21 = vpop.f32.mrb[116].mxu1  ;;  %4174 = vmatprep.mubr.msk.bf16.mxu0 %vm1226_vm1, %v1739_v63 }
 0x487   : > { %v3850_v33 = vpop.f32.mrb[117].mxu1 }
 0x488   : > { %v3851_v34 = vadd.f32 %v3850_v33, %v3849_v21  ;;  %v3852_v35 = vpop.f32.mrb[118].mxu1 }
 0x489   : > { %v3853_v36 = vpop.f32.mrb[119].mxu1 }
 0x48a   : > { %v3854_v37 = vadd.f32 %v3853_v36, %v3852_v35 }
 0x48c   : > { %v1740_v38 = vpack.c.bf16 %v3854_v37, %v3851_v34 }
 0x48e   : > { %v3855_v39 = vpop.f32.mrb[120].mxu1  ;;  %4175 = vmatmul.mubr.msk.bf16.gmra.mrb[88].mxu0 %vm1226_vm1, %v1740_v38 }
 0x48f   : > { %v3856_v40 = vpop.f32.mrb[121].mxu1 }
 0x490   : > { %v3857_v41 = vadd.f32 %v3856_v40, %v3855_v39  ;;  %v3858_v42 = vpop.f32.mrb[122].mxu1 }
 0x491   : > { %v3859_v44 = vpop.f32.mrb[123].mxu1 }
 0x492   : > { %v3860_v45 = vadd.f32 %v3859_v44, %v3858_v42 }
 0x494   : > { %v1741_v49 = vpack.c.bf16 %v3860_v45, %v3857_v41 }
 0x496   : > { %v3861_v46 = vpop.f32.mrb[124].mxu1  ;;  %4178 = vmatprep.mubr.msk.bf16.mxu0 %vm1226_vm1, %v1741_v49 }
 0x497   : > { %v3862_v51 = vpop.f32.mrb[125].mxu1 }
 0x498   : > { %v3863_v47 = vadd.f32 %v3862_v51, %v3861_v46  ;;  %v3864_v52 = vpop.f32.mrb[126].mxu1 }
 0x499   : > { %v3865_v48 = vpop.f32.mrb[127].mxu1 }
 0x49a   : > { %v3866_v1 = vadd.f32 %v3865_v48, %v3864_v52 }
 0x49c   : > { %v1742_v2 = vpack.c.bf16 %v3866_v1, %v3863_v47 }
 0x49e   : > { %4179 = vmatmul.mubr.msk.bf16.gmra.mrb[92].mxu0 %vm1226_vm1, %v1742_v2 }
 0x501   : > { %v4152_v15 = vpop.f32.mrb[64].mxu0 }
 0x502   : > { %v1854_v16 = vadd.f32 %v4152_v15, %v4987_v4  ;;  %v1845_v19 = vpop.f32.mrb[65].mxu0 }
 0x503   : > { %v1846_v57 = vadd.f32 %v4987_v4, %v1845_v19  ;;  %v4153_v58 = vpop.f32.mrb[66].mxu0 }
 0x504   : > { %v1857_v60 = vadd.f32 %v4153_v58, %v4987_v4  ;;  %v1848_v5 = vpop.f32.mrb[67].mxu0  ;;  %v1974_v7 = vmax.f32 %v1854_v16, 0.0 }
 0x505   : > { %v1849_v6 = vadd.f32 %v4987_v4, %v1848_v5  ;;  %v1972_v9 = vmax.f32 %v1846_v57, 0.0 }
 0x506   : > { %v1975_v8 = vmax.f32 %v1857_v60, 0.0 }
 0x507   : > { %v1973_v10 = vmax.f32 %v1849_v6, 0.0 }
 0x508   : > { %v2005_v55 = vpack.c.bf16 %v1975_v8, %v1974_v7 }
 0x509   : > { %v2004_v61 = vpack.c.bf16 %v1973_v10, %v1972_v9 }
 0x50b   : > { %4186 = vmatprep.mubr.msk.bf16.mxu0 %vm1226_vm1, %v2004_v61 }
 0x50c   : > { %4187 = vmatmul.mubr.msk.bf16.vlgmr.msra.gmra.mrb[96].mxu0 %vm1226_vm1, %v2005_v55 }
 0x511   : > { %v4156_v62 = vpop.f32.mrb[68].mxu0 }
 0x512   : > { %v1870_v0 = vadd.f32 %v4156_v62, %v4987_v4  ;;  %v1861_v56 = vpop.f32.mrb[69].mxu0 }
 0x513   : > { %v1862_v59 = vadd.f32 %v4987_v4, %v1861_v56  ;;  %v4157_v12 = vpop.f32.mrb[70].mxu0 }
 0x514   : > { %v1873_v13 = vadd.f32 %v4157_v12, %v4987_v4  ;;  %v1864_v14 = vpop.f32.mrb[71].mxu0  ;;  %v1978_v23 = vmax.f32 %v1870_v0, 0.0 }
 0x515   : > { %v1865_v53 = vadd.f32 %v4987_v4, %v1864_v14  ;;  %v1976_v63 = vmax.f32 %v1862_v59, 0.0 }
 0x516   : > { %v1979_v54 = vmax.f32 %v1873_v13, 0.0 }
 0x517   : > { %v1977_v21 = vmax.f32 %v1865_v53, 0.0 }
 0x518   : > { %v2007_v20 = vpack.c.bf16 %v1979_v54, %v1978_v23 }
 0x519   : > { %v2006_v33 = vpack.c.bf16 %v1977_v21, %v1976_v63 }
 0x51b   : > { %4190 = vmatprep.mubr.msk.bf16.mxu0 %vm1226_vm1, %v2006_v33 }
 0x51c   : > { %4191 = vmatmul.mubr.msk.bf16.gmra.mrb[100].mxu0 %vm1226_vm1, %v2007_v20 }
 0x521   : > { %v4160_v34 = vpop.f32.mrb[72].mxu0 }
 0x522   : > { %v1886_v35 = vadd.f32 %v4160_v34, %v4987_v4  ;;  %v1877_v36 = vpop.f32.mrb[73].mxu0 }
 0x523   : > { %v1878_v37 = vadd.f32 %v4987_v4, %v1877_v36  ;;  %v4161_v38 = vpop.f32.mrb[74].mxu0 }
 0x524   : > { %v1889_v39 = vadd.f32 %v4161_v38, %v4987_v4  ;;  %v1880_v40 = vpop.f32.mrb[75].mxu0  ;;  %v1982_v42 = vmax.f32 %v1886_v35, 0.0 }
 0x525   : > { %v1881_v41 = vadd.f32 %v4987_v4, %v1880_v40  ;;  %v1980_v45 = vmax.f32 %v1878_v37, 0.0 }
 0x526   : > { %v1983_v44 = vmax.f32 %v1889_v39, 0.0 }
 0x527   : > { %v1981_v49 = vmax.f32 %v1881_v41, 0.0 }
 0x528   : > { %v2009_v46 = vpack.c.bf16 %v1983_v44, %v1982_v42 }
 0x529   : > { %v2008_v51 = vpack.c.bf16 %v1981_v49, %v1980_v45 }
 0x52b   : > { %4194 = vmatprep.mubr.msk.bf16.mxu0 %vm1226_vm1, %v2008_v51 }
 0x52c   : > { %4195 = vmatmul.mubr.msk.bf16.gmra.mrb[104].mxu0 %vm1226_vm1, %v2009_v46 }
 0x531   : > { %v4164_v47 = vpop.f32.mrb[76].mxu0 }
 0x532   : > { %v1902_v52 = vadd.f32 %v4164_v47, %v4987_v4  ;;  %v1893_v48 = vpop.f32.mrb[77].mxu0 }
 0x533   : > { %v1894_v1 = vadd.f32 %v4987_v4, %v1893_v48  ;;  %v4165_v2 = vpop.f32.mrb[78].mxu0 }
 0x534   : > { %v1905_v15 = vadd.f32 %v4165_v2, %v4987_v4  ;;  %v1896_v16 = vpop.f32.mrb[79].mxu0  ;;  %v1986_v57 = vmax.f32 %v1902_v52, 0.0 }
 0x535   : > { %v1897_v19 = vadd.f32 %v4987_v4, %v1896_v16  ;;  %v1984_v60 = vmax.f32 %v1894_v1, 0.0 }
 0x536   : > { %v1987_v58 = vmax.f32 %v1905_v15, 0.0 }
 0x537   : > { %v1985_v5 = vmax.f32 %v1897_v19, 0.0 }
 0x538   : > { %v2011_v6 = vpack.c.bf16 %v1987_v58, %v1986_v57 }
 0x539   : > { %v2010_v7 = vpack.c.bf16 %v1985_v5, %v1984_v60 }
 0x53b   : > { %4198 = vmatprep.mubr.msk.bf16.mxu0 %vm1226_vm1, %v2010_v7 }
 0x53c   : > { %4199 = vmatmul.mubr.msk.bf16.gmra.mrb[108].mxu0 %vm1226_vm1, %v2011_v6 }
 0x541   : > { %v4168_v8 = vpop.f32.mrb[80].mxu0 }
 0x542   : > { %v1918_v9 = vadd.f32 %v4168_v8, %v4987_v4  ;;  %v1909_v10 = vpop.f32.mrb[81].mxu0 }
 0x543   : > { %v1910_v55 = vadd.f32 %v4987_v4, %v1909_v10  ;;  %v4169_v61 = vpop.f32.mrb[82].mxu0 }
 0x544   : > { %v1921_v62 = vadd.f32 %v4169_v61, %v4987_v4  ;;  %v1912_v0 = vpop.f32.mrb[83].mxu0  ;;  %v1990_v59 = vmax.f32 %v1918_v9, 0.0 }
 0x545   : > { %v1913_v56 = vadd.f32 %v4987_v4, %v1912_v0  ;;  %v1988_v13 = vmax.f32 %v1910_v55, 0.0 }
 0x546   : > { %v1991_v12 = vmax.f32 %v1921_v62, 0.0 }
 0x547   : > { %v1989_v14 = vmax.f32 %v1913_v56, 0.0 }
 0x548   : > { %v2013_v53 = vpack.c.bf16 %v1991_v12, %v1990_v59  ;;  %v5040_v12 = vld [vmem:[%s5550_s7 + $0x1] ss:$0 sm:$0xff] }
 0x549   : > { %v2012_v23 = vpack.c.bf16 %v1989_v14, %v1988_v13 }
 0x54b   : > { %4202 = vmatprep.mubr.msk.bf16.mxu0 %vm1226_vm1, %v2012_v23 }
 0x54c   : > { %4203 = vmatmul.mubr.msk.bf16.gmra.mrb[112].mxu0 %vm1226_vm1, %v2013_v53 }
 0x551   : > { %v4172_v54 = vpop.f32.mrb[84].mxu0 }
 0x552   : > { %v1934_v63 = vadd.f32 %v4172_v54, %v4987_v4  ;;  %v1925_v21 = vpop.f32.mrb[85].mxu0 }
 0x553   : > { %v1926_v20 = vadd.f32 %v4987_v4, %v1925_v21  ;;  %v4173_v33 = vpop.f32.mrb[86].mxu0 }
 0x554   : > { %v1937_v34 = vadd.f32 %v4173_v33, %v4987_v4  ;;  %v1928_v35 = vpop.f32.mrb[87].mxu0  ;;  %v1994_v37 = vmax.f32 %v1934_v63, 0.0 }
 0x555   : > { %v1929_v36 = vadd.f32 %v4987_v4, %v1928_v35  ;;  %v1992_v39 = vmax.f32 %v1926_v20, 0.0 }
 0x556   : > { %v1995_v38 = vmax.f32 %v1937_v34, 0.0 }
 0x557   : > { %v1993_v40 = vmax.f32 %v1929_v36, 0.0 }
 0x558   : > { %v2015_v41 = vpack.c.bf16 %v1995_v38, %v1994_v37  ;;  %v5055_v37 = vld [vmem:[%s5552_s9 + $0x1] ss:$0 sm:$0xff] }
 0x559   : > { %v2014_v42 = vpack.c.bf16 %v1993_v40, %v1992_v39 }
 0x55b   : > { %4206 = vmatprep.mubr.msk.bf16.mxu0 %vm1226_vm1, %v2014_v42 }
 0x55c   : > { %4207 = vmatmul.mubr.msk.bf16.gmra.mrb[116].mxu0 %vm1226_vm1, %v2015_v41 }
 0x561   : > { %v4176_v44 = vpop.f32.mrb[88].mxu0 }
 0x562   : > { %v1950_v45 = vadd.f32 %v4176_v44, %v4987_v4  ;;  %v1941_v49 = vpop.f32.mrb[89].mxu0 }
 0x563   : > { %v1942_v46 = vadd.f32 %v4987_v4, %v1941_v49  ;;  %v4177_v51 = vpop.f32.mrb[90].mxu0 }
 0x564   : > { %v1953_v47 = vadd.f32 %v4177_v51, %v4987_v4  ;;  %v1944_v52 = vpop.f32.mrb[91].mxu0  ;;  %v1998_v1 = vmax.f32 %v1950_v45, 0.0 }
 0x565   : > { %v1945_v48 = vadd.f32 %v4987_v4, %v1944_v52  ;;  %v1996_v15 = vmax.f32 %v1942_v46, 0.0 }
 0x566   : > { %v1999_v2 = vmax.f32 %v1953_v47, 0.0 }
 0x567   : > { %v1997_v16 = vmax.f32 %v1945_v48, 0.0 }
 0x568   : > { %v2017_v19 = vpack.c.bf16 %v1999_v2, %v1998_v1 }
 0x569   : > { %v2016_v57 = vpack.c.bf16 %v1997_v16, %v1996_v15 }
 0x56b   : > { %4210 = vmatprep.mubr.msk.bf16.mxu0 %vm1226_vm1, %v2016_v57 }
 0x56c   : > { %4211 = vmatmul.mubr.msk.bf16.gmra.mrb[120].mxu0 %vm1226_vm1, %v2017_v19 }
 0x571   : > { %v4180_v58 = vpop.f32.mrb[92].mxu0 }
 0x572   : > { %v1966_v60 = vadd.f32 %v4180_v58, %v4987_v4  ;;  %v1957_v5 = vpop.f32.mrb[93].mxu0 }
 0x573   : > { %v1958_v6 = vadd.f32 %v4987_v4, %v1957_v5  ;;  %v4181_v7 = vpop.f32.mrb[94].mxu0 }
 0x574   : > { %v1969_v8 = vadd.f32 %v4181_v7, %v4987_v4  ;;  %v1960_v9 = vpop.f32.mrb[95].mxu0  ;;  %v2002_v55 = vmax.f32 %v1966_v60, 0.0 }
 0x575   : > { %v1961_v10 = vadd.f32 %v4987_v4, %v1960_v9  ;;  %v2000_v62 = vmax.f32 %v1958_v6, 0.0  ;;  %v5046_v4 = vld [vmem:[%s5551_s8 + $0x1] ss:$0 sm:$0xff] }
 0x576   : > { %v2003_v61 = vmax.f32 %v1969_v8, 0.0 }
 0x577   : > { %v2001_v0 = vmax.f32 %v1961_v10, 0.0 }
 0x578   : > { %v2019_v56 = vpack.c.bf16 %v2003_v61, %v2002_v55 }
 0x579   : > { %v2018_v59 = vpack.c.bf16 %v2001_v0, %v2000_v62 }
 0x57b   : > { %4214 = vmatprep.mubr.msk.bf16.mxu0 %vm1226_vm1, %v2018_v59 }
 0x57c   : > { %4215 = vmatmul.mubr.msk.bf16.gmra.mrb[124].mxu0 %vm1226_vm1, %v2019_v56 }
 0x5df   : > { %v4188_v13 = vpop.f32.mrb[96].mxu0 }
 0x5e0   : > { %v2136_v14 = vadd.f32 %v4188_v13, %v5040_v12  ;;  %v2127_v53 = vpop.f32.mrb[97].mxu0 }
 0x5e1   : > { %v2128_v23 = vadd.f32 %v5040_v12, %v2127_v53  ;;  %v4189_v54 = vpop.f32.mrb[98].mxu0 }
 0x5e2   : > { %v2256_v63 = vmax.f32 %v2136_v14, 0.0  ;;  %v2139_v21 = vadd.f32 %v4189_v54, %v5040_v12  ;;  %v2130_v20 = vpop.f32.mrb[99].mxu0 }
 0x5e3   : > { %v2254_v33 = vmax.f32 %v2128_v23, 0.0  ;;  %v2131_v34 = vadd.f32 %v5040_v12, %v2130_v20 }
 0x5e4   : > { %v2296_v35 = vmul.f32 %v5046_v4, %v2256_v63  ;;  %v2257_v36 = vmax.f32 %v2139_v21, 0.0 }
 0x5e5   : > { %v2294_v38 = vmul.f32 %v5046_v4, %v2254_v33  ;;  %v2255_v39 = vmax.f32 %v2131_v34, 0.0 }
 0x5e6   : > { %v2297_v40 = vmul.f32 %v5046_v4, %v2257_v36  ;;  %v5061_v42 = vadd.f32 %v5055_v37, %v2296_v35 }
 0x5e7   : > { %v2295_v41 = vmul.f32 %v5046_v4, %v2255_v39  ;;  %v5067_v45 = vadd.f32 %v5055_v37, %v2294_v38 }
 0x5e8   : > { %v5064_v44 = vadd.f32 %v5055_v37, %v2297_v40 }
 0x5e9   : > { %v5070_v49 = vadd.f32 %v5055_v37, %v2295_v41 }
 0x5ea   : > { %v2367_v46 = vpack.c.bf16 %v5064_v44, %v5061_v42 }
 0x5eb   : > { %v2366_v51 = vpack.c.bf16 %v5070_v49, %v5067_v45 }
 0x5ef   : > { %v4192_v47 = vpop.f32.mrb[100].mxu0 }
 0x5f0   : > { %v2152_v52 = vadd.f32 %v4192_v47, %v5040_v12  ;;  %v2143_v48 = vpop.f32.mrb[101].mxu0 }
 0x5f1   : > { %v2144_v1 = vadd.f32 %v5040_v12, %v2143_v48  ;;  %v4193_v2 = vpop.f32.mrb[102].mxu0 }
 0x5f2   : > { %v2260_v15 = vmax.f32 %v2152_v52, 0.0  ;;  %v2155_v16 = vadd.f32 %v4193_v2, %v5040_v12  ;;  %v2146_v19 = vpop.f32.mrb[103].mxu0 }
 0x5f3   : > { %v2258_v57 = vmax.f32 %v2144_v1, 0.0  ;;  %v2147_v58 = vadd.f32 %v5040_v12, %v2146_v19 }
 0x5f4   : > { %v2300_v60 = vmul.f32 %v5046_v4, %v2260_v15  ;;  %v2261_v5 = vmax.f32 %v2155_v16, 0.0 }
 0x5f5   : > { %v2298_v6 = vmul.f32 %v5046_v4, %v2258_v57  ;;  %v2259_v7 = vmax.f32 %v2147_v58, 0.0 }
 0x5f6   : > { %v2301_v8 = vmul.f32 %v5046_v4, %v2261_v5  ;;  %v5085_v10 = vadd.f32 %v5055_v37, %v2300_v60 }
 0x5f7   : > { %v2299_v9 = vmul.f32 %v5046_v4, %v2259_v7  ;;  %v5091_v61 = vadd.f32 %v5055_v37, %v2298_v6 }
 0x5f8   : > { %v5088_v55 = vadd.f32 %v5055_v37, %v2301_v8 }
 0x5f9   : > { %v5094_v62 = vadd.f32 %v5055_v37, %v2299_v9 }
 0x5fa   : > { %v2369_v0 = vpack.c.bf16 %v5088_v55, %v5085_v10 }
 0x5fb   : > { %v2368_v56 = vpack.c.bf16 %v5094_v62, %v5091_v61 }
 0x5ff   : > { %v4196_v59 = vpop.f32.mrb[104].mxu0 }
 0x600   : > { %v2168_v13 = vadd.f32 %v4196_v59, %v5040_v12  ;;  %v2159_v14 = vpop.f32.mrb[105].mxu0 }
 0x601   : > { %v2160_v53 = vadd.f32 %v5040_v12, %v2159_v14  ;;  %v4197_v23 = vpop.f32.mrb[106].mxu0 }
 0x602   : > { %v2264_v54 = vmax.f32 %v2168_v13, 0.0  ;;  %v2171_v63 = vadd.f32 %v4197_v23, %v5040_v12  ;;  %v2162_v21 = vpop.f32.mrb[107].mxu0 }
 0x603   : > { %v2262_v20 = vmax.f32 %v2160_v53, 0.0  ;;  %v2163_v33 = vadd.f32 %v5040_v12, %v2162_v21 }
 0x604   : > { %v2304_v34 = vmul.f32 %v5046_v4, %v2264_v54  ;;  %v2265_v35 = vmax.f32 %v2171_v63, 0.0 }
 0x605   : > { %v2302_v36 = vmul.f32 %v5046_v4, %v2262_v20  ;;  %v2263_v38 = vmax.f32 %v2163_v33, 0.0 }
 0x606   : > { %v2305_v39 = vmul.f32 %v5046_v4, %v2265_v35  ;;  %v5109_v41 = vadd.f32 %v5055_v37, %v2304_v34 }
 0x607   : > { %v2303_v40 = vmul.f32 %v5046_v4, %v2263_v38  ;;  %v5115_v52 = vadd.f32 %v5055_v37, %v2302_v36 }
 0x608   : > { %v5112_v47 = vadd.f32 %v5055_v37, %v2305_v39 }
 0x609   : > { %v5118_v48 = vadd.f32 %v5055_v37, %v2303_v40 }
 0x60a   : > { %v2371_v1 = vpack.c.bf16 %v5112_v47, %v5109_v41 }
 0x60b   : > { %v2370_v2 = vpack.c.bf16 %v5118_v48, %v5115_v52 }
 0x60f   : > { %v4200_v15 = vpop.f32.mrb[108].mxu0 }
 0x610   : > { %v2184_v16 = vadd.f32 %v4200_v15, %v5040_v12  ;;  %v2175_v19 = vpop.f32.mrb[109].mxu0 }
 0x611   : > { %v2176_v57 = vadd.f32 %v5040_v12, %v2175_v19  ;;  %v4201_v58 = vpop.f32.mrb[110].mxu0 }
 0x612   : > { %v2268_v60 = vmax.f32 %v2184_v16, 0.0  ;;  %v2187_v5 = vadd.f32 %v4201_v58, %v5040_v12  ;;  %v2178_v6 = vpop.f32.mrb[111].mxu0 }
 0x613   : > { %v2266_v7 = vmax.f32 %v2176_v57, 0.0  ;;  %v2179_v8 = vadd.f32 %v5040_v12, %v2178_v6 }
 0x614   : > { %v2308_v9 = vmul.f32 %v5046_v4, %v2268_v60  ;;  %v2269_v59 = vmax.f32 %v2187_v5, 0.0 }
 0x615   : > { %v2306_v13 = vmul.f32 %v5046_v4, %v2266_v7  ;;  %v2267_v14 = vmax.f32 %v2179_v8, 0.0 }
 0x616   : > { %v2309_v53 = vmul.f32 %v5046_v4, %v2269_v59  ;;  %v5133_v54 = vadd.f32 %v5055_v37, %v2308_v9 }
 0x617   : > { %v2307_v23 = vmul.f32 %v5046_v4, %v2267_v14  ;;  %v5139_v21 = vadd.f32 %v5055_v37, %v2306_v13 }
 0x618   : > { %v5136_v63 = vadd.f32 %v5055_v37, %v2309_v53 }
 0x619   : > { %v5142_v20 = vadd.f32 %v5055_v37, %v2307_v23 }
 0x61a   : > { %v2373_v33 = vpack.c.bf16 %v5136_v63, %v5133_v54 }
 0x61b   : > { %v2372_v34 = vpack.c.bf16 %v5142_v20, %v5139_v21 }
 0x61f   : > { %v4204_v35 = vpop.f32.mrb[112].mxu0 }
 0x620   : > { %v2200_v36 = vadd.f32 %v4204_v35, %v5040_v12  ;;  %v2191_v38 = vpop.f32.mrb[113].mxu0 }
 0x621   : > { %v2192_v39 = vadd.f32 %v5040_v12, %v2191_v38  ;;  %v4205_v40 = vpop.f32.mrb[114].mxu0 }
 0x622   : > { %v2272_v15 = vmax.f32 %v2200_v36, 0.0  ;;  %v2203_v16 = vadd.f32 %v4205_v40, %v5040_v12  ;;  %v2194_v19 = vpop.f32.mrb[115].mxu0 }
 0x623   : > { %v2270_v57 = vmax.f32 %v2192_v39, 0.0  ;;  %v2195_v58 = vadd.f32 %v5040_v12, %v2194_v19 }
 0x624   : > { %v2312_v60 = vmul.f32 %v5046_v4, %v2272_v15  ;;  %v2273_v5 = vmax.f32 %v2203_v16, 0.0 }
 0x625   : > { %v2310_v6 = vmul.f32 %v5046_v4, %v2270_v57  ;;  %v2271_v7 = vmax.f32 %v2195_v58, 0.0 }
 0x626   : > { %v2313_v8 = vmul.f32 %v5046_v4, %v2273_v5  ;;  %v2352_v59 = vadd.f32 %v5055_v37, %v2312_v60 }
 0x627   : > { %v2311_v9 = vmul.f32 %v5046_v4, %v2271_v7  ;;  %v2350_v14 = vadd.f32 %v5055_v37, %v2310_v6 }
 0x628   : > { %v2353_v13 = vadd.f32 %v5055_v37, %v2313_v8 }
 0x629   : > { %v2351_v53 = vadd.f32 %v5055_v37, %v2311_v9 }
 0x62a   : > { %v2375_v23 = vpack.c.bf16 %v2353_v13, %v2352_v59 }
 0x62b   : > { %v2374_v35 = vpack.c.bf16 %v2351_v53, %v2350_v14 }
 0x62d   : > { %3903 = vmatprep.subr.bf16.mxu1 %v2374_v35 }
 0x62e   : > { %3904 = vmatpush3.bf16.msra.mxu1 %v2366_v51 }
 0x62f   : > { %v4208_v36 = vpop.f32.mrb[116].mxu0  ;;  %3905 = vmatprep.subr.bf16.mxu1 %v2375_v23 }
 0x630   : > { %v2216_v38 = vadd.f32 %v4208_v36, %v5040_v12  ;;  %v2207_v39 = vpop.f32.mrb[117].mxu0 }
 0x631   : > { %v2208_v40 = vadd.f32 %v5040_v12, %v2207_v39  ;;  %v4209_v15 = vpop.f32.mrb[118].mxu0 }
 0x632   : > { %v2276_v16 = vmax.f32 %v2216_v38, 0.0  ;;  %v2219_v19 = vadd.f32 %v4209_v15, %v5040_v12  ;;  %v2210_v57 = vpop.f32.mrb[119].mxu0  ;;  %3906 = vmatpush3.bf16.msra.mxu1 %v2367_v46 }
 0x633   : > { %v2274_v58 = vmax.f32 %v2208_v40, 0.0  ;;  %v2211_v45 = vadd.f32 %v5040_v12, %v2210_v57 }
 0x634   : > { %v2316_v49 = vmul.f32 %v5046_v4, %v2276_v16  ;;  %v2277_v51 = vmax.f32 %v2219_v19, 0.0 }
 0x635   : > { %v2314_v60 = vmul.f32 %v5046_v4, %v2274_v58  ;;  %v2275_v5 = vmax.f32 %v2211_v45, 0.0 }
 0x636   : > { %v2317_v6 = vmul.f32 %v5046_v4, %v2277_v51  ;;  %v2356_v8 = vadd.f32 %v5055_v37, %v2316_v49 }
 0x637   : > { %v2315_v7 = vmul.f32 %v5046_v4, %v2275_v5  ;;  %v2354_v42 = vadd.f32 %v5055_v37, %v2314_v60 }
 0x638   : > { %v2357_v9 = vadd.f32 %v5055_v37, %v2317_v6 }
 0x639   : > { %v2355_v44 = vadd.f32 %v5055_v37, %v2315_v7 }
 0x63a   : > { %v2377_v46 = vpack.c.bf16 %v2357_v9, %v2356_v8 }
 0x63b   : > { %v2376_v59 = vpack.c.bf16 %v2355_v44, %v2354_v42 }
 0x63d   : > { %3907 = vmatprep.subr.bf16.mxu1 %v2376_v59 }
 0x63e   : > { %3908 = vmatpush3.bf16.msra.mxu1 %v2368_v56 }
 0x63f   : > { %v4212_v13 = vpop.f32.mrb[120].mxu0  ;;  %3909 = vmatprep.subr.bf16.mxu1 %v2377_v46 }
 0x640   : > { %v2232_v14 = vadd.f32 %v4212_v13, %v5040_v12  ;;  %v2223_v53 = vpop.f32.mrb[121].mxu0 }
 0x641   : > { %v2224_v23 = vadd.f32 %v5040_v12, %v2223_v53  ;;  %v4213_v35 = vpop.f32.mrb[122].mxu0 }
 0x642   : > { %v2280_v36 = vmax.f32 %v2232_v14, 0.0  ;;  %v2235_v38 = vadd.f32 %v4213_v35, %v5040_v12  ;;  %v2226_v39 = vpop.f32.mrb[123].mxu0  ;;  %3910 = vmatpush3.bf16.msra.mxu1 %v2369_v0 }
 0x643   : > { %v2278_v40 = vmax.f32 %v2224_v23, 0.0  ;;  %v2227_v61 = vadd.f32 %v5040_v12, %v2226_v39 }
 0x644   : > { %v2320_v62 = vmul.f32 %v5046_v4, %v2280_v36  ;;  %v2281_v56 = vmax.f32 %v2235_v38, 0.0 }
 0x645   : > { %v2318_v15 = vmul.f32 %v5046_v4, %v2278_v40  ;;  %v2279_v16 = vmax.f32 %v2227_v61, 0.0 }
 0x646   : > { %v2321_v19 = vmul.f32 %v5046_v4, %v2281_v56  ;;  %v2360_v58 = vadd.f32 %v5055_v37, %v2320_v62 }
 0x647   : > { %v2319_v57 = vmul.f32 %v5046_v4, %v2279_v16  ;;  %v2358_v10 = vadd.f32 %v5055_v37, %v2318_v15 }
 0x648   : > { %v2361_v45 = vadd.f32 %v5055_v37, %v2321_v19 }
 0x649   : > { %v2359_v55 = vadd.f32 %v5055_v37, %v2319_v57 }
 0x64a   : > { %v2379_v0 = vpack.c.bf16 %v2361_v45, %v2360_v58 }
 0x64b   : > { %v2378_v49 = vpack.c.bf16 %v2359_v55, %v2358_v10 }
 0x64d   : > { %3911 = vmatprep.subr.bf16.mxu1 %v2378_v49 }
 0x64e   : > { %3912 = vmatpush3.bf16.msra.mxu1 %v2370_v2 }
 0x64f   : > { %v4216_v51 = vpop.f32.mrb[124].mxu0  ;;  %3913 = vmatprep.subr.bf16.mxu1 %v2379_v0 }
 0x650   : > { %v2248_v60 = vadd.f32 %v4216_v51, %v5040_v12  ;;  %v2239_v5 = vpop.f32.mrb[125].mxu0 }
 0x651   : > { %v2240_v6 = vadd.f32 %v5040_v12, %v2239_v5  ;;  %v4217_v7 = vpop.f32.mrb[126].mxu0 }
 0x652   : > { %v2284_v8 = vmax.f32 %v2248_v60, 0.0  ;;  %v2251_v9 = vadd.f32 %v4217_v7, %v5040_v12  ;;  %v2242_v42 = vpop.f32.mrb[127].mxu0  ;;  %3914 = vmatpush3.bf16.msra.mxu1 %v2371_v1 }
 0x653   : > { %v2282_v44 = vmax.f32 %v2240_v6, 0.0  ;;  %v2243_v52 = vadd.f32 %v5040_v12, %v2242_v42 }
 0x654   : > { %v2324_v48 = vmul.f32 %v5046_v4, %v2284_v8  ;;  %v2285_v2 = vmax.f32 %v2251_v9, 0.0 }
 0x655   : > { %v2322_v46 = vmul.f32 %v5046_v4, %v2282_v44  ;;  %v2283_v59 = vmax.f32 %v2243_v52, 0.0 }
 0x656   : > { %v2325_v13 = vmul.f32 %v5046_v4, %v2285_v2  ;;  %v2364_v53 = vadd.f32 %v5055_v37, %v2324_v48 }
 0x657   : > { %v2323_v14 = vmul.f32 %v5046_v4, %v2283_v59  ;;  %v2362_v41 = vadd.f32 %v5055_v37, %v2322_v46  ;;  %v4420_v4 = vld [vmem:[%s4525_s30 + $0xf0] ss:$8 sps:$4 sm:$0xff]  }
 0x658   : > { %v2365_v23 = vadd.f32 %v5055_v37, %v2325_v13 }
 0x659   : > { %v2363_v47 = vadd.f32 %v5055_v37, %v2323_v14 }
 0x65a   : > { %v2381_v1 = vpack.c.bf16 %v2365_v23, %v2364_v53 }
 0x65b   : > { %v2380_v12 = vpack.c.bf16 %v2363_v47, %v2362_v41 }
 0x65d   : > { %3915 = vmatprep.subr.bf16.mxu1 %v2380_v12 }
 0x65e   : > { %3916 = vmatpush3.bf16.msra.mxu1 %v2372_v34 }
 0x65f   : > { %3917 = vmatprep.subr.bf16.mxu1 %v2381_v1 }
 0x662   : > { %3918 = vmatpush3.bf16.msra.mxu1 %v2373_v33 }
 0x665   : > { %2415 = vmatmul.mubr.bf16.vlgmr.msra.gmra.mrb[128].mxu1 %v4877_v26  ;;  %v4406_v26 = vld [vmem:[%s4525_s30 + $0x80] ss:$8 sps:$4 sm:$0xff]  }
 0x666   : > { %2422 = vmatprep.mubr.bf16.mxu1 %v4881_v50  ;;  %v4407_v50 = vld [vmem:[%s4525_s30 + $0x94] ss:$8 sps:$4 sm:$0xff]  }
 0x66d   : > { %2423 = vmatmul.mubr.bf16.gmra.mrb[132].mxu1 %v4885_v22  ;;  %v4408_v22 = vld [vmem:[%s4525_s30 + $0x90] ss:$8 sps:$4 sm:$0xff]  }
 0x66e   : > { %2430 = vmatprep.mubr.bf16.mxu1 %v4889_v28  ;;  %v4409_v28 = vld [vmem:[%s4525_s30 + $0xa4] ss:$8 sps:$4 sm:$0xff]  }
 0x675   : > { %2431 = vmatmul.mubr.bf16.gmra.mrb[136].mxu1 %v4893_v25  ;;  %v4410_v25 = vld [vmem:[%s4525_s30 + $0xa0] ss:$8 sps:$4 sm:$0xff]  }
 0x676   : > { %2438 = vmatprep.mubr.bf16.mxu1 %v4897_v27  ;;  %v4411_v27 = vld [vmem:[%s4525_s30 + $0xb4] ss:$8 sps:$4 sm:$0xff]  }
 0x67d   : > { %2439 = vmatmul.mubr.bf16.gmra.mrb[140].mxu1 %v4901_v29  ;;  %v4412_v29 = vld [vmem:[%s4525_s30 + $0xb0] ss:$8 sps:$4 sm:$0xff]  }
 0x67e   : > { %2446 = vmatprep.mubr.bf16.mxu1 %v4905_v11  ;;  %v4413_v11 = vld [vmem:[%s4525_s30 + $0xc4] ss:$8 sps:$4 sm:$0xff]  }
 0x685   : > { %2447 = vmatmul.mubr.bf16.gmra.mrb[144].mxu1 %v4909_v30  ;;  %v4379_v30 = vld [vmem:[%s5547_s4 + $0x10] sm:$0xff]  }
 0x686   : > { %2454 = vmatprep.mubr.bf16.mxu1 %v4913_v24  ;;  %4218 = vmatprep.subr.bf16.mxu0 %v4379_v30  ;;  %v4380_v24 = vld [vmem:[%s5547_s4 + $0x18] sm:$0xff]  }
 0x687   : > { %4219 = vmatpush3.bf16.msra.mxu0 %v4379_v30 }
 0x688   : > { %4220 = vmatprep.subr.bf16.mxu0 %v4380_v24 }
 0x68b   : > { %4221 = vmatpush3.bf16.msra.mxu0 %v4380_v24 }
 0x68d   : > { %2455 = vmatmul.mubr.bf16.gmra.mrb[148].mxu1 %v4917_v3  ;;  %v4414_v3 = vld [vmem:[%s4525_s30 + $0xc0] ss:$8 sps:$4 sm:$0xff]  }
 0x68e   : > { %2462 = vmatprep.mubr.bf16.mxu1 %v4921_v31  ;;  %v4415_v31 = vld [vmem:[%s4525_s30 + $0xd4] ss:$8 sps:$4 sm:$0xff]  }
 0x695   : > { %2463 = vmatmul.mubr.bf16.gmra.mrb[152].mxu1 %v4925_v32  ;;  %v4416_v32 = vld [vmem:[%s4525_s30 + $0xd0] ss:$8 sps:$4 sm:$0xff]  }
 0x696   : > { %2470 = vmatprep.mubr.bf16.mxu1 %v4929_v43  ;;  %v4417_v43 = vld [vmem:[%s4525_s30 + $0xe4] ss:$8 sps:$4 sm:$0xff]  }
 0x69d   : > { %2471 = vmatmul.mubr.bf16.gmra.mrb[156].mxu1 %v4933_v17  ;;  %v4418_v17 = vld [vmem:[%s4525_s30 + $0xe0] ss:$8 sps:$4 sm:$0xff]  }
 0x69e   : > { %2478 = vmatprep.mubr.bf16.mxu1 %v4937_v18  ;;  %v4419_v18 = vld [vmem:[%s4525_s30 + $0xf4] ss:$8 sps:$4 sm:$0xff]  }
 0x6a5   : > { %2479 = vmatmul.mubr.bf16.gmra.mrb[160].mxu1 %v4406_v26 }
 0x6a6   : > { %2486 = vmatprep.mubr.bf16.mxu1 %v4407_v50 }
 0x6ad   : > { %2487 = vmatmul.mubr.bf16.gmra.mrb[164].mxu1 %v4408_v22 }
 0x6ae   : > { %2494 = vmatprep.mubr.bf16.mxu1 %v4409_v28 }
 0x6b5   : > { %2495 = vmatmul.mubr.bf16.gmra.mrb[168].mxu1 %v4410_v25 }
 0x6b6   : > { %2502 = vmatprep.mubr.bf16.mxu1 %v4411_v27 }
 0x6bd   : > { %2503 = vmatmul.mubr.bf16.gmra.mrb[172].mxu1 %v4412_v29 }
 0x6be   : > { %2510 = vmatprep.mubr.bf16.mxu1 %v4413_v11 }
 0x6c5   : > { %2511 = vmatmul.mubr.bf16.gmra.mrb[176].mxu1 %v4414_v3 }
 0x6c6   : > { %2518 = vmatprep.mubr.bf16.mxu1 %v4415_v31 }
 0x6cd   : > { %2519 = vmatmul.mubr.bf16.gmra.mrb[180].mxu1 %v4416_v32 }
 0x6ce   : > { %2526 = vmatprep.mubr.bf16.mxu1 %v4417_v43 }
 0x6d5   : > { %2527 = vmatmul.mubr.bf16.gmra.mrb[184].mxu1 %v4418_v17 }
 0x6d6   : > { %2534 = vmatprep.mubr.bf16.mxu1 %v4419_v18 }
 0x6dd   : > { %2535 = vmatmul.mubr.bf16.gmra.mrb[188].mxu1 %v4420_v4 }
 0x738   : > { %v3919_v37 = vpop.f32.mrb[128].mxu1 }
 0x739   : > { %v3920_v54 = vpop.f32.mrb[129].mxu1 }
 0x73a   : > { %v3921_v63 = vadd.f32 %v3920_v54, %v3919_v37  ;;  %v3922_v21 = vpop.f32.mrb[130].mxu1 }
 0x73b   : > { %v3923_v20 = vpop.f32.mrb[131].mxu1 }
 0x73c   : > { %v3924_v33 = vadd.f32 %v3923_v20, %v3922_v21 }
 0x73e   : > { %v2548_v34 = vpack.c.bf16 %v3924_v33, %v3921_v63 }
 0x740   : > { %v3925_v35 = vpop.f32.mrb[132].mxu1  ;;  %4222 = vmatprep.mubr.msk.bf16.mxu0 %vm1226_vm1, %v2548_v34 }
 0x741   : > { %v3926_v36 = vpop.f32.mrb[133].mxu1 }
 0x742   : > { %v3927_v38 = vadd.f32 %v3926_v36, %v3925_v35  ;;  %v3928_v39 = vpop.f32.mrb[134].mxu1 }
 0x743   : > { %v3929_v40 = vpop.f32.mrb[135].mxu1 }
 0x744   : > { %v3930_v61 = vadd.f32 %v3929_v40, %v3928_v39 }
 0x746   : > { %v2549_v62 = vpack.c.bf16 %v3930_v61, %v3927_v38 }
 0x748   : > { %v3931_v56 = vpop.f32.mrb[136].mxu1  ;;  %4223 = vmatmul.mubr.msk.bf16.vlgmr.msra.gmra.mrb[128].mxu0 %vm1226_vm1, %v2549_v62 }
 0x749   : > { %v3932_v15 = vpop.f32.mrb[137].mxu1 }
 0x74a   : > { %v3933_v16 = vadd.f32 %v3932_v15, %v3931_v56  ;;  %v3934_v19 = vpop.f32.mrb[138].mxu1 }
 0x74b   : > { %v3935_v57 = vpop.f32.mrb[139].mxu1 }
 0x74c   : > { %v3936_v58 = vadd.f32 %v3935_v57, %v3934_v19 }
 0x74e   : > { %v2550_v45 = vpack.c.bf16 %v3936_v58, %v3933_v16 }
 0x750   : > { %v3937_v10 = vpop.f32.mrb[140].mxu1  ;;  %4226 = vmatprep.mubr.msk.bf16.mxu0 %vm1226_vm1, %v2550_v45 }
 0x751   : > { %v3938_v55 = vpop.f32.mrb[141].mxu1 }
 0x752   : > { %v3939_v0 = vadd.f32 %v3938_v55, %v3937_v10  ;;  %v3940_v49 = vpop.f32.mrb[142].mxu1 }
 0x753   : > { %v3941_v51 = vpop.f32.mrb[143].mxu1 }
 0x754   : > { %v3942_v60 = vadd.f32 %v3941_v51, %v3940_v49 }
 0x756   : > { %v2551_v5 = vpack.c.bf16 %v3942_v60, %v3939_v0  ;;  %v4381_v60 = vld [vmem:[%s5549_s6 + $0x20] sm:$0xff]  }
 0x757   : > { %4254 = vmatprep.subr.bf16.mxu0 %v4381_v60 }
 0x758   : > { %v3943_v6 = vpop.f32.mrb[144].mxu1  ;;  %4227 = vmatmul.mubr.msk.bf16.gmra.mrb[132].mxu0 %vm1226_vm1, %v2551_v5 }
 0x759   : > { %v3944_v7 = vpop.f32.mrb[145].mxu1  ;;  %4255 = vmatpush3.bf16.msra.mxu0 %v4381_v60 }
 0x75a   : > { %v3945_v8 = vadd.f32 %v3944_v7, %v3943_v6  ;;  %v3946_v9 = vpop.f32.mrb[146].mxu1  ;;  %v4382_v7 = vld [vmem:[%s5549_s6 + $0x28] sm:$0xff]  }
 0x75b   : > { %v3947_v42 = vpop.f32.mrb[147].mxu1  ;;  %4256 = vmatprep.subr.bf16.mxu0 %v4382_v7 }
 0x75c   : > { %v3948_v44 = vadd.f32 %v3947_v42, %v3946_v9 }
 0x75d   : > { %4257 = vmatpush3.bf16.msra.mxu0 %v4382_v7 }
 0x75e   : > { %v2552_v52 = vpack.c.bf16 %v3948_v44, %v3945_v8 }
 0x760   : > { %v3949_v48 = vpop.f32.mrb[148].mxu1  ;;  %4230 = vmatprep.mubr.msk.bf16.mxu0 %vm1226_vm1, %v2552_v52 }
 0x761   : > { %v3950_v2 = vpop.f32.mrb[149].mxu1 }
 0x762   : > { %v3951_v46 = vadd.f32 %v3950_v2, %v3949_v48  ;;  %v3952_v59 = vpop.f32.mrb[150].mxu1 }
 0x763   : > { %v3953_v13 = vpop.f32.mrb[151].mxu1 }
 0x764   : > { %v3954_v14 = vadd.f32 %v3953_v13, %v3952_v59 }
 0x766   : > { %v2553_v53 = vpack.c.bf16 %v3954_v14, %v3951_v46 }
 0x768   : > { %v3955_v23 = vpop.f32.mrb[152].mxu1  ;;  %4231 = vmatmul.mubr.msk.bf16.gmra.mrb[136].mxu0 %vm1226_vm1, %v2553_v53 }
 0x769   : > { %v3956_v41 = vpop.f32.mrb[153].mxu1 }
 0x76a   : > { %v3957_v47 = vadd.f32 %v3956_v41, %v3955_v23  ;;  %v3958_v1 = vpop.f32.mrb[154].mxu1 }
 0x76b   : > { %v3959_v12 = vpop.f32.mrb[155].mxu1 }
 0x76c   : > { %v3960_v26 = vadd.f32 %v3959_v12, %v3958_v1 }
 0x76e   : > { %v2554_v50 = vpack.c.bf16 %v3960_v26, %v3957_v47 }
 0x770   : > { %v3961_v22 = vpop.f32.mrb[156].mxu1  ;;  %4234 = vmatprep.mubr.msk.bf16.mxu0 %vm1226_vm1, %v2554_v50 }
 0x771   : > { %v3962_v28 = vpop.f32.mrb[157].mxu1 }
 0x772   : > { %v3963_v25 = vadd.f32 %v3962_v28, %v3961_v22  ;;  %v3964_v27 = vpop.f32.mrb[158].mxu1  ;;  %v5282_v28 = vld [vmem:[%s5548_s5 + $0x2] ss:$0 sm:$0xff] }
 0x773   : > { %v3965_v29 = vpop.f32.mrb[159].mxu1 }
 0x774   : > { %v3966_v11 = vadd.f32 %v3965_v29, %v3964_v27 }
 0x776   : > { %v2555_v30 = vpack.c.bf16 %v3966_v11, %v3963_v25 }
 0x778   : > { %v3967_v24 = vpop.f32.mrb[160].mxu1  ;;  %4235 = vmatmul.mubr.msk.bf16.gmra.mrb[140].mxu0 %vm1226_vm1, %v2555_v30 }
 0x779   : > { %v3968_v3 = vpop.f32.mrb[161].mxu1 }
 0x77a   : > { %v3969_v31 = vadd.f32 %v3968_v3, %v3967_v24  ;;  %v3970_v32 = vpop.f32.mrb[162].mxu1 }
 0x77b   : > { %v3971_v43 = vpop.f32.mrb[163].mxu1 }
 0x77c   : > { %v3972_v17 = vadd.f32 %v3971_v43, %v3970_v32 }
 0x77e   : > { %v2556_v18 = vpack.c.bf16 %v3972_v17, %v3969_v31 }
 0x780   : > { %v3973_v4 = vpop.f32.mrb[164].mxu1  ;;  %4238 = vmatprep.mubr.msk.bf16.mxu0 %vm1226_vm1, %v2556_v18 }
 0x781   : > { %v3974_v37 = vpop.f32.mrb[165].mxu1 }
 0x782   : > { %v3975_v54 = vadd.f32 %v3974_v37, %v3973_v4  ;;  %v3976_v63 = vpop.f32.mrb[166].mxu1 }
 0x783   : > { %v3977_v21 = vpop.f32.mrb[167].mxu1 }
 0x784   : > { %v3978_v20 = vadd.f32 %v3977_v21, %v3976_v63 }
 0x786   : > { %v2557_v33 = vpack.c.bf16 %v3978_v20, %v3975_v54 }
 0x788   : > { %4239 = vmatmul.mubr.msk.bf16.gmra.mrb[144].mxu0 %vm1226_vm1, %v2557_v33  ;;  %v3979_v34 = vpop.f32.mrb[168].mxu1 }
 0x789   : > { %v3980_v35 = vpop.f32.mrb[169].mxu1 }
 0x78a   : > { %v3981_v36 = vadd.f32 %v3980_v35, %v3979_v34  ;;  %v3982_v38 = vpop.f32.mrb[170].mxu1 }
 0x78b   : > { %v3983_v39 = vpop.f32.mrb[171].mxu1 }
 0x78c   : > { %v3984_v40 = vadd.f32 %v3983_v39, %v3982_v38 }
 0x78e   : > { %v2558_v61 = vpack.c.bf16 %v3984_v40, %v3981_v36 }
 0x790   : > { %v3985_v62 = vpop.f32.mrb[172].mxu1  ;;  %4242 = vmatprep.mubr.msk.bf16.mxu0 %vm1226_vm1, %v2558_v61 }
 0x791   : > { %v3986_v56 = vpop.f32.mrb[173].mxu1 }
 0x792   : > { %v3987_v15 = vadd.f32 %v3986_v56, %v3985_v62  ;;  %v3988_v16 = vpop.f32.mrb[174].mxu1 }
 0x793   : > { %v3989_v19 = vpop.f32.mrb[175].mxu1 }
 0x794   : > { %v3990_v57 = vadd.f32 %v3989_v19, %v3988_v16 }
 0x796   : > { %v2559_v58 = vpack.c.bf16 %v3990_v57, %v3987_v15 }
 0x798   : > { %4243 = vmatmul.mubr.msk.bf16.gmra.mrb[148].mxu0 %vm1226_vm1, %v2559_v58  ;;  %v3991_v45 = vpop.f32.mrb[176].mxu1 }
 0x799   : > { %v3992_v10 = vpop.f32.mrb[177].mxu1 }
 0x79a   : > { %v3993_v55 = vadd.f32 %v3992_v10, %v3991_v45  ;;  %v3994_v0 = vpop.f32.mrb[178].mxu1 }
 0x79b   : > { %v3995_v49 = vpop.f32.mrb[179].mxu1 }
 0x79c   : > { %v3996_v51 = vadd.f32 %v3995_v49, %v3994_v0 }
 0x79e   : > { %v2560_v5 = vpack.c.bf16 %v3996_v51, %v3993_v55 }
 0x7a0   : > { %v3997_v6 = vpop.f32.mrb[180].mxu1  ;;  %4246 = vmatprep.mubr.msk.bf16.mxu0 %vm1226_vm1, %v2560_v5 }
 0x7a1   : > { %v3998_v8 = vpop.f32.mrb[181].mxu1 }
 0x7a2   : > { %v3999_v9 = vadd.f32 %v3998_v8, %v3997_v6  ;;  %v4000_v42 = vpop.f32.mrb[182].mxu1 }
 0x7a3   : > { %v4001_v44 = vpop.f32.mrb[183].mxu1 }
 0x7a4   : > { %v4002_v52 = vadd.f32 %v4001_v44, %v4000_v42 }
 0x7a6   : > { %v2561_v48 = vpack.c.bf16 %v4002_v52, %v3999_v9 }
 0x7a8   : > { %4247 = vmatmul.mubr.msk.bf16.gmra.mrb[152].mxu0 %vm1226_vm1, %v2561_v48  ;;  %v4003_v2 = vpop.f32.mrb[184].mxu1 }
 0x7a9   : > { %v4004_v46 = vpop.f32.mrb[185].mxu1 }
 0x7aa   : > { %v4005_v59 = vadd.f32 %v4004_v46, %v4003_v2  ;;  %v4006_v13 = vpop.f32.mrb[186].mxu1 }
 0x7ab   : > { %v4007_v14 = vpop.f32.mrb[187].mxu1 }
 0x7ac   : > { %v4008_v53 = vadd.f32 %v4007_v14, %v4006_v13 }
 0x7ae   : > { %v2562_v23 = vpack.c.bf16 %v4008_v53, %v4005_v59 }
 0x7b0   : > { %v4009_v41 = vpop.f32.mrb[188].mxu1  ;;  %4250 = vmatprep.mubr.msk.bf16.mxu0 %vm1226_vm1, %v2562_v23 }
 0x7b1   : > { %v4010_v47 = vpop.f32.mrb[189].mxu1 }
 0x7b2   : > { %v4011_v1 = vadd.f32 %v4010_v47, %v4009_v41  ;;  %v4012_v12 = vpop.f32.mrb[190].mxu1 }
 0x7b3   : > { %v4013_v26 = vpop.f32.mrb[191].mxu1 }
 0x7b4   : > { %v4014_v50 = vadd.f32 %v4013_v26, %v4012_v12 }
 0x7b6   : > { %v2563_v22 = vpack.c.bf16 %v4014_v50, %v4011_v1 }
 0x7b8   : > { %4251 = vmatmul.mubr.msk.bf16.gmra.mrb[156].mxu0 %vm1226_vm1, %v2563_v22 }
 0x81b   : > { %v4224_v25 = vpop.f32.mrb[128].mxu0 }
 0x81c   : > { %v2675_v27 = vadd.f32 %v4224_v25, %v5282_v28  ;;  %v2666_v29 = vpop.f32.mrb[129].mxu0 }
 0x81d   : > { %v2667_v11 = vadd.f32 %v5282_v28, %v2666_v29  ;;  %v4225_v30 = vpop.f32.mrb[130].mxu0 }
 0x81e   : > { %v2678_v24 = vadd.f32 %v4225_v30, %v5282_v28  ;;  %v2669_v3 = vpop.f32.mrb[131].mxu0  ;;  %v2795_v32 = vmax.f32 %v2675_v27, 0.0 }
 0x81f   : > { %v2670_v31 = vadd.f32 %v5282_v28, %v2669_v3  ;;  %v2793_v17 = vmax.f32 %v2667_v11, 0.0 }
 0x820   : > { %v2796_v43 = vmax.f32 %v2678_v24, 0.0 }
 0x821   : > { %v2794_v18 = vmax.f32 %v2670_v31, 0.0 }
 0x822   : > { %v2826_v4 = vpack.c.bf16 %v2796_v43, %v2795_v32 }
 0x823   : > { %v2825_v37 = vpack.c.bf16 %v2794_v18, %v2793_v17 }
 0x825   : > { %4258 = vmatprep.mubr.msk.bf16.mxu0 %vm1226_vm1, %v2825_v37 }
 0x826   : > { %4259 = vmatmul.mubr.msk.bf16.vlgmr.msra.gmra.mrb[160].mxu0 %vm1226_vm1, %v2826_v4 }
 0x82b   : > { %v4228_v54 = vpop.f32.mrb[132].mxu0 }
 0x82c   : > { %v2691_v63 = vadd.f32 %v4228_v54, %v5282_v28  ;;  %v2682_v21 = vpop.f32.mrb[133].mxu0 }
 0x82d   : > { %v2683_v20 = vadd.f32 %v5282_v28, %v2682_v21  ;;  %v4229_v33 = vpop.f32.mrb[134].mxu0 }
 0x82e   : > { %v2694_v34 = vadd.f32 %v4229_v33, %v5282_v28  ;;  %v2685_v35 = vpop.f32.mrb[135].mxu0  ;;  %v2799_v38 = vmax.f32 %v2691_v63, 0.0 }
 0x82f   : > { %v2686_v36 = vadd.f32 %v5282_v28, %v2685_v35  ;;  %v2797_v40 = vmax.f32 %v2683_v20, 0.0 }
 0x830   : > { %v2800_v39 = vmax.f32 %v2694_v34, 0.0 }
 0x831   : > { %v2798_v61 = vmax.f32 %v2686_v36, 0.0 }
 0x832   : > { %v2828_v62 = vpack.c.bf16 %v2800_v39, %v2799_v38 }
 0x833   : > { %v2827_v56 = vpack.c.bf16 %v2798_v61, %v2797_v40 }
 0x835   : > { %4262 = vmatprep.mubr.msk.bf16.mxu0 %vm1226_vm1, %v2827_v56 }
 0x836   : > { %4263 = vmatmul.mubr.msk.bf16.gmra.mrb[164].mxu0 %vm1226_vm1, %v2828_v62 }
 0x83b   : > { %v4232_v15 = vpop.f32.mrb[136].mxu0 }
 0x83c   : > { %v2707_v16 = vadd.f32 %v4232_v15, %v5282_v28  ;;  %v2698_v19 = vpop.f32.mrb[137].mxu0 }
 0x83d   : > { %v2699_v57 = vadd.f32 %v5282_v28, %v2698_v19  ;;  %v4233_v58 = vpop.f32.mrb[138].mxu0 }
 0x83e   : > { %v2710_v45 = vadd.f32 %v4233_v58, %v5282_v28  ;;  %v2701_v10 = vpop.f32.mrb[139].mxu0  ;;  %v2803_v0 = vmax.f32 %v2707_v16, 0.0 }
 0x83f   : > { %v2702_v55 = vadd.f32 %v5282_v28, %v2701_v10  ;;  %v2801_v51 = vmax.f32 %v2699_v57, 0.0 }
 0x840   : > { %v2804_v49 = vmax.f32 %v2710_v45, 0.0 }
 0x841   : > { %v2802_v60 = vmax.f32 %v2702_v55, 0.0 }
 0x842   : > { %v2830_v5 = vpack.c.bf16 %v2804_v49, %v2803_v0 }
 0x843   : > { %v2829_v6 = vpack.c.bf16 %v2802_v60, %v2801_v51 }
 0x845   : > { %4266 = vmatprep.mubr.msk.bf16.mxu0 %vm1226_vm1, %v2829_v6 }
 0x846   : > { %4267 = vmatmul.mubr.msk.bf16.gmra.mrb[168].mxu0 %vm1226_vm1, %v2830_v5 }
 0x84b   : > { %v4236_v7 = vpop.f32.mrb[140].mxu0 }
 0x84c   : > { %v2723_v8 = vadd.f32 %v4236_v7, %v5282_v28  ;;  %v2714_v9 = vpop.f32.mrb[141].mxu0 }
 0x84d   : > { %v2715_v42 = vadd.f32 %v5282_v28, %v2714_v9  ;;  %v4237_v44 = vpop.f32.mrb[142].mxu0 }
 0x84e   : > { %v2726_v52 = vadd.f32 %v4237_v44, %v5282_v28  ;;  %v2717_v48 = vpop.f32.mrb[143].mxu0  ;;  %v2807_v46 = vmax.f32 %v2723_v8, 0.0 }
 0x84f   : > { %v2718_v2 = vadd.f32 %v5282_v28, %v2717_v48  ;;  %v2805_v13 = vmax.f32 %v2715_v42, 0.0 }
 0x850   : > { %v2808_v59 = vmax.f32 %v2726_v52, 0.0 }
 0x851   : > { %v2806_v14 = vmax.f32 %v2718_v2, 0.0  ;;  %v5335_v2 = vld [vmem:[%s5550_s7 + $0x2] ss:$0 sm:$0xff] }
 0x852   : > { %v2832_v53 = vpack.c.bf16 %v2808_v59, %v2807_v46 }
 0x853   : > { %v2831_v23 = vpack.c.bf16 %v2806_v14, %v2805_v13 }
 0x855   : > { %4270 = vmatprep.mubr.msk.bf16.mxu0 %vm1226_vm1, %v2831_v23  ;;  %v5347_v23 = vld.sshfl [vmem:[%s5545_s2] sm:$0x33 pattern:$0x76325410] }
 0x856   : > { %4271 = vmatmul.mubr.msk.bf16.gmra.mrb[172].mxu0 %vm1226_vm1, %v2832_v53 }
 0x85b   : > { %v4240_v41 = vpop.f32.mrb[144].mxu0 }
 0x85c   : > { %v2739_v47 = vadd.f32 %v4240_v41, %v5282_v28  ;;  %v2730_v1 = vpop.f32.mrb[145].mxu0 }
 0x85d   : > { %v2731_v12 = vadd.f32 %v5282_v28, %v2730_v1  ;;  %v4241_v26 = vpop.f32.mrb[146].mxu0 }
 0x85e   : > { %v2742_v50 = vadd.f32 %v4241_v26, %v5282_v28  ;;  %v2733_v22 = vpop.f32.mrb[147].mxu0  ;;  %v2811_v27 = vmax.f32 %v2739_v47, 0.0 }
 0x85f   : > { %v2734_v25 = vadd.f32 %v5282_v28, %v2733_v22  ;;  %v2809_v11 = vmax.f32 %v2731_v12, 0.0  ;;  %v3212_v12 = vcombine.high %v5347_v23, %v5347_v23 }
 0x860   : > { %v2812_v29 = vmax.f32 %v2742_v50, 0.0 }
 0x861   : > { %v2810_v30 = vmax.f32 %v2734_v25, 0.0  ;;  %3247 = vmatprep.mubr.bf16.mxu1 %v3212_v12 }
 0x862   : > { %v2834_v24 = vpack.c.bf16 %v2812_v29, %v2811_v27  ;;  %v5357_v27 = vld [vmem:[%s5552_s9 + $0x2] ss:$0 sm:$0xff] }
 0x863   : > { %v2833_v3 = vpack.c.bf16 %v2810_v30, %v2809_v11 }
 0x865   : > { %4274 = vmatprep.mubr.msk.bf16.mxu0 %vm1226_vm1, %v2833_v3 }
 0x866   : > { %4275 = vmatmul.mubr.msk.bf16.gmra.mrb[176].mxu0 %vm1226_vm1, %v2834_v24 }
 0x86b   : > { %v4244_v31 = vpop.f32.mrb[148].mxu0 }
 0x86c   : > { %v2755_v32 = vadd.f32 %v4244_v31, %v5282_v28  ;;  %v2746_v43 = vpop.f32.mrb[149].mxu0 }
 0x86d   : > { %v2747_v17 = vadd.f32 %v5282_v28, %v2746_v43  ;;  %v4245_v18 = vpop.f32.mrb[150].mxu0 }
 0x86e   : > { %v2758_v4 = vadd.f32 %v4245_v18, %v5282_v28  ;;  %v2749_v37 = vpop.f32.mrb[151].mxu0  ;;  %v2815_v63 = vmax.f32 %v2755_v32, 0.0 }
 0x86f   : > { %v2750_v54 = vadd.f32 %v5282_v28, %v2749_v37  ;;  %v2813_v20 = vmax.f32 %v2747_v17, 0.0 }
 0x870   : > { %v2816_v21 = vmax.f32 %v2758_v4, 0.0 }
 0x871   : > { %v2814_v33 = vmax.f32 %v2750_v54, 0.0 }
 0x872   : > { %v2836_v34 = vpack.c.bf16 %v2816_v21, %v2815_v63 }
 0x873   : > { %v2835_v35 = vpack.c.bf16 %v2814_v33, %v2813_v20 }
 0x875   : > { %4278 = vmatprep.mubr.msk.bf16.mxu0 %vm1226_vm1, %v2835_v35 }
 0x876   : > { %4279 = vmatmul.mubr.msk.bf16.gmra.mrb[180].mxu0 %vm1226_vm1, %v2836_v34 }
 0x87b   : > { %v4248_v36 = vpop.f32.mrb[152].mxu0 }
 0x87c   : > { %v2771_v38 = vadd.f32 %v4248_v36, %v5282_v28  ;;  %v2762_v39 = vpop.f32.mrb[153].mxu0 }
 0x87d   : > { %v2763_v40 = vadd.f32 %v5282_v28, %v2762_v39  ;;  %v4249_v61 = vpop.f32.mrb[154].mxu0 }
 0x87e   : > { %v2774_v62 = vadd.f32 %v4249_v61, %v5282_v28  ;;  %v2765_v56 = vpop.f32.mrb[155].mxu0  ;;  %v2819_v16 = vmax.f32 %v2771_v38, 0.0 }
 0x87f   : > { %v2766_v15 = vadd.f32 %v5282_v28, %v2765_v56  ;;  %v2817_v57 = vmax.f32 %v2763_v40, 0.0 }
 0x880   : > { %v2820_v19 = vmax.f32 %v2774_v62, 0.0 }
 0x881   : > { %v2818_v58 = vmax.f32 %v2766_v15, 0.0 }
 0x882   : > { %v2838_v45 = vpack.c.bf16 %v2820_v19, %v2819_v16 }
 0x883   : > { %v2837_v10 = vpack.c.bf16 %v2818_v58, %v2817_v57 }
 0x885   : > { %4282 = vmatprep.mubr.msk.bf16.mxu0 %vm1226_vm1, %v2837_v10 }
 0x886   : > { %4283 = vmatmul.mubr.msk.bf16.gmra.mrb[184].mxu0 %vm1226_vm1, %v2838_v45 }
 0x88b   : > { %v4252_v55 = vpop.f32.mrb[156].mxu0 }
 0x88c   : > { %v2787_v0 = vadd.f32 %v4252_v55, %v5282_v28  ;;  %v2778_v49 = vpop.f32.mrb[157].mxu0 }
 0x88d   : > { %v2779_v51 = vadd.f32 %v5282_v28, %v2778_v49  ;;  %v4253_v60 = vpop.f32.mrb[158].mxu0 }
 0x88e   : > { %v2790_v5 = vadd.f32 %v4253_v60, %v5282_v28  ;;  %v2781_v6 = vpop.f32.mrb[159].mxu0  ;;  %v2823_v8 = vmax.f32 %v2787_v0, 0.0 }
 0x88f   : > { %v2782_v7 = vadd.f32 %v5282_v28, %v2781_v6  ;;  %v2821_v42 = vmax.f32 %v2779_v51, 0.0  ;;  %v5341_v28 = vld [vmem:[%s5551_s8 + $0x2] ss:$0 sm:$0xff] }
 0x890   : > { %v2824_v9 = vmax.f32 %v2790_v5, 0.0 }
 0x891   : > { %v2822_v44 = vmax.f32 %v2782_v7, 0.0 }
 0x892   : > { %v2840_v52 = vpack.c.bf16 %v2824_v9, %v2823_v8 }
 0x893   : > { %v2839_v48 = vpack.c.bf16 %v2822_v44, %v2821_v42 }
 0x895   : > { %4286 = vmatprep.mubr.msk.bf16.mxu0 %vm1226_vm1, %v2839_v48 }
 0x896   : > { %4287 = vmatmul.mubr.msk.bf16.gmra.mrb[188].mxu0 %vm1226_vm1, %v2840_v52 }
 0x8f9   : > { %v4260_v46 = vpop.f32.mrb[160].mxu0 }
 0x8fa   : > { %v2957_v59 = vadd.f32 %v4260_v46, %v5335_v2  ;;  %v2948_v13 = vpop.f32.mrb[161].mxu0 }
 0x8fb   : > { %v2949_v14 = vadd.f32 %v5335_v2, %v2948_v13  ;;  %v4261_v53 = vpop.f32.mrb[162].mxu0 }
 0x8fc   : > { %v3077_v41 = vmax.f32 %v2957_v59, 0.0  ;;  %v2960_v47 = vadd.f32 %v4261_v53, %v5335_v2  ;;  %v2951_v1 = vpop.f32.mrb[163].mxu0 }
 0x8fd   : > { %v3075_v26 = vmax.f32 %v2949_v14, 0.0  ;;  %v2952_v50 = vadd.f32 %v5335_v2, %v2951_v1 }
 0x8fe   : > { %v3117_v22 = vmul.f32 %v5341_v28, %v3077_v41  ;;  %v3078_v25 = vmax.f32 %v2960_v47, 0.0 }
 0x8ff   : > { %v3115_v29 = vmul.f32 %v5341_v28, %v3075_v26  ;;  %v3076_v11 = vmax.f32 %v2952_v50, 0.0 }
 0x900   : > { %v3118_v30 = vmul.f32 %v5341_v28, %v3078_v25  ;;  %v5363_v3 = vadd.f32 %v5357_v27, %v3117_v22 }
 0x901   : > { %v3116_v24 = vmul.f32 %v5341_v28, %v3076_v11  ;;  %v5369_v32 = vadd.f32 %v5357_v27, %v3115_v29 }
 0x902   : > { %v5366_v31 = vadd.f32 %v5357_v27, %v3118_v30 }
 0x903   : > { %v5372_v43 = vadd.f32 %v5357_v27, %v3116_v24 }
 0x904   : > { %v3188_v17 = vpack.c.bf16 %v5366_v31, %v5363_v3 }
 0x905   : > { %v3187_v18 = vpack.c.bf16 %v5372_v43, %v5369_v32 }
 0x909   : > { %v4264_v4 = vpop.f32.mrb[164].mxu0 }
 0x90a   : > { %v2973_v37 = vadd.f32 %v4264_v4, %v5335_v2  ;;  %v2964_v54 = vpop.f32.mrb[165].mxu0 }
 0x90b   : > { %v2965_v63 = vadd.f32 %v5335_v2, %v2964_v54  ;;  %v4265_v21 = vpop.f32.mrb[166].mxu0 }
 0x90c   : > { %v3081_v20 = vmax.f32 %v2973_v37, 0.0  ;;  %v2976_v33 = vadd.f32 %v4265_v21, %v5335_v2  ;;  %v2967_v34 = vpop.f32.mrb[167].mxu0 }
 0x90d   : > { %v3079_v35 = vmax.f32 %v2965_v63, 0.0  ;;  %v2968_v36 = vadd.f32 %v5335_v2, %v2967_v34 }
 0x90e   : > { %v3121_v38 = vmul.f32 %v5341_v28, %v3081_v20  ;;  %v3082_v39 = vmax.f32 %v2976_v33, 0.0 }
 0x90f   : > { %v3119_v40 = vmul.f32 %v5341_v28, %v3079_v35  ;;  %v3080_v61 = vmax.f32 %v2968_v36, 0.0 }
 0x910   : > { %v3122_v62 = vmul.f32 %v5341_v28, %v3082_v39  ;;  %v5387_v15 = vadd.f32 %v5357_v27, %v3121_v38 }
 0x911   : > { %v3120_v56 = vmul.f32 %v5341_v28, %v3080_v61  ;;  %v5393_v19 = vadd.f32 %v5357_v27, %v3119_v40 }
 0x912   : > { %v5390_v16 = vadd.f32 %v5357_v27, %v3122_v62 }
 0x913   : > { %v5396_v57 = vadd.f32 %v5357_v27, %v3120_v56 }
 0x914   : > { %v3190_v58 = vpack.c.bf16 %v5390_v16, %v5387_v15 }
 0x915   : > { %v3189_v45 = vpack.c.bf16 %v5396_v57, %v5393_v19 }
 0x919   : > { %v4268_v10 = vpop.f32.mrb[168].mxu0 }
 0x91a   : > { %v2989_v55 = vadd.f32 %v4268_v10, %v5335_v2  ;;  %v2980_v0 = vpop.f32.mrb[169].mxu0 }
 0x91b   : > { %v2981_v49 = vadd.f32 %v5335_v2, %v2980_v0  ;;  %v4269_v51 = vpop.f32.mrb[170].mxu0 }
 0x91c   : > { %v3085_v60 = vmax.f32 %v2989_v55, 0.0  ;;  %v2992_v5 = vadd.f32 %v4269_v51, %v5335_v2  ;;  %v2983_v6 = vpop.f32.mrb[171].mxu0 }
 0x91d   : > { %v3083_v7 = vmax.f32 %v2981_v49, 0.0  ;;  %v2984_v8 = vadd.f32 %v5335_v2, %v2983_v6 }
 0x91e   : > { %v3125_v9 = vmul.f32 %v5341_v28, %v3085_v60  ;;  %v3086_v42 = vmax.f32 %v2992_v5, 0.0 }
 0x91f   : > { %v3123_v44 = vmul.f32 %v5341_v28, %v3083_v7  ;;  %v3084_v52 = vmax.f32 %v2984_v8, 0.0 }
 0x920   : > { %v3126_v48 = vmul.f32 %v5341_v28, %v3086_v42  ;;  %v5411_v59 = vadd.f32 %v5357_v27, %v3125_v9 }
 0x921   : > { %v3124_v46 = vmul.f32 %v5341_v28, %v3084_v52  ;;  %v5417_v14 = vadd.f32 %v5357_v27, %v3123_v44 }
 0x922   : > { %v5414_v13 = vadd.f32 %v5357_v27, %v3126_v48 }
 0x923   : > { %v5420_v53 = vadd.f32 %v5357_v27, %v3124_v46 }
 0x924   : > { %v3192_v41 = vpack.c.bf16 %v5414_v13, %v5411_v59 }
 0x925   : > { %v3191_v47 = vpack.c.bf16 %v5420_v53, %v5417_v14 }
 0x929   : > { %v4272_v1 = vpop.f32.mrb[172].mxu0 }
 0x92a   : > { %v3005_v12 = vadd.f32 %v4272_v1, %v5335_v2  ;;  %v2996_v26 = vpop.f32.mrb[173].mxu0 }
 0x92b   : > { %v2997_v50 = vadd.f32 %v5335_v2, %v2996_v26  ;;  %v4273_v22 = vpop.f32.mrb[174].mxu0 }
 0x92c   : > { %v3089_v25 = vmax.f32 %v3005_v12, 0.0  ;;  %v3008_v29 = vadd.f32 %v4273_v22, %v5335_v2  ;;  %v2999_v11 = vpop.f32.mrb[175].mxu0 }
 0x92d   : > { %v3087_v30 = vmax.f32 %v2997_v50, 0.0  ;;  %v3000_v24 = vadd.f32 %v5335_v2, %v2999_v11 }
 0x92e   : > { %v3129_v4 = vmul.f32 %v5341_v28, %v3089_v25  ;;  %v3090_v37 = vmax.f32 %v3008_v29, 0.0 }
 0x92f   : > { %v3127_v54 = vmul.f32 %v5341_v28, %v3087_v30  ;;  %v3088_v63 = vmax.f32 %v3000_v24, 0.0 }
 0x930   : > { %v3130_v21 = vmul.f32 %v5341_v28, %v3090_v37  ;;  %v5435_v33 = vadd.f32 %v5357_v27, %v3129_v4 }
 0x931   : > { %v3128_v20 = vmul.f32 %v5341_v28, %v3088_v63  ;;  %v5441_v35 = vadd.f32 %v5357_v27, %v3127_v54 }
 0x932   : > { %v5438_v34 = vadd.f32 %v5357_v27, %v3130_v21 }
 0x933   : > { %v5444_v36 = vadd.f32 %v5357_v27, %v3128_v20 }
 0x934   : > { %v3194_v38 = vpack.c.bf16 %v5438_v34, %v5435_v33 }
 0x935   : > { %v3193_v39 = vpack.c.bf16 %v5444_v36, %v5441_v35 }
 0x939   : > { %v4276_v40 = vpop.f32.mrb[176].mxu0 }
 0x93a   : > { %v3021_v61 = vadd.f32 %v4276_v40, %v5335_v2  ;;  %v3012_v62 = vpop.f32.mrb[177].mxu0 }
 0x93b   : > { %v3013_v56 = vadd.f32 %v5335_v2, %v3012_v62  ;;  %v4277_v10 = vpop.f32.mrb[178].mxu0 }
 0x93c   : > { %v3093_v55 = vmax.f32 %v3021_v61, 0.0  ;;  %v3024_v0 = vadd.f32 %v4277_v10, %v5335_v2  ;;  %v3015_v49 = vpop.f32.mrb[179].mxu0 }
 0x93d   : > { %v3091_v51 = vmax.f32 %v3013_v56, 0.0  ;;  %v3016_v60 = vadd.f32 %v5335_v2, %v3015_v49 }
 0x93e   : > { %v3133_v5 = vmul.f32 %v5341_v28, %v3093_v55  ;;  %v3094_v6 = vmax.f32 %v3024_v0, 0.0 }
 0x93f   : > { %v3131_v7 = vmul.f32 %v5341_v28, %v3091_v51  ;;  %v3092_v8 = vmax.f32 %v3016_v60, 0.0 }
 0x940   : > { %v3134_v9 = vmul.f32 %v5341_v28, %v3094_v6  ;;  %v3173_v44 = vadd.f32 %v5357_v27, %v3133_v5 }
 0x941   : > { %v3132_v42 = vmul.f32 %v5341_v28, %v3092_v8  ;;  %v3171_v48 = vadd.f32 %v5357_v27, %v3131_v7 }
 0x942   : > { %v3174_v52 = vadd.f32 %v5357_v27, %v3134_v9 }
 0x943   : > { %v3172_v46 = vadd.f32 %v5357_v27, %v3132_v42 }
 0x944   : > { %v3196_v1 = vpack.c.bf16 %v3174_v52, %v3173_v44 }
 0x945   : > { %v3195_v12 = vpack.c.bf16 %v3172_v46, %v3171_v48 }
 0x947   : > { %4051 = vmatprep.subr.bf16.mxu1 %v3195_v12 }
 0x948   : > { %4052 = vmatpush3.bf16.msra.mxu1 %v3187_v18 }
 0x949   : > { %v4280_v26 = vpop.f32.mrb[180].mxu0  ;;  %4053 = vmatprep.subr.bf16.mxu1 %v3196_v1 }
 0x94a   : > { %v3037_v50 = vadd.f32 %v4280_v26, %v5335_v2  ;;  %v3028_v22 = vpop.f32.mrb[181].mxu0 }
 0x94b   : > { %v3029_v25 = vadd.f32 %v5335_v2, %v3028_v22  ;;  %v4281_v29 = vpop.f32.mrb[182].mxu0 }
 0x94c   : > { %v3097_v11 = vmax.f32 %v3037_v50, 0.0  ;;  %v3040_v30 = vadd.f32 %v4281_v29, %v5335_v2  ;;  %v3031_v24 = vpop.f32.mrb[183].mxu0  ;;  %4054 = vmatpush3.bf16.msra.mxu1 %v3188_v17 }
 0x94d   : > { %v3095_v4 = vmax.f32 %v3029_v25, 0.0  ;;  %v3032_v32 = vadd.f32 %v5335_v2, %v3031_v24 }
 0x94e   : > { %v3137_v43 = vmul.f32 %v5341_v28, %v3097_v11  ;;  %v3098_v18 = vmax.f32 %v3040_v30, 0.0 }
 0x94f   : > { %v3135_v37 = vmul.f32 %v5341_v28, %v3095_v4  ;;  %v3096_v54 = vmax.f32 %v3032_v32, 0.0 }
 0x950   : > { %v3138_v63 = vmul.f32 %v5341_v28, %v3098_v18  ;;  %v3177_v20 = vadd.f32 %v5357_v27, %v3137_v43  ;;  %v4429_v18 = vmov 0.0  }
 0x951   : > { %v3136_v21 = vmul.f32 %v5341_v28, %v3096_v54  ;;  %v3175_v3 = vadd.f32 %v5357_v27, %v3135_v37 }
 0x952   : > { %v3178_v40 = vadd.f32 %v5357_v27, %v3138_v63 }
 0x953   : > { %v3176_v31 = vadd.f32 %v5357_v27, %v3136_v21 }
 0x954   : > { %v3198_v17 = vpack.c.bf16 %v3178_v40, %v3177_v20 }
 0x955   : > { %v3197_v61 = vpack.c.bf16 %v3176_v31, %v3175_v3 }
 0x957   : > { %4055 = vmatprep.subr.bf16.mxu1 %v3197_v61 }
 0x958   : > { %4056 = vmatpush3.bf16.msra.mxu1 %v3189_v45 }
 0x959   : > { %v4284_v62 = vpop.f32.mrb[184].mxu0  ;;  %4057 = vmatprep.subr.bf16.mxu1 %v3198_v17 }
 0x95a   : > { %v3053_v56 = vadd.f32 %v4284_v62, %v5335_v2  ;;  %v3044_v10 = vpop.f32.mrb[185].mxu0 }
 0x95b   : > { %v3045_v55 = vadd.f32 %v5335_v2, %v3044_v10  ;;  %v4285_v0 = vpop.f32.mrb[186].mxu0 }
 0x95c   : > { %v3101_v49 = vmax.f32 %v3053_v56, 0.0  ;;  %v3056_v51 = vadd.f32 %v4285_v0, %v5335_v2  ;;  %v3047_v60 = vpop.f32.mrb[187].mxu0  ;;  %4058 = vmatpush3.bf16.msra.mxu1 %v3190_v58 }
 0x95d   : > { %v3099_v5 = vmax.f32 %v3045_v55, 0.0  ;;  %v3048_v19 = vadd.f32 %v5335_v2, %v3047_v60 }
 0x95e   : > { %v3141_v57 = vmul.f32 %v5341_v28, %v3101_v49  ;;  %v3102_v45 = vmax.f32 %v3056_v51, 0.0 }
 0x95f   : > { %v3139_v6 = vmul.f32 %v5341_v28, %v3099_v5  ;;  %v3100_v7 = vmax.f32 %v3048_v19, 0.0 }
 0x960   : > { %v3142_v8 = vmul.f32 %v5341_v28, %v3102_v45  ;;  %v3181_v42 = vadd.f32 %v5357_v27, %v3141_v57 }
 0x961   : > { %v3140_v9 = vmul.f32 %v5341_v28, %v3100_v7  ;;  %v3179_v15 = vadd.f32 %v5357_v27, %v3139_v6 }
 0x962   : > { %v3182_v44 = vadd.f32 %v5357_v27, %v3142_v8 }
 0x963   : > { %v3180_v16 = vadd.f32 %v5357_v27, %v3140_v9 }
 0x964   : > { %v3200_v58 = vpack.c.bf16 %v3182_v44, %v3181_v42 }
 0x965   : > { %v3199_v52 = vpack.c.bf16 %v3180_v16, %v3179_v15 }
 0x967   : > { %4059 = vmatprep.subr.bf16.mxu1 %v3199_v52 }
 0x968   : > { %4060 = vmatpush3.bf16.msra.mxu1 %v3191_v47 }
 0x969   : > { %v4288_v48 = vpop.f32.mrb[188].mxu0  ;;  %4061 = vmatprep.subr.bf16.mxu1 %v3200_v58 }
 0x96a   : > { %v3069_v46 = vadd.f32 %v4288_v48, %v5335_v2  ;;  %v3060_v1 = vpop.f32.mrb[189].mxu0 }
 0x96b   : > { %v3061_v12 = vadd.f32 %v5335_v2, %v3060_v1  ;;  %v4289_v26 = vpop.f32.mrb[190].mxu0 }
 0x96c   : > { %v3105_v50 = vmax.f32 %v3069_v46, 0.0  ;;  %v3072_v22 = vadd.f32 %v4289_v26, %v5335_v2  ;;  %v3063_v25 = vpop.f32.mrb[191].mxu0  ;;  %4062 = vmatpush3.bf16.msra.mxu1 %v3192_v41 }
 0x96d   : > { %v3103_v29 = vmax.f32 %v3061_v12, 0.0  ;;  %v3064_v14 = vadd.f32 %v5335_v2, %v3063_v25 }
 0x96e   : > { %v3145_v53 = vmul.f32 %v5341_v28, %v3105_v50  ;;  %v3106_v47 = vmax.f32 %v3072_v22, 0.0 }
 0x96f   : > { %v3143_v11 = vmul.f32 %v5341_v28, %v3103_v29  ;;  %v3104_v30 = vmax.f32 %v3064_v14, 0.0 }
 0x970   : > { %v3146_v24 = vmul.f32 %v5341_v28, %v3106_v47  ;;  %v3185_v32 = vadd.f32 %v5357_v27, %v3145_v53 }
 0x971   : > { %v3144_v4 = vmul.f32 %v5341_v28, %v3104_v30  ;;  %v3183_v59 = vadd.f32 %v5357_v27, %v3143_v11  ;;  %v4383_v28 = vld [vmem:[%s5553_s10] sm:$0xff]  }
 0x972   : > { %v3186_v43 = vadd.f32 %v5357_v27, %v3146_v24 }
 0x973   : > { %v3184_v13 = vadd.f32 %v5357_v27, %v3144_v4  ;;  %v4384_v27 = vld [vmem:[%s5553_s10 + $0x8] sm:$0xff]  }
 0x974   : > { %v3202_v41 = vpack.c.bf16 %v3186_v43, %v3185_v32 }
 0x975   : > { %v3201_v2 = vpack.c.bf16 %v3184_v13, %v3183_v59 }
 0x977   : > { %4063 = vmatprep.subr.bf16.mxu1 %v3201_v2 }
 0x978   : > { %4064 = vmatpush3.bf16.msra.mxu1 %v3193_v39 }
 0x979   : > { %4065 = vmatprep.subr.bf16.mxu1 %v3202_v41 }
 0x97c   : > { %4066 = vmatpush3.bf16.msra.mxu1 %v3194_v38 }
 0x97d   : > { %4290 = vmatprep.subr.bf16.mxu1 %v4429_v18 }
 0x97f   : > { %3248 = vmatmul.mubr.bf16.vlgmr.msra.gmra.mrb[192].mxu1 %v5347_v23  ;;  %v3600_v23 = vld [vmem:[%s5554_s11] ss:$0 sm:$0xff] }
 0x980   : > { %4291 = vmatpush3.bf16.msra.mxu1 %v4383_v28  ;;  %4294 = vmatprep.mubr.msk.bf16.mxu1 %vm4430_vm2, %v4429_v18 }
 0x981   : > { %4292 = vmatprep.subr.bf16.mxu1 %v4429_v18 }
 0x984   : > { %4293 = vmatpush3.bf16.msra.mxu1 %v4384_v27 }
 0xa52   : > { %v4067_v35 = vpop.f32.mrb[192].mxu1 }
 0xa53   : > { %v4068_v33 = vpop.f32.mrb[193].mxu1 }
 0xa54   : > { %v4069_v34 = vadd.f32 %v4068_v33, %v4067_v35  ;;  %v4070_v36 = vpop.f32.mrb[194].mxu1 }
 0xa55   : > { %v4071_v38 = vpop.f32.mrb[195].mxu1 }
 0xa56   : > { %v3255_v39 = vpack.c.bf16 %v4069_v34, %v4069_v34 }
 0xa58   : > { %4295 = vmatmul.mubr.msk.bf16.vlgmr.msra.gmra.mrb[196].mxu1 %vm1226_vm1, %v3255_v39 }
 0xb2b   : > { %v3316_v37 = vpop.f32.mrb[196].mxu1 }
 0xb2c   : > { %v3317_v54 = vadd.f32 %v3600_v23, %v3316_v37  ;;  %v4296_v63 = vpop.f32.mrb[197].mxu1 }
 0xb2d   : > { %v3319_v21 = vpop.f32.mrb[198].mxu1 }
 0xb2e   : > { %v3323_v20 = vsel %vm3322_vm3, %v3317_v54, -inf  ;;  %v4297_v40 = vpop.f32.mrb[199].mxu1 }
 0xb2f   : > { %3324 = vmax.xlane.f32.xlu0 %v3323_v20 }
 0xbbc   : > { %v3325_v3 = vpop.xlane.xlu0 %3324 }
 0xbbd   : > { %v3326_v31 = vsub.f32 %v3317_v54, %v3325_v3 }
 0xbbf   : > { %v3327_v17 = vmul.f32 1.442695, %v3326_v31 }
 0xbc1   : > { %4385 = vpow2.f32 %v3327_v17 }
 0xbcb   : > { %v4386_v61 = vpop.eup %4385 }
 0xbcc   : > { %v3329_v62 = vsel %vm3322_vm3, %v4386_v61, 0.0 }
 0xbcd   : > { %3330 = vadd.xlane.f32.xlu0 %v3329_v62 }
 0xc5a   : > { %v3331_v56 = vpop.xlane.xlu0 %3330 }
 0xc5b   : > { %4387 = vlog2.f32 %v3331_v56 }
 0xc65   : > { %v4388_v10 = vpop.eup %4387 }
 0xc66   : > { %v3333_v55 = vmul.f32 0.6931472, %v4388_v10 }
 0xc68   : > { %v3334_v0 = vadd.f32 %v3333_v55, %v3325_v3 }
 0xc6a   : > { %v3335_v49 = vsub.f32 %v3317_v54, %v3334_v0 }
 0xc6c   : > { %3336 = vst.msk [vmem:[%s431_s25] sm:$0xf] %vm3322_vm3, %v3335_v49 }
 0xc6d PF: > { %s22_s21 = sadd.s32 1, %s4427_s21  }
 0xc6e   : > { %p19_p4 = scmp.ge.s32.totalorder %s22_s21, 4  }
 0xc70   :  { %21 = sbr.rel (!%p19_p4) target bundleno = 1 (0x1), region = 112 }

</bundles_post_ra>
